<compile_context>
chip_gen: v6e
topology: v6e:2x2x1
jax: 0.10.0
libtpu: 0.0.40
codegen_flags: <defaults>
</compile_context>

<pallas_src>
import functools

import jax
import jax.numpy as jnp
from jax.experimental import pallas as pl
from jax.experimental.pallas import tpu as pltpu

LANE = 128      # channel padding granularity (TPU lane width)
TARGET_M = 512  # target matmul rows (th * Wo) per grid step


def _round_up(x, m):
    return (x + m - 1) // m * m


def _pick_row_tile(ho, wo, target_m=TARGET_M):
    """Divisor of `ho` whose tile (th * wo) is closest to target_m."""
    tgt = max(1, target_m // max(wo, 1))
    divs = [d for d in range(1, ho + 1) if ho % d == 0]
    return min(divs, key=lambda d: (abs(d - tgt), -d))


# ----------------------------------------------------------------------------
# Fused kernel: 3x3 conv (9-tap accumulation) + folded-BN bias
#               [+ residual add | + fused 1x1 shortcut matmul] [+ ReLU]
# ----------------------------------------------------------------------------
def _make_conv_kernel(taps, th, wo, cin, relu, residual_mode):
    """taps: tuple of static (row_off, col_off, chan_off) into the source."""

    def accumulate(src_ref, w_ref):
        i = pl.program_id(1)                       # row-tile index
        row0 = pl.multiple_of(i * th, th)
        acc = None
        # Static 9-tap unroll: every iteration is a lane-dense MXU matmul with
        # f32 accumulation; window slices are pure in-VMEM views.
        for t, (oh, ow, oc) in enumerate(taps):
            win = src_ref[0, pl.ds(row0 + oh, th), pl.ds(ow, wo), pl.ds(oc, cin)]
            win = win.reshape(th * wo, cin)
            part = jnp.dot(win, w_ref[t], preferred_element_type=jnp.float32)
            acc = part if acc is None else acc + part
        return acc

    def epilogue(acc, b_ref, o_ref):
        y = acc + b_ref[...]                       # f32 bias (BN folded)
        if relu:
            y = jnp.maximum(y, 0.0)
        o_ref[0] = y.reshape(th, wo, -1).astype(o_ref.dtype)

    if residual_mode == "none":
        def kernel(src_ref, w_ref, b_ref, o_ref):
            epilogue(accumulate(src_ref, w_ref), b_ref, o_ref)
    elif residual_mode == "add":                   # identity shortcut
        def kernel(src_ref, w_ref, b_ref, r_ref, o_ref):
            acc = accumulate(src_ref, w_ref)
            acc = acc + r_ref[0].reshape(th * wo, -1).astype(jnp.float32)
            epilogue(acc, b_ref, o_ref)
    else:                                          # fused 1x1-conv+BN shortcut
        def kernel(src_ref, w_ref, b_ref, r_ref, ws_ref, o_ref):
            acc = accumulate(src_ref, w_ref)
            r = r_ref[0].reshape(th * wo, -1)
            acc = acc + jnp.dot(r, ws_ref[...], preferred_element_type=jnp.float32)
            epilogue(acc, b_ref, o_ref)
    return kernel


def conv3x3_bn_act(x, w_taps, bias, *, stride, residual=None, shortcut_w=None,
                   relu=True):
    """Fused 3x3 conv (padding=1, bias-free) + folded BN + residual + ReLU.

    x:          (N, H, W, Cp)   channel-padded activations, compute dtype.
    w_taps:     (9, Cp, Coutp)  BN-scale-folded weights, tap-major (HWIO).
    bias:       (Coutp,)        f32 folded BN bias (incl. shortcut BN bias).
    residual:   optional (N, Ho, Wo, Cr); added in the epilogue.  If
                shortcut_w (Cr, Coutp) is given it is matmul'd first
                (fused 1x1 shortcut conv), otherwise added directly.
    """
    n, h, w, cp = x.shape
    coutp = w_taps.shape[-1]
    ho = (h + 2 - 3) // stride + 1
    wo = (w + 2 - 3) // stride + 1

    xp = jnp.pad(x, ((0, 0), (1, 1), (1, 1), (0, 0)))
    if stride == 1:
        src = xp
        taps = tuple((dh, dw, 0) for dh in range(3) for dw in range(3))
    elif stride == 2:
        hp, wp = h + 2, w + 2
        if hp % 2:
            xp = jnp.pad(xp, ((0, 0), (0, 1), (0, 0), (0, 0)))
            hp += 1
        if wp % 2:
            xp = jnp.pad(xp, ((0, 0), (0, 0), (0, 1), (0, 0)))
            wp += 1
        # space-to-depth: stride-2 taps -> unit-offset taps over 4 phases
        src = xp.reshape(n, hp // 2, 2, wp // 2, 2, cp)
        src = src.transpose(0, 1, 3, 2, 4, 5).reshape(n, hp // 2, wp // 2, 4 * cp)
        taps = tuple((dh // 2, dw // 2, ((dh % 2) * 2 + (dw % 2)) * cp)
                     for dh in range(3) for dw in range(3))
    else:
        raise NotImplementedError("stride must be 1 or 2")

    th = _pick_row_tile(ho, wo)          # divisor of ho -> never a ragged tile
    row_tiles = ho // th

    residual_mode = "none"
    if residual is not None:
        residual_mode = "matmul" if shortcut_w is not None else "add"

    kernel = _make_conv_kernel(taps, th, wo, cp, relu, residual_mode)

    in_specs = [
        # Whole padded image: constant block index over the row-tile axis, so
        # it is DMA'd once per image and stays VMEM-resident across row tiles.
        pl.BlockSpec((1,) + src.shape[1:], lambda b, i: (b, 0, 0, 0)),
        # Folded weights / bias: constant index (resident).  On VMEM-tight
        # generations (v7x, 64 MiB) these could be single-buffered via
        # pipeline_mode and vmem_limit_bytes raised; defaults are fine here.
        pl.BlockSpec(w_taps.shape, lambda b, i: (0, 0, 0)),
        pl.BlockSpec((1, coutp), lambda b, i: (0, 0)),
    ]
    args = [src, w_taps, bias.reshape(1, coutp).astype(jnp.float32)]
    if residual is not None:
        in_specs.append(
            pl.BlockSpec((1, th, wo, residual.shape[-1]),
                         lambda b, i: (b, i, 0, 0)))
        args.append(residual)
        if shortcut_w is not None:
            in_specs.append(pl.BlockSpec(shortcut_w.shape, lambda b, i: (0, 0)))
            args.append(shortcut_w)

    return pl.pallas_call(
        kernel,
        out_shape=jax.ShapeDtypeStruct((n, ho, wo, coutp), x.dtype),
        grid_spec=pltpu.PrefetchScalarGridSpec(
            num_scalar_prefetch=0,
            grid=(n, row_tiles),
            in_specs=in_specs,
            out_specs=pl.BlockSpec((1, th, wo, coutp), lambda b, i: (b, i, 0, 0)),
        ),
        compiler_params=pltpu.CompilerParams(
            dimension_semantics=("parallel", "arbitrary")),
    )(*args)


# ----------------------------------------------------------------------------
# Parameter preparation: BN folding, channel padding, dtype cast (done once)
# ----------------------------------------------------------------------------
def _fold_bn(gamma, beta, mean, var, eps=1e-5):
    scale = gamma / jnp.sqrt(var + eps)
    return scale, beta - mean * scale


def _prep_conv3x3_weight(w_oihw, scale, cin_p, cout_p, dtype):
    cout, cin = w_oihw.shape[:2]
    w = w_oihw * scale[:, None, None, None]            # fold BN scale into conv
    w = jnp.transpose(w, (2, 3, 1, 0)).reshape(9, cin, cout)   # tap-major HWIO
    w = jnp.pad(w, ((0, 0), (0, cin_p - cin), (0, cout_p - cout)))
    return w.astype(dtype)


def prepare_layer_params(params, compute_dtype=jnp.bfloat16):
    """Fold BN, pad channels to LANE multiples, cast once (not per forward)."""
    kparams, strides = [], []
    for p in params:
        cout, cin = p["w1"].shape[:2]
        cin_p, cout_p = _round_up(cin, LANE), _round_up(cout, LANE)
        s1, b1 = _fold_bn(*p["bn1"])
        s2, b2 = _fold_bn(*p["bn2"])
        kp = {
            "w1": _prep_conv3x3_weight(p["w1"], s1, cin_p, cout_p, compute_dtype),
            "b1": jnp.pad(b1, (0, cout_p - cout)).astype(jnp.float32),
            "w2": _prep_conv3x3_weight(p["w2"], s2, cout_p, cout_p, compute_dtype),
        }
        b2_total = jnp.pad(b2, (0, cout_p - cout))
        if "ws" in p:                                   # 1x1 shortcut conv + BN
            ss, bs = _fold_bn(*p["bns"])
            ws = (p["ws"][:, :, 0, 0] * ss[:, None]).T  # (Cin, Cout), folded
            ws = jnp.pad(ws, ((0, cin_p - cin), (0, cout_p - cout)))
            kp["ws"] = ws.astype(compute_dtype)
            b2_total = b2_total + jnp.pad(bs, (0, cout_p - cout))
        kp["b2"] = b2_total.astype(jnp.float32)
        kparams.append(kp)
        strides.append(int(p["downsampling"]))
    return tuple(kparams), tuple(strides)


# ----------------------------------------------------------------------------
# ResNetBasicBlock / ResNetLayer forward built on the fused conv kernel
# ----------------------------------------------------------------------------
def resnet_layer_fwd(x_nchw, kparams, *, strides, out_channels, compute_dtype):
    x = jnp.transpose(x_nchw, (0, 2, 3, 1))             # NCHW -> NHWC
    cin = x.shape[-1]
    cin_p = _round_up(cin, LANE)
    x = jnp.pad(x, ((0, 0), (0, 0), (0, 0), (0, cin_p - cin))).astype(compute_dtype)
    for kp, s in zip(kparams, strides):
        # conv1 (3x3, stride s) + BN + ReLU
        h = conv3x3_bn_act(x, kp["w1"], kp["b1"], stride=s, relu=True)
        # conv2 (3x3, stride 1) + BN + residual + ReLU
        if "ws" in kp:                                   # fused 1x1 shortcut
            r = x[:, ::s, ::s, :]
            x = conv3x3_bn_act(h, kp["w2"], kp["b2"], stride=1,
                               residual=r, shortcut_w=kp["ws"], relu=True)
        else:                                            # identity shortcut
            x = conv3x3_bn_act(h, kp["w2"], kp["b2"], stride=1,
                               residual=x, relu=True)
    x = x[..., :out_channels].astype(jnp.float32)
    return jnp.transpose(x, (0, 3, 1, 2))                # NHWC -> NCHW


# ----------------------------------------------------------------------------
# Parameter init (matches the PyTorch module structure) + pure-JAX reference
# ----------------------------------------------------------------------------
def init_bn(key, c):
    k1, k2, k3, k4 = jax.random.split(key, 4)
    gamma = 1.0 + 0.1 * jax.random.normal(k1, (c,), jnp.float32)
    beta = 0.1 * jax.random.normal(k2, (c,), jnp.float32)
    mean = 0.1 * jax.random.normal(k3, (c,), jnp.float32)
    var = 0.5 + jax.random.uniform(k4, (c,), jnp.float32)
    return (gamma, beta, mean, var)


def init_block_params(key, cin, cout, downsampling):
    ks = jax.random.split(key, 6)
    p = {
        "downsampling": downsampling,
        "w1": 0.1 * jax.random.normal(ks[0], (cout, cin, 3, 3), jnp.float32),
        "bn1": init_bn(ks[1], cout),
        "w2": 0.1 * jax.random.normal(ks[2], (cout, cout, 3, 3), jnp.float32),
        "bn2": init_bn(ks[3], cout),
    }
    if cin != cout:  # should_apply_shortcut (expansion = 1)
        p["ws"] = 0.1 * jax.random.normal(ks[4], (cout, cin, 1, 1), jnp.float32)
        p["bns"] = init_bn(ks[5], cout)
    return p


def init_resnet_layer(key, in_channels, out_channels, n=1):
    downsampling = 2 if in_channels != out_channels else 1
    keys = jax.random.split(key, n)
    params = [init_block_params(keys[0], in_channels, out_channels, downsampling)]
    for i in range(1, n):
        params.append(init_block_params(keys[i], out_channels, out_channels, 1))
    return params


def _conv_ref(x_nhwc, w_oihw, stride, pad):
    w = jnp.transpose(w_oihw, (2, 3, 1, 0))   # OIHW -> HWIO
    return jax.lax.conv_general_dilated(
        x_nhwc, w, (stride, stride), ((pad, pad), (pad, pad)),
        dimension_numbers=("NHWC", "HWIO", "NHWC"))


def _bn_ref(x, gamma, beta, mean, var, eps=1e-5):
    return (x - mean) / jnp.sqrt(var + eps) * gamma + beta


def resnet_layer_ref(x_nchw, params):
    x = jnp.transpose(x_nchw, (0, 2, 3, 1))
    for p in params:
        s = p["downsampling"]
        if "ws" in p:
            r = _bn_ref(_conv_ref(x, p["ws"], s, 0), *p["bns"])
        else:
            r = x
        h = jax.nn.relu(_bn_ref(_conv_ref(x, p["w1"], s, 1), *p["bn1"]))
        h = _bn_ref(_conv_ref(h, p["w2"], 1, 1), *p["bn2"])
        x = jax.nn.relu(h + r)
    return jnp.transpose(x, (0, 3, 1, 2))


# ----------------------------------------------------------------------------
if __name__ == "__main__":
    key = jax.random.PRNGKey(0)
    kx, kp = jax.random.split(key)

    in_channels, out_channels, n = 4, 8, 2
    x = jax.random.normal(kx, (2, in_channels, 16, 16), jnp.float32)  # NCHW

    params = init_resnet_layer(kp, in_channels, out_channels, n=n)
    ref = jax.block_until_ready(resnet_layer_ref(x, params))

    # --- f32 mode: tight numerical check against the XLA reference ----------
    kparams32, strides = prepare_layer_params(params, jnp.float32)
    fwd32 = jax.jit(functools.partial(
        resnet_layer_fwd, strides=strides, out_channels=out_channels,
        compute_dtype=jnp.float32))
    out32 = jax.block_until_ready(fwd32(x, kparams32))
    assert out32.shape == (2, out_channels, 8, 8), out32.shape
    assert jnp.allclose(out32, ref, atol=2e-4, rtol=2e-4), \
        float(jnp.max(jnp.abs(out32 - ref)))

    # --- bf16 mode (default / fast path): f32 accumulation, loose check -----
    kparams16, strides16 = prepare_layer_params(params, jnp.bfloat16)
    fwd16 = jax.jit(functools.partial(
        resnet_layer_fwd, strides=strides16, out_channels=out_channels,
        compute_dtype=jnp.bfloat16))
    out16 = jax.block_until_ready(fwd16(x, kparams16))
    assert out16.shape == (2, out_channels, 8, 8), out16.shape
    rel = float(jnp.max(jnp.abs(out16 - ref) / (jnp.abs(ref) + 1.0)))
    assert rel < 0.1, rel

    print("KERNEL_OK")
</pallas_src>

<mosaic_0001>
module attributes {stable_mosaic.version = 11 : i64} {
  func.func @kernel(%arg0: i32, %arg1: i32, %arg2: memref<1x9x9x512xf32, #tpu.memory_space<vmem>>, %arg3: memref<9x128x128xf32, #tpu.memory_space<vmem>>, %arg4: memref<1x128xf32, #tpu.memory_space<vmem>>, %arg5: memref<1x8x8x128xf32, #tpu.memory_space<vmem>>) attributes {dimension_semantics = [#tpu.dimension_semantics<parallel>, #tpu.dimension_semantics<arbitrary>], iteration_bounds = array<i64: 2, 1>, scalar_prefetch = 0 : i64, scratch_operands = 0 : i64, tpu.core_type = #tpu.core_type<tc>, window_params = [{transform_indices = @transform_0, window_bounds = array<i64: 1, 9, 9, 512>}, {pipeline_mode = #tpu.pipeline_mode<synchronous>, transform_indices = @transform_1, window_bounds = array<i64: 9, 128, 128>}, {pipeline_mode = #tpu.pipeline_mode<synchronous>, transform_indices = @transform_2, window_bounds = array<i64: 1, 128>}, {transform_indices = @transform_3, window_bounds = array<i64: 1, 8, 8, 128>}]} {
    %c8_i32 = arith.constant 8 : i32
    %0 = arith.muli %arg1, %c8_i32 : i32
    %1 = tpu.assume_multiple %0, 8 : i32
    %c0_i32 = arith.constant 0 : i32
    %2 = arith.addi %1, %c0_i32 : i32
    %c0 = arith.constant 0 : index
    %3 = arith.index_cast %2 : i32 to index
    %c0_0 = arith.constant 0 : index
    %c0_1 = arith.constant 0 : index
    %4 = vector.load %arg2[%c0, %3, %c0_0, %c0_1] : memref<1x9x9x512xf32, #tpu.memory_space<vmem>>, vector<1x8x8x128xf32>
    %5 = vector.shape_cast %4 : vector<1x8x8x128xf32> to vector<8x8x128xf32>
    %6 = vector.shape_cast %5 : vector<8x8x128xf32> to vector<64x128xf32>
    %c0_2 = arith.constant 0 : index
    %c0_3 = arith.constant 0 : index
    %c0_4 = arith.constant 0 : index
    %7 = vector.load %arg3[%c0_2, %c0_3, %c0_4] : memref<9x128x128xf32, #tpu.memory_space<vmem>>, vector<1x128x128xf32>
    %8 = vector.shape_cast %7 : vector<1x128x128xf32> to vector<128x128xf32>
    %cst = arith.constant dense<0.000000e+00> : vector<64x128xf32>
    %9 = tpu.matmul %6, %8, %cst {dimension_numbers = #tpu.dot_dimension_numbers<[1], [0], [0], [1], [0, 0, 1, 1], [], []>} : vector<64x128xf32>, vector<128x128xf32>, vector<64x128xf32> -> vector<64x128xf32>
    %c0_i32_5 = arith.constant 0 : i32
    %10 = arith.addi %1, %c0_i32_5 : i32
    %c0_6 = arith.constant 0 : index
    %11 = arith.index_cast %10 : i32 to index
    %c0_7 = arith.constant 0 : index
    %c128 = arith.constant 128 : index
    %12 = vector.load %arg2[%c0_6, %11, %c0_7, %c128] : memref<1x9x9x512xf32, #tpu.memory_space<vmem>>, vector<1x8x8x128xf32>
    %13 = vector.shape_cast %12 : vector<1x8x8x128xf32> to vector<8x8x128xf32>
    %14 = vector.shape_cast %13 : vector<8x8x128xf32> to vector<64x128xf32>
    %c1 = arith.constant 1 : index
    %c0_8 = arith.constant 0 : index
    %c0_9 = arith.constant 0 : index
    %15 = vector.load %arg3[%c1, %c0_8, %c0_9] : memref<9x128x128xf32, #tpu.memory_space<vmem>>, vector<1x128x128xf32>
    %16 = vector.shape_cast %15 : vector<1x128x128xf32> to vector<128x128xf32>
    %cst_10 = arith.constant dense<0.000000e+00> : vector<64x128xf32>
    %17 = tpu.matmul %14, %16, %cst_10 {dimension_numbers = #tpu.dot_dimension_numbers<[1], [0], [0], [1], [0, 0, 1, 1], [], []>} : vector<64x128xf32>, vector<128x128xf32>, vector<64x128xf32> -> vector<64x128xf32>
    %18 = arith.addf %9, %17 : vector<64x128xf32>
    %c0_i32_11 = arith.constant 0 : i32
    %19 = arith.addi %1, %c0_i32_11 : i32
    %c0_12 = arith.constant 0 : index
    %20 = arith.index_cast %19 : i32 to index
    %c1_13 = arith.constant 1 : index
    %c0_14 = arith.constant 0 : index
    %21 = vector.load %arg2[%c0_12, %20, %c1_13, %c0_14] : memref<1x9x9x512xf32, #tpu.memory_space<vmem>>, vector<1x8x8x128xf32>
    %22 = vector.shape_cast %21 : vector<1x8x8x128xf32> to vector<8x8x128xf32>
    %23 = vector.shape_cast %22 : vector<8x8x128xf32> to vector<64x128xf32>
    %c2 = arith.constant 2 : index
    %c0_15 = arith.constant 0 : index
    %c0_16 = arith.constant 0 : index
    %24 = vector.load %arg3[%c2, %c0_15, %c0_16] : memref<9x128x128xf32, #tpu.memory_space<vmem>>, vector<1x128x128xf32>
    %25 = vector.shape_cast %24 : vector<1x128x128xf32> to vector<128x128xf32>
    %cst_17 = arith.constant dense<0.000000e+00> : vector<64x128xf32>
    %26 = tpu.matmul %23, %25, %cst_17 {dimension_numbers = #tpu.dot_dimension_numbers<[1], [0], [0], [1], [0, 0, 1, 1], [], []>} : vector<64x128xf32>, vector<128x128xf32>, vector<64x128xf32> -> vector<64x128xf32>
    %27 = arith.addf %18, %26 : vector<64x128xf32>
    %c0_i32_18 = arith.constant 0 : i32
    %28 = arith.addi %1, %c0_i32_18 : i32
    %c0_19 = arith.constant 0 : index
    %29 = arith.index_cast %28 : i32 to index
    %c0_20 = arith.constant 0 : index
    %c256 = arith.constant 256 : index
    %30 = vector.load %arg2[%c0_19, %29, %c0_20, %c256] : memref<1x9x9x512xf32, #tpu.memory_space<vmem>>, vector<1x8x8x128xf32>
    %31 = vector.shape_cast %30 : vector<1x8x8x128xf32> to vector<8x8x128xf32>
    %32 = vector.shape_cast %31 : vector<8x8x128xf32> to vector<64x128xf32>
    %c3 = arith.constant 3 : index
    %c0_21 = arith.constant 0 : index
    %c0_22 = arith.constant 0 : index
    %33 = vector.load %arg3[%c3, %c0_21, %c0_22] : memref<9x128x128xf32, #tpu.memory_space<vmem>>, vector<1x128x128xf32>
    %34 = vector.shape_cast %33 : vector<1x128x128xf32> to vector<128x128xf32>
    %cst_23 = arith.constant dense<0.000000e+00> : vector<64x128xf32>
    %35 = tpu.matmul %32, %34, %cst_23 {dimension_numbers = #tpu.dot_dimension_numbers<[1], [0], [0], [1], [0, 0, 1, 1], [], []>} : vector<64x128xf32>, vector<128x128xf32>, vector<64x128xf32> -> vector<64x128xf32>
    %36 = arith.addf %27, %35 : vector<64x128xf32>
    %c0_i32_24 = arith.constant 0 : i32
    %37 = arith.addi %1, %c0_i32_24 : i32
    %c0_25 = arith.constant 0 : index
    %38 = arith.index_cast %37 : i32 to index
    %c0_26 = arith.constant 0 : index
    %c384 = arith.constant 384 : index
    %39 = vector.load %arg2[%c0_25, %38, %c0_26, %c384] : memref<1x9x9x512xf32, #tpu.memory_space<vmem>>, vector<1x8x8x128xf32>
    %40 = vector.shape_cast %39 : vector<1x8x8x128xf32> to vector<8x8x128xf32>
    %41 = vector.shape_cast %40 : vector<8x8x128xf32> to vector<64x128xf32>
    %c4 = arith.constant 4 : index
    %c0_27 = arith.constant 0 : index
    %c0_28 = arith.constant 0 : index
    %42 = vector.load %arg3[%c4, %c0_27, %c0_28] : memref<9x128x128xf32, #tpu.memory_space<vmem>>, vector<1x128x128xf32>
    %43 = vector.shape_cast %42 : vector<1x128x128xf32> to vector<128x128xf32>
    %cst_29 = arith.constant dense<0.000000e+00> : vector<64x128xf32>
    %44 = tpu.matmul %41, %43, %cst_29 {dimension_numbers = #tpu.dot_dimension_numbers<[1], [0], [0], [1], [0, 0, 1, 1], [], []>} : vector<64x128xf32>, vector<128x128xf32>, vector<64x128xf32> -> vector<64x128xf32>
    %45 = arith.addf %36, %44 : vector<64x128xf32>
    %c0_i32_30 = arith.constant 0 : i32
    %46 = arith.addi %1, %c0_i32_30 : i32
    %c0_31 = arith.constant 0 : index
    %47 = arith.index_cast %46 : i32 to index
    %c1_32 = arith.constant 1 : index
    %c256_33 = arith.constant 256 : index
    %48 = vector.load %arg2[%c0_31, %47, %c1_32, %c256_33] : memref<1x9x9x512xf32, #tpu.memory_space<vmem>>, vector<1x8x8x128xf32>
    %49 = vector.shape_cast %48 : vector<1x8x8x128xf32> to vector<8x8x128xf32>
    %50 = vector.shape_cast %49 : vector<8x8x128xf32> to vector<64x128xf32>
    %c5 = arith.constant 5 : index
    %c0_34 = arith.constant 0 : index
    %c0_35 = arith.constant 0 : index
    %51 = vector.load %arg3[%c5, %c0_34, %c0_35] : memref<9x128x128xf32, #tpu.memory_space<vmem>>, vector<1x128x128xf32>
    %52 = vector.shape_cast %51 : vector<1x128x128xf32> to vector<128x128xf32>
    %cst_36 = arith.constant dense<0.000000e+00> : vector<64x128xf32>
    %53 = tpu.matmul %50, %52, %cst_36 {dimension_numbers = #tpu.dot_dimension_numbers<[1], [0], [0], [1], [0, 0, 1, 1], [], []>} : vector<64x128xf32>, vector<128x128xf32>, vector<64x128xf32> -> vector<64x128xf32>
    %54 = arith.addf %45, %53 : vector<64x128xf32>
    %c1_i32 = arith.constant 1 : i32
    %55 = arith.addi %1, %c1_i32 : i32
    %c0_37 = arith.constant 0 : index
    %56 = arith.index_cast %55 : i32 to index
    %c0_38 = arith.constant 0 : index
    %c0_39 = arith.constant 0 : index
    %57 = vector.load %arg2[%c0_37, %56, %c0_38, %c0_39] : memref<1x9x9x512xf32, #tpu.memory_space<vmem>>, vector<1x8x8x128xf32>
    %58 = vector.shape_cast %57 : vector<1x8x8x128xf32> to vector<8x8x128xf32>
    %59 = vector.shape_cast %58 : vector<8x8x128xf32> to vector<64x128xf32>
    %c6 = arith.constant 6 : index
    %c0_40 = arith.constant 0 : index
    %c0_41 = arith.constant 0 : index
    %60 = vector.load %arg3[%c6, %c0_40, %c0_41] : memref<9x128x128xf32, #tpu.memory_space<vmem>>, vector<1x128x128xf32>
    %61 = vector.shape_cast %60 : vector<1x128x128xf32> to vector<128x128xf32>
    %cst_42 = arith.constant dense<0.000000e+00> : vector<64x128xf32>
    %62 = tpu.matmul %59, %61, %cst_42 {dimension_numbers = #tpu.dot_dimension_numbers<[1], [0], [0], [1], [0, 0, 1, 1], [], []>} : vector<64x128xf32>, vector<128x128xf32>, vector<64x128xf32> -> vector<64x128xf32>
    %63 = arith.addf %54, %62 : vector<64x128xf32>
    %c1_i32_43 = arith.constant 1 : i32
    %64 = arith.addi %1, %c1_i32_43 : i32
    %c0_44 = arith.constant 0 : index
    %65 = arith.index_cast %64 : i32 to index
    %c0_45 = arith.constant 0 : index
    %c128_46 = arith.constant 128 : index
    %66 = vector.load %arg2[%c0_44, %65, %c0_45, %c128_46] : memref<1x9x9x512xf32, #tpu.memory_space<vmem>>, vector<1x8x8x128xf32>
    %67 = vector.shape_cast %66 : vector<1x8x8x128xf32> to vector<8x8x128xf32>
    %68 = vector.shape_cast %67 : vector<8x8x128xf32> to vector<64x128xf32>
    %c7 = arith.constant 7 : index
    %c0_47 = arith.constant 0 : index
    %c0_48 = arith.constant 0 : index
    %69 = vector.load %arg3[%c7, %c0_47, %c0_48] : memref<9x128x128xf32, #tpu.memory_space<vmem>>, vector<1x128x128xf32>
    %70 = vector.shape_cast %69 : vector<1x128x128xf32> to vector<128x128xf32>
    %cst_49 = arith.constant dense<0.000000e+00> : vector<64x128xf32>
    %71 = tpu.matmul %68, %70, %cst_49 {dimension_numbers = #tpu.dot_dimension_numbers<[1], [0], [0], [1], [0, 0, 1, 1], [], []>} : vector<64x128xf32>, vector<128x128xf32>, vector<64x128xf32> -> vector<64x128xf32>
    %72 = arith.addf %63, %71 : vector<64x128xf32>
    %c1_i32_50 = arith.constant 1 : i32
    %73 = arith.addi %1, %c1_i32_50 : i32
    %c0_51 = arith.constant 0 : index
    %74 = arith.index_cast %73 : i32 to index
    %c1_52 = arith.constant 1 : index
    %c0_53 = arith.constant 0 : index
    %75 = vector.load %arg2[%c0_51, %74, %c1_52, %c0_53] : memref<1x9x9x512xf32, #tpu.memory_space<vmem>>, vector<1x8x8x128xf32>
    %76 = vector.shape_cast %75 : vector<1x8x8x128xf32> to vector<8x8x128xf32>
    %77 = vector.shape_cast %76 : vector<8x8x128xf32> to vector<64x128xf32>
    %c8 = arith.constant 8 : index
    %c0_54 = arith.constant 0 : index
    %c0_55 = arith.constant 0 : index
    %78 = vector.load %arg3[%c8, %c0_54, %c0_55] : memref<9x128x128xf32, #tpu.memory_space<vmem>>, vector<1x128x128xf32>
    %79 = vector.shape_cast %78 : vector<1x128x128xf32> to vector<128x128xf32>
    %cst_56 = arith.constant dense<0.000000e+00> : vector<64x128xf32>
    %80 = tpu.matmul %77, %79, %cst_56 {dimension_numbers = #tpu.dot_dimension_numbers<[1], [0], [0], [1], [0, 0, 1, 1], [], []>} : vector<64x128xf32>, vector<128x128xf32>, vector<64x128xf32> -> vector<64x128xf32>
    %81 = arith.addf %72, %80 : vector<64x128xf32>
    %c0_57 = arith.constant 0 : index
    %c0_58 = arith.constant 0 : index
    %82 = vector.load %arg4[%c0_57, %c0_58] : memref<1x128xf32, #tpu.memory_space<vmem>>, vector<1x128xf32>
    %83 = vector.broadcast %82 : vector<1x128xf32> to vector<64x128xf32>
    %84 = arith.addf %81, %83 : vector<64x128xf32>
    %cst_59 = arith.constant 0.000000e+00 : f32
    %85 = vector.broadcast %cst_59 : f32 to vector<64x128xf32>
    %86 = arith.maximumf %84, %85 : vector<64x128xf32>
    %87 = vector.shape_cast %86 : vector<64x128xf32> to vector<8x8x128xf32>
    %c0_60 = arith.constant 0 : index
    %c0_61 = arith.constant 0 : index
    %c0_62 = arith.constant 0 : index
    %c0_63 = arith.constant 0 : index
    %88 = vector.load %arg5[%c0_60, %c0_61, %c0_62, %c0_63] : memref<1x8x8x128xf32, #tpu.memory_space<vmem>>, vector<1x8x8x128xf32>
    %89 = vector.shape_cast %88 : vector<1x8x8x128xf32> to vector<8x8x128xf32>
    %90 = vector.shape_cast %87 : vector<8x8x128xf32> to vector<1x8x8x128xf32>
    tpu.vector_store %arg5[%c0_60, %c0_61, %c0_62, %c0_63], %90 {strides = array<i32>} : memref<1x8x8x128xf32, #tpu.memory_space<vmem>>, vector<1x8x8x128xf32>,
    return
  }
  func.func @transform_0(%arg0: i32, %arg1: i32) -> (i32, i32, i32, i32) {
    %c0_i32 = arith.constant 0 : i32
    %c0_i32_0 = arith.constant 0 : i32
    %c0_i32_1 = arith.constant 0 : i32
    %c0_i32_2 = arith.constant 0 : i32
    return %arg0, %c0_i32, %c0_i32_0, %c0_i32_1 : i32, i32, i32, i32
  }
  func.func @transform_1(%arg0: i32, %arg1: i32) -> (i32, i32, i32) {
    %c0_i32 = arith.constant 0 : i32
    %c0_i32_0 = arith.constant 0 : i32
    %c0_i32_1 = arith.constant 0 : i32
    %c0_i32_2 = arith.constant 0 : i32
    return %c0_i32, %c0_i32_0, %c0_i32_1 : i32, i32, i32
  }
  func.func @transform_2(%arg0: i32, %arg1: i32) -> (i32, i32) {
    %c0_i32 = arith.constant 0 : i32
    %c0_i32_0 = arith.constant 0 : i32
    %c0_i32_1 = arith.constant 0 : i32
    return %c0_i32, %c0_i32_0 : i32, i32
  }
  func.func @transform_3(%arg0: i32, %arg1: i32) -> (i32, i32, i32, i32) {
    %c0_i32 = arith.constant 0 : i32
    %c0_i32_0 = arith.constant 0 : i32
    %c0_i32_1 = arith.constant 0 : i32
    return %arg0, %arg1, %c0_i32, %c0_i32_0 : i32, i32, i32, i32
  }
}

module attributes {stable_mosaic.version = 11 : i64} {
  func.func @kernel(%arg0: i32, %arg1: i32, %arg2: memref<1x10x10x128xf32, #tpu.memory_space<vmem>>, %arg3: memref<9x128x128xf32, #tpu.memory_space<vmem>>, %arg4: memref<1x128xf32, #tpu.memory_space<vmem>>, %arg5: memref<1x8x8x128xf32, #tpu.memory_space<vmem>>, %arg6: memref<128x128xf32, #tpu.memory_space<vmem>>, %arg7: memref<1x8x8x128xf32, #tpu.memory_space<vmem>>) attributes {dimension_semantics = [#tpu.dimension_semantics<parallel>, #tpu.dimension_semantics<arbitrary>], iteration_bounds = array<i64: 2, 1>, scalar_prefetch = 0 : i64, scratch_operands = 0 : i64, tpu.core_type = #tpu.core_type<tc>, window_params = [{transform_indices = @transform_0, window_bounds = array<i64: 1, 10, 10, 128>}, {pipeline_mode = #tpu.pipeline_mode<synchronous>, transform_indices = @transform_1, window_bounds = array<i64: 9, 128, 128>}, {pipeline_mode = #tpu.pipeline_mode<synchronous>, transform_indices = @transform_2, window_bounds = array<i64: 1, 128>}, {transform_indices = @transform_3, window_bounds = array<i64: 1, 8, 8, 128>}, {pipeline_mode = #tpu.pipeline_mode<synchronous>, transform_indices = @transform_4, window_bounds = array<i64: 128, 128>}, {transform_indices = @transform_5, window_bounds = array<i64: 1, 8, 8, 128>}]} {
    %c8_i32 = arith.constant 8 : i32
    %0 = arith.muli %arg1, %c8_i32 : i32
    %1 = tpu.assume_multiple %0, 8 : i32
    %c0_i32 = arith.constant 0 : i32
    %2 = arith.addi %1, %c0_i32 : i32
    %c0 = arith.constant 0 : index
    %3 = arith.index_cast %2 : i32 to index
    %c0_0 = arith.constant 0 : index
    %c0_1 = arith.constant 0 : index
    %4 = vector.load %arg2[%c0, %3, %c0_0, %c0_1] : memref<1x10x10x128xf32, #tpu.memory_space<vmem>>, vector<1x8x8x128xf32>
    %5 = vector.shape_cast %4 : vector<1x8x8x128xf32> to vector<8x8x128xf32>
    %6 = vector.shape_cast %5 : vector<8x8x128xf32> to vector<64x128xf32>
    %c0_2 = arith.constant 0 : index
    %c0_3 = arith.constant 0 : index
    %c0_4 = arith.constant 0 : index
    %7 = vector.load %arg3[%c0_2, %c0_3, %c0_4] : memref<9x128x128xf32, #tpu.memory_space<vmem>>, vector<1x128x128xf32>
    %8 = vector.shape_cast %7 : vector<1x128x128xf32> to vector<128x128xf32>
    %cst = arith.constant dense<0.000000e+00> : vector<64x128xf32>
    %9 = tpu.matmul %6, %8, %cst {dimension_numbers = #tpu.dot_dimension_numbers<[1], [0], [0], [1], [0, 0, 1, 1], [], []>} : vector<64x128xf32>, vector<128x128xf32>, vector<64x128xf32> -> vector<64x128xf32>
    %c0_i32_5 = arith.constant 0 : i32
    %10 = arith.addi %1, %c0_i32_5 : i32
    %c0_6 = arith.constant 0 : index
    %11 = arith.index_cast %10 : i32 to index
    %c1 = arith.constant 1 : index
    %c0_7 = arith.constant 0 : index
    %12 = vector.load %arg2[%c0_6, %11, %c1, %c0_7] : memref<1x10x10x128xf32, #tpu.memory_space<vmem>>, vector<1x8x8x128xf32>
    %13 = vector.shape_cast %12 : vector<1x8x8x128xf32> to vector<8x8x128xf32>
    %14 = vector.shape_cast %13 : vector<8x8x128xf32> to vector<64x128xf32>
    %c1_8 = arith.constant 1 : index
    %c0_9 = arith.constant 0 : index
    %c0_10 = arith.constant 0 : index
    %15 = vector.load %arg3[%c1_8, %c0_9, %c0_10] : memref<9x128x128xf32, #tpu.memory_space<vmem>>, vector<1x128x128xf32>
    %16 = vector.shape_cast %15 : vector<1x128x128xf32> to vector<128x128xf32>
    %cst_11 = arith.constant dense<0.000000e+00> : vector<64x128xf32>
    %17 = tpu.matmul %14, %16, %cst_11 {dimension_numbers = #tpu.dot_dimension_numbers<[1], [0], [0], [1], [0, 0, 1, 1], [], []>} : vector<64x128xf32>, vector<128x128xf32>, vector<64x128xf32> -> vector<64x128xf32>
    %18 = arith.addf %9, %17 : vector<64x128xf32>
    %c0_i32_12 = arith.constant 0 : i32
    %19 = arith.addi %1, %c0_i32_12 : i32
    %c0_13 = arith.constant 0 : index
    %20 = arith.index_cast %19 : i32 to index
    %c2 = arith.constant 2 : index
    %c0_14 = arith.constant 0 : index
    %21 = vector.load %arg2[%c0_13, %20, %c2, %c0_14] : memref<1x10x10x128xf32, #tpu.memory_space<vmem>>, vector<1x8x8x128xf32>
    %22 = vector.shape_cast %21 : vector<1x8x8x128xf32> to vector<8x8x128xf32>
    %23 = vector.shape_cast %22 : vector<8x8x128xf32> to vector<64x128xf32>
    %c2_15 = arith.constant 2 : index
    %c0_16 = arith.constant 0 : index
    %c0_17 = arith.constant 0 : index
    %24 = vector.load %arg3[%c2_15, %c0_16, %c0_17] : memref<9x128x128xf32, #tpu.memory_space<vmem>>, vector<1x128x128xf32>
    %25 = vector.shape_cast %24 : vector<1x128x128xf32> to vector<128x128xf32>
    %cst_18 = arith.constant dense<0.000000e+00> : vector<64x128xf32>
    %26 = tpu.matmul %23, %25, %cst_18 {dimension_numbers = #tpu.dot_dimension_numbers<[1], [0], [0], [1], [0, 0, 1, 1], [], []>} : vector<64x128xf32>, vector<128x128xf32>, vector<64x128xf32> -> vector<64x128xf32>
    %27 = arith.addf %18, %26 : vector<64x128xf32>
    %c1_i32 = arith.constant 1 : i32
    %28 = arith.addi %1, %c1_i32 : i32
    %c0_19 = arith.constant 0 : index
    %29 = arith.index_cast %28 : i32 to index
    %c0_20 = arith.constant 0 : index
    %c0_21 = arith.constant 0 : index
    %30 = vector.load %arg2[%c0_19, %29, %c0_20, %c0_21] : memref<1x10x10x128xf32, #tpu.memory_space<vmem>>, vector<1x8x8x128xf32>
    %31 = vector.shape_cast %30 : vector<1x8x8x128xf32> to vector<8x8x128xf32>
    %32 = vector.shape_cast %31 : vector<8x8x128xf32> to vector<64x128xf32>
    %c3 = arith.constant 3 : index
    %c0_22 = arith.constant 0 : index
    %c0_23 = arith.constant 0 : index
    %33 = vector.load %arg3[%c3, %c0_22, %c0_23] : memref<9x128x128xf32, #tpu.memory_space<vmem>>, vector<1x128x128xf32>
    %34 = vector.shape_cast %33 : vector<1x128x128xf32> to vector<128x128xf32>
    %cst_24 = arith.constant dense<0.000000e+00> : vector<64x128xf32>
    %35 = tpu.matmul %32, %34, %cst_24 {dimension_numbers = #tpu.dot_dimension_numbers<[1], [0], [0], [1], [0, 0, 1, 1], [], []>} : vector<64x128xf32>, vector<128x128xf32>, vector<64x128xf32> -> vector<64x128xf32>
    %36 = arith.addf %27, %35 : vector<64x128xf32>
    %c1_i32_25 = arith.constant 1 : i32
    %37 = arith.addi %1, %c1_i32_25 : i32
    %c0_26 = arith.constant 0 : index
    %38 = arith.index_cast %37 : i32 to index
    %c1_27 = arith.constant 1 : index
    %c0_28 = arith.constant 0 : index
    %39 = vector.load %arg2[%c0_26, %38, %c1_27, %c0_28] : memref<1x10x10x128xf32, #tpu.memory_space<vmem>>, vector<1x8x8x128xf32>
    %40 = vector.shape_cast %39 : vector<1x8x8x128xf32> to vector<8x8x128xf32>
    %41 = vector.shape_cast %40 : vector<8x8x128xf32> to vector<64x128xf32>
    %c4 = arith.constant 4 : index
    %c0_29 = arith.constant 0 : index
    %c0_30 = arith.constant 0 : index
    %42 = vector.load %arg3[%c4, %c0_29, %c0_30] : memref<9x128x128xf32, #tpu.memory_space<vmem>>, vector<1x128x128xf32>
    %43 = vector.shape_cast %42 : vector<1x128x128xf32> to vector<128x128xf32>
    %cst_31 = arith.constant dense<0.000000e+00> : vector<64x128xf32>
    %44 = tpu.matmul %41, %43, %cst_31 {dimension_numbers = #tpu.dot_dimension_numbers<[1], [0], [0], [1], [0, 0, 1, 1], [], []>} : vector<64x128xf32>, vector<128x128xf32>, vector<64x128xf32> -> vector<64x128xf32>
    %45 = arith.addf %36, %44 : vector<64x128xf32>
    %c1_i32_32 = arith.constant 1 : i32
    %46 = arith.addi %1, %c1_i32_32 : i32
    %c0_33 = arith.constant 0 : index
    %47 = arith.index_cast %46 : i32 to index
    %c2_34 = arith.constant 2 : index
    %c0_35 = arith.constant 0 : index
    %48 = vector.load %arg2[%c0_33, %47, %c2_34, %c0_35] : memref<1x10x10x128xf32, #tpu.memory_space<vmem>>, vector<1x8x8x128xf32>
    %49 = vector.shape_cast %48 : vector<1x8x8x128xf32> to vector<8x8x128xf32>
    %50 = vector.shape_cast %49 : vector<8x8x128xf32> to vector<64x128xf32>
    %c5 = arith.constant 5 : index
    %c0_36 = arith.constant 0 : index
    %c0_37 = arith.constant 0 : index
    %51 = vector.load %arg3[%c5, %c0_36, %c0_37] : memref<9x128x128xf32, #tpu.memory_space<vmem>>, vector<1x128x128xf32>
    %52 = vector.shape_cast %51 : vector<1x128x128xf32> to vector<128x128xf32>
    %cst_38 = arith.constant dense<0.000000e+00> : vector<64x128xf32>
    %53 = tpu.matmul %50, %52, %cst_38 {dimension_numbers = #tpu.dot_dimension_numbers<[1], [0], [0], [1], [0, 0, 1, 1], [], []>} : vector<64x128xf32>, vector<128x128xf32>, vector<64x128xf32> -> vector<64x128xf32>
    %54 = arith.addf %45, %53 : vector<64x128xf32>
    %c2_i32 = arith.constant 2 : i32
    %55 = arith.addi %1, %c2_i32 : i32
    %c0_39 = arith.constant 0 : index
    %56 = arith.index_cast %55 : i32 to index
    %c0_40 = arith.constant 0 : index
    %c0_41 = arith.constant 0 : index
    %57 = vector.load %arg2[%c0_39, %56, %c0_40, %c0_41] : memref<1x10x10x128xf32, #tpu.memory_space<vmem>>, vector<1x8x8x128xf32>
    %58 = vector.shape_cast %57 : vector<1x8x8x128xf32> to vector<8x8x128xf32>
    %59 = vector.shape_cast %58 : vector<8x8x128xf32> to vector<64x128xf32>
    %c6 = arith.constant 6 : index
    %c0_42 = arith.constant 0 : index
    %c0_43 = arith.constant 0 : index
    %60 = vector.load %arg3[%c6, %c0_42, %c0_43] : memref<9x128x128xf32, #tpu.memory_space<vmem>>, vector<1x128x128xf32>
    %61 = vector.shape_cast %60 : vector<1x128x128xf32> to vector<128x128xf32>
    %cst_44 = arith.constant dense<0.000000e+00> : vector<64x128xf32>
    %62 = tpu.matmul %59, %61, %cst_44 {dimension_numbers = #tpu.dot_dimension_numbers<[1], [0], [0], [1], [0, 0, 1, 1], [], []>} : vector<64x128xf32>, vector<128x128xf32>, vector<64x128xf32> -> vector<64x128xf32>
    %63 = arith.addf %54, %62 : vector<64x128xf32>
    %c2_i32_45 = arith.constant 2 : i32
    %64 = arith.addi %1, %c2_i32_45 : i32
    %c0_46 = arith.constant 0 : index
    %65 = arith.index_cast %64 : i32 to index
    %c1_47 = arith.constant 1 : index
    %c0_48 = arith.constant 0 : index
    %66 = vector.load %arg2[%c0_46, %65, %c1_47, %c0_48] : memref<1x10x10x128xf32, #tpu.memory_space<vmem>>, vector<1x8x8x128xf32>
    %67 = vector.shape_cast %66 : vector<1x8x8x128xf32> to vector<8x8x128xf32>
    %68 = vector.shape_cast %67 : vector<8x8x128xf32> to vector<64x128xf32>
    %c7 = arith.constant 7 : index
    %c0_49 = arith.constant 0 : index
    %c0_50 = arith.constant 0 : index
    %69 = vector.load %arg3[%c7, %c0_49, %c0_50] : memref<9x128x128xf32, #tpu.memory_space<vmem>>, vector<1x128x128xf32>
    %70 = vector.shape_cast %69 : vector<1x128x128xf32> to vector<128x128xf32>
    %cst_51 = arith.constant dense<0.000000e+00> : vector<64x128xf32>
    %71 = tpu.matmul %68, %70, %cst_51 {dimension_numbers = #tpu.dot_dimension_numbers<[1], [0], [0], [1], [0, 0, 1, 1], [], []>} : vector<64x128xf32>, vector<128x128xf32>, vector<64x128xf32> -> vector<64x128xf32>
    %72 = arith.addf %63, %71 : vector<64x128xf32>
    %c2_i32_52 = arith.constant 2 : i32
    %73 = arith.addi %1, %c2_i32_52 : i32
    %c0_53 = arith.constant 0 : index
    %74 = arith.index_cast %73 : i32 to index
    %c2_54 = arith.constant 2 : index
    %c0_55 = arith.constant 0 : index
    %75 = vector.load %arg2[%c0_53, %74, %c2_54, %c0_55] : memref<1x10x10x128xf32, #tpu.memory_space<vmem>>, vector<1x8x8x128xf32>
    %76 = vector.shape_cast %75 : vector<1x8x8x128xf32> to vector<8x8x128xf32>
    %77 = vector.shape_cast %76 : vector<8x8x128xf32> to vector<64x128xf32>
    %c8 = arith.constant 8 : index
    %c0_56 = arith.constant 0 : index
    %c0_57 = arith.constant 0 : index
    %78 = vector.load %arg3[%c8, %c0_56, %c0_57] : memref<9x128x128xf32, #tpu.memory_space<vmem>>, vector<1x128x128xf32>
    %79 = vector.shape_cast %78 : vector<1x128x128xf32> to vector<128x128xf32>
    %cst_58 = arith.constant dense<0.000000e+00> : vector<64x128xf32>
    %80 = tpu.matmul %77, %79, %cst_58 {dimension_numbers = #tpu.dot_dimension_numbers<[1], [0], [0], [1], [0, 0, 1, 1], [], []>} : vector<64x128xf32>, vector<128x128xf32>, vector<64x128xf32> -> vector<64x128xf32>
    %81 = arith.addf %72, %80 : vector<64x128xf32>
    %c0_59 = arith.constant 0 : index
    %c0_60 = arith.constant 0 : index
    %c0_61 = arith.constant 0 : index
    %c0_62 = arith.constant 0 : index
    %82 = vector.load %arg5[%c0_59, %c0_60, %c0_61, %c0_62] : memref<1x8x8x128xf32, #tpu.memory_space<vmem>>, vector<1x8x8x128xf32>
    %83 = vector.shape_cast %82 : vector<1x8x8x128xf32> to vector<8x8x128xf32>
    %84 = vector.shape_cast %83 : vector<8x8x128xf32> to vector<64x128xf32>
    %c0_63 = arith.constant 0 : index
    %c0_64 = arith.constant 0 : index
    %85 = vector.load %arg6[%c0_63, %c0_64] : memref<128x128xf32, #tpu.memory_space<vmem>>, vector<128x128xf32>
    %cst_65 = arith.constant dense<0.000000e+00> : vector<64x128xf32>
    %86 = tpu.matmul %84, %85, %cst_65 {dimension_numbers = #tpu.dot_dimension_numbers<[1], [0], [0], [1], [0, 0, 1, 1], [], []>} : vector<64x128xf32>, vector<128x128xf32>, vector<64x128xf32> -> vector<64x128xf32>
    %87 = arith.addf %81, %86 : vector<64x128xf32>
    %c0_66 = arith.constant 0 : index
    %c0_67 = arith.constant 0 : index
    %88 = vector.load %arg4[%c0_66, %c0_67] : memref<1x128xf32, #tpu.memory_space<vmem>>, vector<1x128xf32>
    %89 = vector.broadcast %88 : vector<1x128xf32> to vector<64x128xf32>
    %90 = arith.addf %87, %89 : vector<64x128xf32>
    %cst_68 = arith.constant 0.000000e+00 : f32
    %91 = vector.broadcast %cst_68 : f32 to vector<64x128xf32>
    %92 = arith.maximumf %90, %91 : vector<64x128xf32>
    %93 = vector.shape_cast %92 : vector<64x128xf32> to vector<8x8x128xf32>
    %c0_69 = arith.constant 0 : index
    %c0_70 = arith.constant 0 : index
    %c0_71 = arith.constant 0 : index
    %c0_72 = arith.constant 0 : index
    %94 = vector.load %arg7[%c0_69, %c0_70, %c0_71, %c0_72] : memref<1x8x8x128xf32, #tpu.memory_space<vmem>>, vector<1x8x8x128xf32>
    %95 = vector.shape_cast %94 : vector<1x8x8x128xf32> to vector<8x8x128xf32>
    %96 = vector.shape_cast %93 : vector<8x8x128xf32> to vector<1x8x8x128xf32>
    tpu.vector_store %arg7[%c0_69, %c0_70, %c0_71, %c0_72], %96 {strides = array<i32>} : memref<1x8x8x128xf32, #tpu.memory_space<vmem>>, vector<1x8x8x128xf32>,
    return
  }
  func.func @transform_0(%arg0: i32, %arg1: i32) -> (i32, i32, i32, i32) {
    %c0_i32 = arith.constant 0 : i32
    %c0_i32_0 = arith.constant 0 : i32
    %c0_i32_1 = arith.constant 0 : i32
    %c0_i32_2 = arith.constant 0 : i32
    return %arg0, %c0_i32, %c0_i32_0, %c0_i32_1 : i32, i32, i32, i32
  }
  func.func @transform_1(%arg0: i32, %arg1: i32) -> (i32, i32, i32) {
    %c0_i32 = arith.constant 0 : i32
    %c0_i32_0 = arith.constant 0 : i32
    %c0_i32_1 = arith.constant 0 : i32
    %c0_i32_2 = arith.constant 0 : i32
    return %c0_i32, %c0_i32_0, %c0_i32_1 : i32, i32, i32
  }
  func.func @transform_2(%arg0: i32, %arg1: i32) -> (i32, i32) {
    %c0_i32 = arith.constant 0 : i32
    %c0_i32_0 = arith.constant 0 : i32
    %c0_i32_1 = arith.constant 0 : i32
    return %c0_i32, %c0_i32_0 : i32, i32
  }
  func.func @transform_3(%arg0: i32, %arg1: i32) -> (i32, i32, i32, i32) {
    %c0_i32 = arith.constant 0 : i32
    %c0_i32_0 = arith.constant 0 : i32
    %c0_i32_1 = arith.constant 0 : i32
    return %arg0, %arg1, %c0_i32, %c0_i32_0 : i32, i32, i32, i32
  }
  func.func @transform_4(%arg0: i32, %arg1: i32) -> (i32, i32) {
    %c0_i32 = arith.constant 0 : i32
    %c0_i32_0 = arith.constant 0 : i32
    %c0_i32_1 = arith.constant 0 : i32
    return %c0_i32, %c0_i32_0 : i32, i32
  }
  func.func @transform_5(%arg0: i32, %arg1: i32) -> (i32, i32, i32, i32) {
    %c0_i32 = arith.constant 0 : i32
    %c0_i32_0 = arith.constant 0 : i32
    %c0_i32_1 = arith.constant 0 : i32
    return %arg0, %arg1, %c0_i32, %c0_i32_0 : i32, i32, i32, i32
  }
}

module attributes {stable_mosaic.version = 11 : i64} {
  func.func @kernel(%arg0: i32, %arg1: i32, %arg2: memref<1x10x10x128xf32, #tpu.memory_space<vmem>>, %arg3: memref<9x128x128xf32, #tpu.memory_space<vmem>>, %arg4: memref<1x128xf32, #tpu.memory_space<vmem>>, %arg5: memref<1x8x8x128xf32, #tpu.memory_space<vmem>>) attributes {dimension_semantics = [#tpu.dimension_semantics<parallel>, #tpu.dimension_semantics<arbitrary>], iteration_bounds = array<i64: 2, 1>, scalar_prefetch = 0 : i64, scratch_operands = 0 : i64, tpu.core_type = #tpu.core_type<tc>, window_params = [{transform_indices = @transform_0, window_bounds = array<i64: 1, 10, 10, 128>}, {pipeline_mode = #tpu.pipeline_mode<synchronous>, transform_indices = @transform_1, window_bounds = array<i64: 9, 128, 128>}, {pipeline_mode = #tpu.pipeline_mode<synchronous>, transform_indices = @transform_2, window_bounds = array<i64: 1, 128>}, {transform_indices = @transform_3, window_bounds = array<i64: 1, 8, 8, 128>}]} {
    %c8_i32 = arith.constant 8 : i32
    %0 = arith.muli %arg1, %c8_i32 : i32
    %1 = tpu.assume_multiple %0, 8 : i32
    %c0_i32 = arith.constant 0 : i32
    %2 = arith.addi %1, %c0_i32 : i32
    %c0 = arith.constant 0 : index
    %3 = arith.index_cast %2 : i32 to index
    %c0_0 = arith.constant 0 : index
    %c0_1 = arith.constant 0 : index
    %4 = vector.load %arg2[%c0, %3, %c0_0, %c0_1] : memref<1x10x10x128xf32, #tpu.memory_space<vmem>>, vector<1x8x8x128xf32>
    %5 = vector.shape_cast %4 : vector<1x8x8x128xf32> to vector<8x8x128xf32>
    %6 = vector.shape_cast %5 : vector<8x8x128xf32> to vector<64x128xf32>
    %c0_2 = arith.constant 0 : index
    %c0_3 = arith.constant 0 : index
    %c0_4 = arith.constant 0 : index
    %7 = vector.load %arg3[%c0_2, %c0_3, %c0_4] : memref<9x128x128xf32, #tpu.memory_space<vmem>>, vector<1x128x128xf32>
    %8 = vector.shape_cast %7 : vector<1x128x128xf32> to vector<128x128xf32>
    %cst = arith.constant dense<0.000000e+00> : vector<64x128xf32>
    %9 = tpu.matmul %6, %8, %cst {dimension_numbers = #tpu.dot_dimension_numbers<[1], [0], [0], [1], [0, 0, 1, 1], [], []>} : vector<64x128xf32>, vector<128x128xf32>, vector<64x128xf32> -> vector<64x128xf32>
    %c0_i32_5 = arith.constant 0 : i32
    %10 = arith.addi %1, %c0_i32_5 : i32
    %c0_6 = arith.constant 0 : index
    %11 = arith.index_cast %10 : i32 to index
    %c1 = arith.constant 1 : index
    %c0_7 = arith.constant 0 : index
    %12 = vector.load %arg2[%c0_6, %11, %c1, %c0_7] : memref<1x10x10x128xf32, #tpu.memory_space<vmem>>, vector<1x8x8x128xf32>
    %13 = vector.shape_cast %12 : vector<1x8x8x128xf32> to vector<8x8x128xf32>
    %14 = vector.shape_cast %13 : vector<8x8x128xf32> to vector<64x128xf32>
    %c1_8 = arith.constant 1 : index
    %c0_9 = arith.constant 0 : index
    %c0_10 = arith.constant 0 : index
    %15 = vector.load %arg3[%c1_8, %c0_9, %c0_10] : memref<9x128x128xf32, #tpu.memory_space<vmem>>, vector<1x128x128xf32>
    %16 = vector.shape_cast %15 : vector<1x128x128xf32> to vector<128x128xf32>
    %cst_11 = arith.constant dense<0.000000e+00> : vector<64x128xf32>
    %17 = tpu.matmul %14, %16, %cst_11 {dimension_numbers = #tpu.dot_dimension_numbers<[1], [0], [0], [1], [0, 0, 1, 1], [], []>} : vector<64x128xf32>, vector<128x128xf32>, vector<64x128xf32> -> vector<64x128xf32>
    %18 = arith.addf %9, %17 : vector<64x128xf32>
    %c0_i32_12 = arith.constant 0 : i32
    %19 = arith.addi %1, %c0_i32_12 : i32
    %c0_13 = arith.constant 0 : index
    %20 = arith.index_cast %19 : i32 to index
    %c2 = arith.constant 2 : index
    %c0_14 = arith.constant 0 : index
    %21 = vector.load %arg2[%c0_13, %20, %c2, %c0_14] : memref<1x10x10x128xf32, #tpu.memory_space<vmem>>, vector<1x8x8x128xf32>
    %22 = vector.shape_cast %21 : vector<1x8x8x128xf32> to vector<8x8x128xf32>
    %23 = vector.shape_cast %22 : vector<8x8x128xf32> to vector<64x128xf32>
    %c2_15 = arith.constant 2 : index
    %c0_16 = arith.constant 0 : index
    %c0_17 = arith.constant 0 : index
    %24 = vector.load %arg3[%c2_15, %c0_16, %c0_17] : memref<9x128x128xf32, #tpu.memory_space<vmem>>, vector<1x128x128xf32>
    %25 = vector.shape_cast %24 : vector<1x128x128xf32> to vector<128x128xf32>
    %cst_18 = arith.constant dense<0.000000e+00> : vector<64x128xf32>
    %26 = tpu.matmul %23, %25, %cst_18 {dimension_numbers = #tpu.dot_dimension_numbers<[1], [0], [0], [1], [0, 0, 1, 1], [], []>} : vector<64x128xf32>, vector<128x128xf32>, vector<64x128xf32> -> vector<64x128xf32>
    %27 = arith.addf %18, %26 : vector<64x128xf32>
    %c1_i32 = arith.constant 1 : i32
    %28 = arith.addi %1, %c1_i32 : i32
    %c0_19 = arith.constant 0 : index
    %29 = arith.index_cast %28 : i32 to index
    %c0_20 = arith.constant 0 : index
    %c0_21 = arith.constant 0 : index
    %30 = vector.load %arg2[%c0_19, %29, %c0_20, %c0_21] : memref<1x10x10x128xf32, #tpu.memory_space<vmem>>, vector<1x8x8x128xf32>
    %31 = vector.shape_cast %30 : vector<1x8x8x128xf32> to vector<8x8x128xf32>
    %32 = vector.shape_cast %31 : vector<8x8x128xf32> to vector<64x128xf32>
    %c3 = arith.constant 3 : index
    %c0_22 = arith.constant 0 : index
    %c0_23 = arith.constant 0 : index
    %33 = vector.load %arg3[%c3, %c0_22, %c0_23] : memref<9x128x128xf32, #tpu.memory_space<vmem>>, vector<1x128x128xf32>
    %34 = vector.shape_cast %33 : vector<1x128x128xf32> to vector<128x128xf32>
    %cst_24 = arith.constant dense<0.000000e+00> : vector<64x128xf32>
    %35 = tpu.matmul %32, %34, %cst_24 {dimension_numbers = #tpu.dot_dimension_numbers<[1], [0], [0], [1], [0, 0, 1, 1], [], []>} : vector<64x128xf32>, vector<128x128xf32>, vector<64x128xf32> -> vector<64x128xf32>
    %36 = arith.addf %27, %35 : vector<64x128xf32>
    %c1_i32_25 = arith.constant 1 : i32
    %37 = arith.addi %1, %c1_i32_25 : i32
    %c0_26 = arith.constant 0 : index
    %38 = arith.index_cast %37 : i32 to index
    %c1_27 = arith.constant 1 : index
    %c0_28 = arith.constant 0 : index
    %39 = vector.load %arg2[%c0_26, %38, %c1_27, %c0_28] : memref<1x10x10x128xf32, #tpu.memory_space<vmem>>, vector<1x8x8x128xf32>
    %40 = vector.shape_cast %39 : vector<1x8x8x128xf32> to vector<8x8x128xf32>
    %41 = vector.shape_cast %40 : vector<8x8x128xf32> to vector<64x128xf32>
    %c4 = arith.constant 4 : index
    %c0_29 = arith.constant 0 : index
    %c0_30 = arith.constant 0 : index
    %42 = vector.load %arg3[%c4, %c0_29, %c0_30] : memref<9x128x128xf32, #tpu.memory_space<vmem>>, vector<1x128x128xf32>
    %43 = vector.shape_cast %42 : vector<1x128x128xf32> to vector<128x128xf32>
    %cst_31 = arith.constant dense<0.000000e+00> : vector<64x128xf32>
    %44 = tpu.matmul %41, %43, %cst_31 {dimension_numbers = #tpu.dot_dimension_numbers<[1], [0], [0], [1], [0, 0, 1, 1], [], []>} : vector<64x128xf32>, vector<128x128xf32>, vector<64x128xf32> -> vector<64x128xf32>
    %45 = arith.addf %36, %44 : vector<64x128xf32>
    %c1_i32_32 = arith.constant 1 : i32
    %46 = arith.addi %1, %c1_i32_32 : i32
    %c0_33 = arith.constant 0 : index
    %47 = arith.index_cast %46 : i32 to index
    %c2_34 = arith.constant 2 : index
    %c0_35 = arith.constant 0 : index
    %48 = vector.load %arg2[%c0_33, %47, %c2_34, %c0_35] : memref<1x10x10x128xf32, #tpu.memory_space<vmem>>, vector<1x8x8x128xf32>
    %49 = vector.shape_cast %48 : vector<1x8x8x128xf32> to vector<8x8x128xf32>
    %50 = vector.shape_cast %49 : vector<8x8x128xf32> to vector<64x128xf32>
    %c5 = arith.constant 5 : index
    %c0_36 = arith.constant 0 : index
    %c0_37 = arith.constant 0 : index
    %51 = vector.load %arg3[%c5, %c0_36, %c0_37] : memref<9x128x128xf32, #tpu.memory_space<vmem>>, vector<1x128x128xf32>
    %52 = vector.shape_cast %51 : vector<1x128x128xf32> to vector<128x128xf32>
    %cst_38 = arith.constant dense<0.000000e+00> : vector<64x128xf32>
    %53 = tpu.matmul %50, %52, %cst_38 {dimension_numbers = #tpu.dot_dimension_numbers<[1], [0], [0], [1], [0, 0, 1, 1], [], []>} : vector<64x128xf32>, vector<128x128xf32>, vector<64x128xf32> -> vector<64x128xf32>
    %54 = arith.addf %45, %53 : vector<64x128xf32>
    %c2_i32 = arith.constant 2 : i32
    %55 = arith.addi %1, %c2_i32 : i32
    %c0_39 = arith.constant 0 : index
    %56 = arith.index_cast %55 : i32 to index
    %c0_40 = arith.constant 0 : index
    %c0_41 = arith.constant 0 : index
    %57 = vector.load %arg2[%c0_39, %56, %c0_40, %c0_41] : memref<1x10x10x128xf32, #tpu.memory_space<vmem>>, vector<1x8x8x128xf32>
    %58 = vector.shape_cast %57 : vector<1x8x8x128xf32> to vector<8x8x128xf32>
    %59 = vector.shape_cast %58 : vector<8x8x128xf32> to vector<64x128xf32>
    %c6 = arith.constant 6 : index
    %c0_42 = arith.constant 0 : index
    %c0_43 = arith.constant 0 : index
    %60 = vector.load %arg3[%c6, %c0_42, %c0_43] : memref<9x128x128xf32, #tpu.memory_space<vmem>>, vector<1x128x128xf32>
    %61 = vector.shape_cast %60 : vector<1x128x128xf32> to vector<128x128xf32>
    %cst_44 = arith.constant dense<0.000000e+00> : vector<64x128xf32>
    %62 = tpu.matmul %59, %61, %cst_44 {dimension_numbers = #tpu.dot_dimension_numbers<[1], [0], [0], [1], [0, 0, 1, 1], [], []>} : vector<64x128xf32>, vector<128x128xf32>, vector<64x128xf32> -> vector<64x128xf32>
    %63 = arith.addf %54, %62 : vector<64x128xf32>
    %c2_i32_45 = arith.constant 2 : i32
    %64 = arith.addi %1, %c2_i32_45 : i32
    %c0_46 = arith.constant 0 : index
    %65 = arith.index_cast %64 : i32 to index
    %c1_47 = arith.constant 1 : index
    %c0_48 = arith.constant 0 : index
    %66 = vector.load %arg2[%c0_46, %65, %c1_47, %c0_48] : memref<1x10x10x128xf32, #tpu.memory_space<vmem>>, vector<1x8x8x128xf32>
    %67 = vector.shape_cast %66 : vector<1x8x8x128xf32> to vector<8x8x128xf32>
    %68 = vector.shape_cast %67 : vector<8x8x128xf32> to vector<64x128xf32>
    %c7 = arith.constant 7 : index
    %c0_49 = arith.constant 0 : index
    %c0_50 = arith.constant 0 : index
    %69 = vector.load %arg3[%c7, %c0_49, %c0_50] : memref<9x128x128xf32, #tpu.memory_space<vmem>>, vector<1x128x128xf32>
    %70 = vector.shape_cast %69 : vector<1x128x128xf32> to vector<128x128xf32>
    %cst_51 = arith.constant dense<0.000000e+00> : vector<64x128xf32>
    %71 = tpu.matmul %68, %70, %cst_51 {dimension_numbers = #tpu.dot_dimension_numbers<[1], [0], [0], [1], [0, 0, 1, 1], [], []>} : vector<64x128xf32>, vector<128x128xf32>, vector<64x128xf32> -> vector<64x128xf32>
    %72 = arith.addf %63, %71 : vector<64x128xf32>
    %c2_i32_52 = arith.constant 2 : i32
    %73 = arith.addi %1, %c2_i32_52 : i32
    %c0_53 = arith.constant 0 : index
    %74 = arith.index_cast %73 : i32 to index
    %c2_54 = arith.constant 2 : index
    %c0_55 = arith.constant 0 : index
    %75 = vector.load %arg2[%c0_53, %74, %c2_54, %c0_55] : memref<1x10x10x128xf32, #tpu.memory_space<vmem>>, vector<1x8x8x128xf32>
    %76 = vector.shape_cast %75 : vector<1x8x8x128xf32> to vector<8x8x128xf32>
    %77 = vector.shape_cast %76 : vector<8x8x128xf32> to vector<64x128xf32>
    %c8 = arith.constant 8 : index
    %c0_56 = arith.constant 0 : index
    %c0_57 = arith.constant 0 : index
    %78 = vector.load %arg3[%c8, %c0_56, %c0_57] : memref<9x128x128xf32, #tpu.memory_space<vmem>>, vector<1x128x128xf32>
    %79 = vector.shape_cast %78 : vector<1x128x128xf32> to vector<128x128xf32>
    %cst_58 = arith.constant dense<0.000000e+00> : vector<64x128xf32>
    %80 = tpu.matmul %77, %79, %cst_58 {dimension_numbers = #tpu.dot_dimension_numbers<[1], [0], [0], [1], [0, 0, 1, 1], [], []>} : vector<64x128xf32>, vector<128x128xf32>, vector<64x128xf32> -> vector<64x128xf32>
    %81 = arith.addf %72, %80 : vector<64x128xf32>
    %c0_59 = arith.constant 0 : index
    %c0_60 = arith.constant 0 : index
    %82 = vector.load %arg4[%c0_59, %c0_60] : memref<1x128xf32, #tpu.memory_space<vmem>>, vector<1x128xf32>
    %83 = vector.broadcast %82 : vector<1x128xf32> to vector<64x128xf32>
    %84 = arith.addf %81, %83 : vector<64x128xf32>
    %cst_61 = arith.constant 0.000000e+00 : f32
    %85 = vector.broadcast %cst_61 : f32 to vector<64x128xf32>
    %86 = arith.maximumf %84, %85 : vector<64x128xf32>
    %87 = vector.shape_cast %86 : vector<64x128xf32> to vector<8x8x128xf32>
    %c0_62 = arith.constant 0 : index
    %c0_63 = arith.constant 0 : index
    %c0_64 = arith.constant 0 : index
    %c0_65 = arith.constant 0 : index
    %88 = vector.load %arg5[%c0_62, %c0_63, %c0_64, %c0_65] : memref<1x8x8x128xf32, #tpu.memory_space<vmem>>, vector<1x8x8x128xf32>
    %89 = vector.shape_cast %88 : vector<1x8x8x128xf32> to vector<8x8x128xf32>
    %90 = vector.shape_cast %87 : vector<8x8x128xf32> to vector<1x8x8x128xf32>
    tpu.vector_store %arg5[%c0_62, %c0_63, %c0_64, %c0_65], %90 {strides = array<i32>} : memref<1x8x8x128xf32, #tpu.memory_space<vmem>>, vector<1x8x8x128xf32>,
    return
  }
  func.func @transform_0(%arg0: i32, %arg1: i32) -> (i32, i32, i32, i32) {
    %c0_i32 = arith.constant 0 : i32
    %c0_i32_0 = arith.constant 0 : i32
    %c0_i32_1 = arith.constant 0 : i32
    %c0_i32_2 = arith.constant 0 : i32
    return %arg0, %c0_i32, %c0_i32_0, %c0_i32_1 : i32, i32, i32, i32
  }
  func.func @transform_1(%arg0: i32, %arg1: i32) -> (i32, i32, i32) {
    %c0_i32 = arith.constant 0 : i32
    %c0_i32_0 = arith.constant 0 : i32
    %c0_i32_1 = arith.constant 0 : i32
    %c0_i32_2 = arith.constant 0 : i32
    return %c0_i32, %c0_i32_0, %c0_i32_1 : i32, i32, i32
  }
  func.func @transform_2(%arg0: i32, %arg1: i32) -> (i32, i32) {
    %c0_i32 = arith.constant 0 : i32
    %c0_i32_0 = arith.constant 0 : i32
    %c0_i32_1 = arith.constant 0 : i32
    return %c0_i32, %c0_i32_0 : i32, i32
  }
  func.func @transform_3(%arg0: i32, %arg1: i32) -> (i32, i32, i32, i32) {
    %c0_i32 = arith.constant 0 : i32
    %c0_i32_0 = arith.constant 0 : i32
    %c0_i32_1 = arith.constant 0 : i32
    return %arg0, %arg1, %c0_i32, %c0_i32_0 : i32, i32, i32, i32
  }
}

module attributes {stable_mosaic.version = 11 : i64} {
  func.func @kernel(%arg0: i32, %arg1: i32, %arg2: memref<1x10x10x128xf32, #tpu.memory_space<vmem>>, %arg3: memref<9x128x128xf32, #tpu.memory_space<vmem>>, %arg4: memref<1x128xf32, #tpu.memory_space<vmem>>, %arg5: memref<1x8x8x128xf32, #tpu.memory_space<vmem>>, %arg6: memref<1x8x8x128xf32, #tpu.memory_space<vmem>>) attributes {dimension_semantics = [#tpu.dimension_semantics<parallel>, #tpu.dimension_semantics<arbitrary>], iteration_bounds = array<i64: 2, 1>, scalar_prefetch = 0 : i64, scratch_operands = 0 : i64, tpu.core_type = #tpu.core_type<tc>, window_params = [{transform_indices = @transform_0, window_bounds = array<i64: 1, 10, 10, 128>}, {pipeline_mode = #tpu.pipeline_mode<synchronous>, transform_indices = @transform_1, window_bounds = array<i64: 9, 128, 128>}, {pipeline_mode = #tpu.pipeline_mode<synchronous>, transform_indices = @transform_2, window_bounds = array<i64: 1, 128>}, {transform_indices = @transform_3, window_bounds = array<i64: 1, 8, 8, 128>}, {transform_indices = @transform_4, window_bounds = array<i64: 1, 8, 8, 128>}]} {
    %c8_i32 = arith.constant 8 : i32
    %0 = arith.muli %arg1, %c8_i32 : i32
    %1 = tpu.assume_multiple %0, 8 : i32
    %c0_i32 = arith.constant 0 : i32
    %2 = arith.addi %1, %c0_i32 : i32
    %c0 = arith.constant 0 : index
    %3 = arith.index_cast %2 : i32 to index
    %c0_0 = arith.constant 0 : index
    %c0_1 = arith.constant 0 : index
    %4 = vector.load %arg2[%c0, %3, %c0_0, %c0_1] : memref<1x10x10x128xf32, #tpu.memory_space<vmem>>, vector<1x8x8x128xf32>
    %5 = vector.shape_cast %4 : vector<1x8x8x128xf32> to vector<8x8x128xf32>
    %6 = vector.shape_cast %5 : vector<8x8x128xf32> to vector<64x128xf32>
    %c0_2 = arith.constant 0 : index
    %c0_3 = arith.constant 0 : index
    %c0_4 = arith.constant 0 : index
    %7 = vector.load %arg3[%c0_2, %c0_3, %c0_4] : memref<9x128x128xf32, #tpu.memory_space<vmem>>, vector<1x128x128xf32>
    %8 = vector.shape_cast %7 : vector<1x128x128xf32> to vector<128x128xf32>
    %cst = arith.constant dense<0.000000e+00> : vector<64x128xf32>
    %9 = tpu.matmul %6, %8, %cst {dimension_numbers = #tpu.dot_dimension_numbers<[1], [0], [0], [1], [0, 0, 1, 1], [], []>} : vector<64x128xf32>, vector<128x128xf32>, vector<64x128xf32> -> vector<64x128xf32>
    %c0_i32_5 = arith.constant 0 : i32
    %10 = arith.addi %1, %c0_i32_5 : i32
    %c0_6 = arith.constant 0 : index
    %11 = arith.index_cast %10 : i32 to index
    %c1 = arith.constant 1 : index
    %c0_7 = arith.constant 0 : index
    %12 = vector.load %arg2[%c0_6, %11, %c1, %c0_7] : memref<1x10x10x128xf32, #tpu.memory_space<vmem>>, vector<1x8x8x128xf32>
    %13 = vector.shape_cast %12 : vector<1x8x8x128xf32> to vector<8x8x128xf32>
    %14 = vector.shape_cast %13 : vector<8x8x128xf32> to vector<64x128xf32>
    %c1_8 = arith.constant 1 : index
    %c0_9 = arith.constant 0 : index
    %c0_10 = arith.constant 0 : index
    %15 = vector.load %arg3[%c1_8, %c0_9, %c0_10] : memref<9x128x128xf32, #tpu.memory_space<vmem>>, vector<1x128x128xf32>
    %16 = vector.shape_cast %15 : vector<1x128x128xf32> to vector<128x128xf32>
    %cst_11 = arith.constant dense<0.000000e+00> : vector<64x128xf32>
    %17 = tpu.matmul %14, %16, %cst_11 {dimension_numbers = #tpu.dot_dimension_numbers<[1], [0], [0], [1], [0, 0, 1, 1], [], []>} : vector<64x128xf32>, vector<128x128xf32>, vector<64x128xf32> -> vector<64x128xf32>
    %18 = arith.addf %9, %17 : vector<64x128xf32>
    %c0_i32_12 = arith.constant 0 : i32
    %19 = arith.addi %1, %c0_i32_12 : i32
    %c0_13 = arith.constant 0 : index
    %20 = arith.index_cast %19 : i32 to index
    %c2 = arith.constant 2 : index
    %c0_14 = arith.constant 0 : index
    %21 = vector.load %arg2[%c0_13, %20, %c2, %c0_14] : memref<1x10x10x128xf32, #tpu.memory_space<vmem>>, vector<1x8x8x128xf32>
    %22 = vector.shape_cast %21 : vector<1x8x8x128xf32> to vector<8x8x128xf32>
    %23 = vector.shape_cast %22 : vector<8x8x128xf32> to vector<64x128xf32>
    %c2_15 = arith.constant 2 : index
    %c0_16 = arith.constant 0 : index
    %c0_17 = arith.constant 0 : index
    %24 = vector.load %arg3[%c2_15, %c0_16, %c0_17] : memref<9x128x128xf32, #tpu.memory_space<vmem>>, vector<1x128x128xf32>
    %25 = vector.shape_cast %24 : vector<1x128x128xf32> to vector<128x128xf32>
    %cst_18 = arith.constant dense<0.000000e+00> : vector<64x128xf32>
    %26 = tpu.matmul %23, %25, %cst_18 {dimension_numbers = #tpu.dot_dimension_numbers<[1], [0], [0], [1], [0, 0, 1, 1], [], []>} : vector<64x128xf32>, vector<128x128xf32>, vector<64x128xf32> -> vector<64x128xf32>
    %27 = arith.addf %18, %26 : vector<64x128xf32>
    %c1_i32 = arith.constant 1 : i32
    %28 = arith.addi %1, %c1_i32 : i32
    %c0_19 = arith.constant 0 : index
    %29 = arith.index_cast %28 : i32 to index
    %c0_20 = arith.constant 0 : index
    %c0_21 = arith.constant 0 : index
    %30 = vector.load %arg2[%c0_19, %29, %c0_20, %c0_21] : memref<1x10x10x128xf32, #tpu.memory_space<vmem>>, vector<1x8x8x128xf32>
    %31 = vector.shape_cast %30 : vector<1x8x8x128xf32> to vector<8x8x128xf32>
    %32 = vector.shape_cast %31 : vector<8x8x128xf32> to vector<64x128xf32>
    %c3 = arith.constant 3 : index
    %c0_22 = arith.constant 0 : index
    %c0_23 = arith.constant 0 : index
    %33 = vector.load %arg3[%c3, %c0_22, %c0_23] : memref<9x128x128xf32, #tpu.memory_space<vmem>>, vector<1x128x128xf32>
    %34 = vector.shape_cast %33 : vector<1x128x128xf32> to vector<128x128xf32>
    %cst_24 = arith.constant dense<0.000000e+00> : vector<64x128xf32>
    %35 = tpu.matmul %32, %34, %cst_24 {dimension_numbers = #tpu.dot_dimension_numbers<[1], [0], [0], [1], [0, 0, 1, 1], [], []>} : vector<64x128xf32>, vector<128x128xf32>, vector<64x128xf32> -> vector<64x128xf32>
    %36 = arith.addf %27, %35 : vector<64x128xf32>
    %c1_i32_25 = arith.constant 1 : i32
    %37 = arith.addi %1, %c1_i32_25 : i32
    %c0_26 = arith.constant 0 : index
    %38 = arith.index_cast %37 : i32 to index
    %c1_27 = arith.constant 1 : index
    %c0_28 = arith.constant 0 : index
    %39 = vector.load %arg2[%c0_26, %38, %c1_27, %c0_28] : memref<1x10x10x128xf32, #tpu.memory_space<vmem>>, vector<1x8x8x128xf32>
    %40 = vector.shape_cast %39 : vector<1x8x8x128xf32> to vector<8x8x128xf32>
    %41 = vector.shape_cast %40 : vector<8x8x128xf32> to vector<64x128xf32>
    %c4 = arith.constant 4 : index
    %c0_29 = arith.constant 0 : index
    %c0_30 = arith.constant 0 : index
    %42 = vector.load %arg3[%c4, %c0_29, %c0_30] : memref<9x128x128xf32, #tpu.memory_space<vmem>>, vector<1x128x128xf32>
    %43 = vector.shape_cast %42 : vector<1x128x128xf32> to vector<128x128xf32>
    %cst_31 = arith.constant dense<0.000000e+00> : vector<64x128xf32>
    %44 = tpu.matmul %41, %43, %cst_31 {dimension_numbers = #tpu.dot_dimension_numbers<[1], [0], [0], [1], [0, 0, 1, 1], [], []>} : vector<64x128xf32>, vector<128x128xf32>, vector<64x128xf32> -> vector<64x128xf32>
    %45 = arith.addf %36, %44 : vector<64x128xf32>
    %c1_i32_32 = arith.constant 1 : i32
    %46 = arith.addi %1, %c1_i32_32 : i32
    %c0_33 = arith.constant 0 : index
    %47 = arith.index_cast %46 : i32 to index
    %c2_34 = arith.constant 2 : index
    %c0_35 = arith.constant 0 : index
    %48 = vector.load %arg2[%c0_33, %47, %c2_34, %c0_35] : memref<1x10x10x128xf32, #tpu.memory_space<vmem>>, vector<1x8x8x128xf32>
    %49 = vector.shape_cast %48 : vector<1x8x8x128xf32> to vector<8x8x128xf32>
    %50 = vector.shape_cast %49 : vector<8x8x128xf32> to vector<64x128xf32>
    %c5 = arith.constant 5 : index
    %c0_36 = arith.constant 0 : index
    %c0_37 = arith.constant 0 : index
    %51 = vector.load %arg3[%c5, %c0_36, %c0_37] : memref<9x128x128xf32, #tpu.memory_space<vmem>>, vector<1x128x128xf32>
    %52 = vector.shape_cast %51 : vector<1x128x128xf32> to vector<128x128xf32>
    %cst_38 = arith.constant dense<0.000000e+00> : vector<64x128xf32>
    %53 = tpu.matmul %50, %52, %cst_38 {dimension_numbers = #tpu.dot_dimension_numbers<[1], [0], [0], [1], [0, 0, 1, 1], [], []>} : vector<64x128xf32>, vector<128x128xf32>, vector<64x128xf32> -> vector<64x128xf32>
    %54 = arith.addf %45, %53 : vector<64x128xf32>
    %c2_i32 = arith.constant 2 : i32
    %55 = arith.addi %1, %c2_i32 : i32
    %c0_39 = arith.constant 0 : index
    %56 = arith.index_cast %55 : i32 to index
    %c0_40 = arith.constant 0 : index
    %c0_41 = arith.constant 0 : index
    %57 = vector.load %arg2[%c0_39, %56, %c0_40, %c0_41] : memref<1x10x10x128xf32, #tpu.memory_space<vmem>>, vector<1x8x8x128xf32>
    %58 = vector.shape_cast %57 : vector<1x8x8x128xf32> to vector<8x8x128xf32>
    %59 = vector.shape_cast %58 : vector<8x8x128xf32> to vector<64x128xf32>
    %c6 = arith.constant 6 : index
    %c0_42 = arith.constant 0 : index
    %c0_43 = arith.constant 0 : index
    %60 = vector.load %arg3[%c6, %c0_42, %c0_43] : memref<9x128x128xf32, #tpu.memory_space<vmem>>, vector<1x128x128xf32>
    %61 = vector.shape_cast %60 : vector<1x128x128xf32> to vector<128x128xf32>
    %cst_44 = arith.constant dense<0.000000e+00> : vector<64x128xf32>
    %62 = tpu.matmul %59, %61, %cst_44 {dimension_numbers = #tpu.dot_dimension_numbers<[1], [0], [0], [1], [0, 0, 1, 1], [], []>} : vector<64x128xf32>, vector<128x128xf32>, vector<64x128xf32> -> vector<64x128xf32>
    %63 = arith.addf %54, %62 : vector<64x128xf32>
    %c2_i32_45 = arith.constant 2 : i32
    %64 = arith.addi %1, %c2_i32_45 : i32
    %c0_46 = arith.constant 0 : index
    %65 = arith.index_cast %64 : i32 to index
    %c1_47 = arith.constant 1 : index
    %c0_48 = arith.constant 0 : index
    %66 = vector.load %arg2[%c0_46, %65, %c1_47, %c0_48] : memref<1x10x10x128xf32, #tpu.memory_space<vmem>>, vector<1x8x8x128xf32>
    %67 = vector.shape_cast %66 : vector<1x8x8x128xf32> to vector<8x8x128xf32>
    %68 = vector.shape_cast %67 : vector<8x8x128xf32> to vector<64x128xf32>
    %c7 = arith.constant 7 : index
    %c0_49 = arith.constant 0 : index
    %c0_50 = arith.constant 0 : index
    %69 = vector.load %arg3[%c7, %c0_49, %c0_50] : memref<9x128x128xf32, #tpu.memory_space<vmem>>, vector<1x128x128xf32>
    %70 = vector.shape_cast %69 : vector<1x128x128xf32> to vector<128x128xf32>
    %cst_51 = arith.constant dense<0.000000e+00> : vector<64x128xf32>
    %71 = tpu.matmul %68, %70, %cst_51 {dimension_numbers = #tpu.dot_dimension_numbers<[1], [0], [0], [1], [0, 0, 1, 1], [], []>} : vector<64x128xf32>, vector<128x128xf32>, vector<64x128xf32> -> vector<64x128xf32>
    %72 = arith.addf %63, %71 : vector<64x128xf32>
    %c2_i32_52 = arith.constant 2 : i32
    %73 = arith.addi %1, %c2_i32_52 : i32
    %c0_53 = arith.constant 0 : index
    %74 = arith.index_cast %73 : i32 to index
    %c2_54 = arith.constant 2 : index
    %c0_55 = arith.constant 0 : index
    %75 = vector.load %arg2[%c0_53, %74, %c2_54, %c0_55] : memref<1x10x10x128xf32, #tpu.memory_space<vmem>>, vector<1x8x8x128xf32>
    %76 = vector.shape_cast %75 : vector<1x8x8x128xf32> to vector<8x8x128xf32>
    %77 = vector.shape_cast %76 : vector<8x8x128xf32> to vector<64x128xf32>
    %c8 = arith.constant 8 : index
    %c0_56 = arith.constant 0 : index
    %c0_57 = arith.constant 0 : index
    %78 = vector.load %arg3[%c8, %c0_56, %c0_57] : memref<9x128x128xf32, #tpu.memory_space<vmem>>, vector<1x128x128xf32>
    %79 = vector.shape_cast %78 : vector<1x128x128xf32> to vector<128x128xf32>
    %cst_58 = arith.constant dense<0.000000e+00> : vector<64x128xf32>
    %80 = tpu.matmul %77, %79, %cst_58 {dimension_numbers = #tpu.dot_dimension_numbers<[1], [0], [0], [1], [0, 0, 1, 1], [], []>} : vector<64x128xf32>, vector<128x128xf32>, vector<64x128xf32> -> vector<64x128xf32>
    %81 = arith.addf %72, %80 : vector<64x128xf32>
    %c0_59 = arith.constant 0 : index
    %c0_60 = arith.constant 0 : index
    %c0_61 = arith.constant 0 : index
    %c0_62 = arith.constant 0 : index
    %82 = vector.load %arg5[%c0_59, %c0_60, %c0_61, %c0_62] : memref<1x8x8x128xf32, #tpu.memory_space<vmem>>, vector<1x8x8x128xf32>
    %83 = vector.shape_cast %82 : vector<1x8x8x128xf32> to vector<8x8x128xf32>
    %84 = vector.shape_cast %83 : vector<8x8x128xf32> to vector<64x128xf32>
    %85 = arith.addf %81, %84 : vector<64x128xf32>
    %c0_63 = arith.constant 0 : index
    %c0_64 = arith.constant 0 : index
    %86 = vector.load %arg4[%c0_63, %c0_64] : memref<1x128xf32, #tpu.memory_space<vmem>>, vector<1x128xf32>
    %87 = vector.broadcast %86 : vector<1x128xf32> to vector<64x128xf32>
    %88 = arith.addf %85, %87 : vector<64x128xf32>
    %cst_65 = arith.constant 0.000000e+00 : f32
    %89 = vector.broadcast %cst_65 : f32 to vector<64x128xf32>
    %90 = arith.maximumf %88, %89 : vector<64x128xf32>
    %91 = vector.shape_cast %90 : vector<64x128xf32> to vector<8x8x128xf32>
    %c0_66 = arith.constant 0 : index
    %c0_67 = arith.constant 0 : index
    %c0_68 = arith.constant 0 : index
    %c0_69 = arith.constant 0 : index
    %92 = vector.load %arg6[%c0_66, %c0_67, %c0_68, %c0_69] : memref<1x8x8x128xf32, #tpu.memory_space<vmem>>, vector<1x8x8x128xf32>
    %93 = vector.shape_cast %92 : vector<1x8x8x128xf32> to vector<8x8x128xf32>
    %94 = vector.shape_cast %91 : vector<8x8x128xf32> to vector<1x8x8x128xf32>
    tpu.vector_store %arg6[%c0_66, %c0_67, %c0_68, %c0_69], %94 {strides = array<i32>} : memref<1x8x8x128xf32, #tpu.memory_space<vmem>>, vector<1x8x8x128xf32>,
    return
  }
  func.func @transform_0(%arg0: i32, %arg1: i32) -> (i32, i32, i32, i32) {
    %c0_i32 = arith.constant 0 : i32
    %c0_i32_0 = arith.constant 0 : i32
    %c0_i32_1 = arith.constant 0 : i32
    %c0_i32_2 = arith.constant 0 : i32
    return %arg0, %c0_i32, %c0_i32_0, %c0_i32_1 : i32, i32, i32, i32
  }
  func.func @transform_1(%arg0: i32, %arg1: i32) -> (i32, i32, i32) {
    %c0_i32 = arith.constant 0 : i32
    %c0_i32_0 = arith.constant 0 : i32
    %c0_i32_1 = arith.constant 0 : i32
    %c0_i32_2 = arith.constant 0 : i32
    return %c0_i32, %c0_i32_0, %c0_i32_1 : i32, i32, i32
  }
  func.func @transform_2(%arg0: i32, %arg1: i32) -> (i32, i32) {
    %c0_i32 = arith.constant 0 : i32
    %c0_i32_0 = arith.constant 0 : i32
    %c0_i32_1 = arith.constant 0 : i32
    return %c0_i32, %c0_i32_0 : i32, i32
  }
  func.func @transform_3(%arg0: i32, %arg1: i32) -> (i32, i32, i32, i32) {
    %c0_i32 = arith.constant 0 : i32
    %c0_i32_0 = arith.constant 0 : i32
    %c0_i32_1 = arith.constant 0 : i32
    return %arg0, %arg1, %c0_i32, %c0_i32_0 : i32, i32, i32, i32
  }
  func.func @transform_4(%arg0: i32, %arg1: i32) -> (i32, i32, i32, i32) {
    %c0_i32 = arith.constant 0 : i32
    %c0_i32_0 = arith.constant 0 : i32
    %c0_i32_1 = arith.constant 0 : i32
    return %arg0, %arg1, %c0_i32, %c0_i32_0 : i32, i32, i32, i32
  }
}

</mosaic_0001>

<bundles_post_ra>
// kernel: resnet_layer_fwd.4
= control target key start
LH: loop header
LB: loop body
LE: loop exit
PB: predicated region body
PF: predicated region fallthrough
CT: control target
= control target key end

     0   :  { %s2599_s12 = smov 0   ;;  %s2601_s13 = smov 0   ;;  %s3257_s0 = inlined_call_operand.vmem [shape: f32[2,9,9,512], index: 0, kind: input, shape index: {}]   ;;  %s3258_s1 = inlined_call_operand.vmem [shape: f32[9,128,128], index: 1, kind: input, shape index: {}]   ;;  %s3259_s2 = inlined_call_operand.vmem [shape: f32[1,128], index: 2, kind: input, shape index: {}]   ;;  %s3260_s3 = inlined_call_operand.vmem [shape: f32[2,8,8,128], index: 3, kind: output, shape index: {}]  }
   0x1   :  { %s2603_s14 = smov 0  }
   0x2 LB: > { %s25_s15 = sadd.s32 1, %s2573_s13  ;;  %p1718_p0 = scmp.ge.s32.totalorder %s2577_s14, 1  ;;  %s2577_s14 = sphi %s2603_s14, %s13_s14   ;;  %s2573_s13 = sphi %s2601_s13, %s3272_s13   ;;  %s2569_s12 = sphi %s2599_s12, %s3271_s12  }
   0x3   : > { %p27_p1 = scmp.ge.s32.totalorder %s25_s15, 2  ;;  %p151_p2 = scmp.lt.s32.totalorder %s2577_s14, 3 }
   0x5   : > { %s3274_s15 = smov (%p27_p1, %s25_s15), 0  ;;  %p152_p3 = pnand %p1718_p0, %p151_p2 }
   0x7   : > { %155 = sbr.rel (%p152_p3) target bundleno = 413 (0x19d), region = 32 }
   0xc   : > { %v1737_v0 = vld [vmem:[%s3258_s1 + $0xf8] sm:$0xff]  ;;  %v1736_v2 = vld [vmem:[%s3258_s1 + $0xf0] sm:$0xff]  ;;  %v1735_v4 = vld [vmem:[%s3258_s1 + $0xe8] sm:$0xff]  ;;  %p179_p4 = scmp.lt.s32.totalorder %s2569_s12, 1  ;;  %vm489_vm0 = vcmask 1046528  }
   0xd   : > { %v221_v1 = vld [vmem:[%s3258_s1 + $0x78] sm:$0xff]  ;;  %2102 = vmatprep.subr.mxu0 %v1737_v0  ;;  %v220_v3 = vld [vmem:[%s3258_s1 + $0x70] sm:$0xff]  ;;  %v219_v5 = vld [vmem:[%s3258_s1 + $0x68] sm:$0xff] }
   0xe   : > { %2146 = vmatprep.subr.mxu1 %v221_v1  ;;  %2103 = vmatpush3.msra.mxu0 %v1737_v0  ;;  %v1734_v6 = vld [vmem:[%s3258_s1 + $0xe0] sm:$0xff]  ;;  %v1733_v8 = vld [vmem:[%s3258_s1 + $0xd8] sm:$0xff]  ;;  %v1732_v10 = vld [vmem:[%s3258_s1 + $0xd0] sm:$0xff]  ;;  %s3276_s12 = smov (!%p179_p4, %s2569_s12), 1 }
   0xf   : > { %2147 = vmatpush3.msra.mxu1 %v221_v1  ;;  %2104 = vmatprep.subr.mxu0 %v1736_v2  ;;  %v218_v7 = vld [vmem:[%s3258_s1 + $0x60] sm:$0xff]  ;;  %v217_v9 = vld [vmem:[%s3258_s1 + $0x58] sm:$0xff]  ;;  %v216_v11 = vld [vmem:[%s3258_s1 + $0x50] sm:$0xff]  ;;  %s2530_s22 = smul.u32 576, %s3276_s12  ;;  %s1885_s20 = sshll.u32 %s3276_s12, 6 }
  0x10   : > { %2148 = vmatprep.subr.mxu1 %v220_v3  ;;  %2105 = vmatpush3.msra.mxu0 %v1736_v2  ;;  %v1731_v12 = vld [vmem:[%s3258_s1 + $0xc8] sm:$0xff]  ;;  %v1730_v14 = vld [vmem:[%s3258_s1 + $0xc0] sm:$0xff]  ;;  %v1729_v16 = vld [vmem:[%s3258_s1 + $0xb8] sm:$0xff]  ;;  %s192_s23 = scalar_lea.vmem %s3260_s3, %s1885_s20 }
  0x11   : > { %2149 = vmatpush3.msra.mxu1 %v220_v3  ;;  %2106 = vmatprep.subr.mxu0 %v1735_v4  ;;  %v215_v13 = vld [vmem:[%s3258_s1 + $0x48] sm:$0xff]  ;;  %v214_v15 = vld [vmem:[%s3258_s1 + $0x40] sm:$0xff]  ;;  %v213_v17 = vld [vmem:[%s3258_s1 + $0x38] sm:$0xff]  ;;  %s2717_s6 = scalar_lea.vmem %s3257_s0, %s2530_s22 }
  0x12   : > { %2150 = vmatprep.subr.mxu1 %v219_v5  ;;  %2107 = vmatpush3.msra.mxu0 %v1735_v4  ;;  %v1728_v18 = vld [vmem:[%s3258_s1 + $0xb0] sm:$0xff]  ;;  %v1727_v20 = vld [vmem:[%s3258_s1 + $0xa8] sm:$0xff]  ;;  %v1726_v22 = vld [vmem:[%s3258_s1 + $0xa0] sm:$0xff] }
  0x13   : > { %2151 = vmatpush3.msra.mxu1 %v219_v5  ;;  %2108 = vmatprep.subr.mxu0 %v1734_v6  ;;  %v212_v19 = vld [vmem:[%s3258_s1 + $0x30] sm:$0xff]  ;;  %v211_v21 = vld [vmem:[%s3258_s1 + $0x28] sm:$0xff]  ;;  %v210_v23 = vld [vmem:[%s3258_s1 + $0x20] sm:$0xff] }
  0x14   : > { %2152 = vmatprep.subr.mxu1 %v218_v7  ;;  %2109 = vmatpush3.msra.mxu0 %v1734_v6  ;;  %v1725_v24 = vld [vmem:[%s3258_s1 + $0x98] sm:$0xff]  ;;  %v1724_v26 = vld [vmem:[%s3258_s1 + $0x90] sm:$0xff]  ;;  %v1723_v28 = vld [vmem:[%s3258_s1 + $0x88] sm:$0xff] }
  0x15   : > { %2153 = vmatpush3.msra.mxu1 %v218_v7  ;;  %2110 = vmatprep.subr.mxu0 %v1733_v8  ;;  %v209_v25 = vld [vmem:[%s3258_s1 + $0x18] sm:$0xff]  ;;  %v208_v27 = vld [vmem:[%s3258_s1 + $0x10] sm:$0xff]  ;;  %v207_v29 = vld [vmem:[%s3258_s1 + $0x8] sm:$0xff] }
  0x16   : > { %2154 = vmatprep.subr.mxu1 %v217_v9  ;;  %2111 = vmatpush3.msra.mxu0 %v1733_v8  ;;  %v1722_v30 = vld [vmem:[%s3258_s1 + $0x80] sm:$0xff]  ;;  %v222_v32 = vld [vmem:[%s2717_s6 + $0x8] sm:$0xff]  ;;  %v1753_v36 = vld [vmem:[%s3258_s1 + $0x178] sm:$0xff] }
  0x17   : > { %2155 = vmatpush3.msra.mxu1 %v217_v9  ;;  %2112 = vmatprep.subr.mxu0 %v1732_v10  ;;  %v206_v31 = vld [vmem:[%s3258_s1] sm:$0xff]  ;;  %v2728_v34 = vld [vmem:[%s2717_s6 + $0x48] sm:$0xff]  ;;  %v1769_v37 = vld [vmem:[%s3258_s1 + $0x1f8] sm:$0xff] }
  0x18   : > { %2156 = vmatprep.subr.mxu1 %v216_v11  ;;  %2113 = vmatpush3.msra.mxu0 %v1732_v10  ;;  %v198_v33 = vld [vmem:[%s2717_s6] sm:$0xff]  ;;  %v1752_v38 = vld [vmem:[%s3258_s1 + $0x170] sm:$0xff]  ;;  %v1751_v40 = vld [vmem:[%s3258_s1 + $0x168] sm:$0xff] }
  0x19   : > { %2157 = vmatpush3.msra.mxu1 %v216_v11  ;;  %2114 = vmatprep.subr.mxu0 %v1731_v12  ;;  %v2731_v35 = vld [vmem:[%s2717_s6 + $0x40] sm:$0xff]  ;;  %v1768_v39 = vld [vmem:[%s3258_s1 + $0x1f0] sm:$0xff]  ;;  %v1767_v41 = vld [vmem:[%s3258_s1 + $0x1e8] sm:$0xff] }
  0x1a   : > { %2158 = vmatprep.subr.mxu1 %v215_v13  ;;  %2115 = vmatpush3.msra.mxu0 %v1731_v12  ;;  %v1750_v42 = vld [vmem:[%s3258_s1 + $0x160] sm:$0xff]  ;;  %v1749_v44 = vld [vmem:[%s3258_s1 + $0x158] sm:$0xff]  ;;  %v1748_v46 = vld [vmem:[%s3258_s1 + $0x150] sm:$0xff] }
  0x1b   : > { %2159 = vmatpush3.msra.mxu1 %v215_v13  ;;  %2116 = vmatprep.subr.mxu0 %v1730_v14  ;;  %v1766_v43 = vld [vmem:[%s3258_s1 + $0x1e0] sm:$0xff]  ;;  %v1765_v45 = vld [vmem:[%s3258_s1 + $0x1d8] sm:$0xff]  ;;  %v1764_v47 = vld [vmem:[%s3258_s1 + $0x1d0] sm:$0xff] }
  0x1c   : > { %2160 = vmatprep.subr.mxu1 %v214_v15  ;;  %2117 = vmatpush3.msra.mxu0 %v1730_v14  ;;  %v1747_v48 = vld [vmem:[%s3258_s1 + $0x148] sm:$0xff]  ;;  %v1746_v50 = vld [vmem:[%s3258_s1 + $0x140] sm:$0xff]  ;;  %v1745_v52 = vld [vmem:[%s3258_s1 + $0x138] sm:$0xff] }
  0x1d   : > { %2161 = vmatpush3.msra.mxu1 %v214_v15  ;;  %2118 = vmatprep.subr.mxu0 %v1729_v16  ;;  %v1763_v49 = vld [vmem:[%s3258_s1 + $0x1c8] sm:$0xff]  ;;  %v1762_v51 = vld [vmem:[%s3258_s1 + $0x1c0] sm:$0xff]  ;;  %v1761_v53 = vld [vmem:[%s3258_s1 + $0x1b8] sm:$0xff] }
  0x1e   : > { %2162 = vmatprep.subr.mxu1 %v213_v17  ;;  %2119 = vmatpush3.msra.mxu0 %v1729_v16  ;;  %v2790_v54 = vld [vmem:[%s2717_s6 + $0x88] sm:$0xff]  ;;  %v2793_v55 = vld [vmem:[%s2717_s6 + $0x80] sm:$0xff]  ;;  %v1744_v56 = vld [vmem:[%s3258_s1 + $0x130] sm:$0xff] }
  0x1f   : > { %2163 = vmatpush3.msra.mxu1 %v213_v17  ;;  %2120 = vmatprep.subr.mxu0 %v1728_v18  ;;  %v1760_v57 = vld [vmem:[%s3258_s1 + $0x1b0] sm:$0xff]  ;;  %v2802_v58 = vld [vmem:[%s2717_s6 + $0xc8] sm:$0xff]  ;;  %v2805_v59 = vld [vmem:[%s2717_s6 + $0xc0] sm:$0xff] }
  0x20   : > { %2164 = vmatprep.subr.mxu1 %v212_v19  ;;  %2121 = vmatpush3.msra.mxu0 %v1728_v18  ;;  %v1743_v60 = vld [vmem:[%s3258_s1 + $0x128] sm:$0xff]  ;;  %v2821_v63 = vld [vmem:[%s2717_s6 + $0x100] sm:$0xff]  ;;  %v1741_v4 = vld [vmem:[%s3258_s1 + $0x118] sm:$0xff] }
  0x21   : > { %2165 = vmatpush3.msra.mxu1 %v212_v19  ;;  %2122 = vmatprep.subr.mxu0 %v1727_v20  ;;  %v1759_v61 = vld [vmem:[%s3258_s1 + $0x1a8] sm:$0xff]  ;;  %v1742_v0 = vld [vmem:[%s3258_s1 + $0x120] sm:$0xff]  ;;  %v1757_v5 = vld [vmem:[%s3258_s1 + $0x198] sm:$0xff] }
  0x22   : > { %2166 = vmatprep.subr.mxu1 %v211_v21  ;;  %2123 = vmatpush3.msra.mxu0 %v1727_v20  ;;  %v2818_v62 = vld [vmem:[%s2717_s6 + $0x108] sm:$0xff]  ;;  %v1758_v1 = vld [vmem:[%s3258_s1 + $0x1a0] sm:$0xff]  ;;  %v1740_v10 = vld [vmem:[%s3258_s1 + $0x110] sm:$0xff] }
  0x23   : > { %2167 = vmatpush3.msra.mxu1 %v211_v21  ;;  %2124 = vmatprep.subr.mxu0 %v1726_v22  ;;  %v2830_v2 = vld [vmem:[%s2717_s6 + $0x148] sm:$0xff]  ;;  %v2833_v3 = vld [vmem:[%s2717_s6 + $0x140] sm:$0xff]  ;;  %v1756_v11 = vld [vmem:[%s3258_s1 + $0x190] sm:$0xff] }
  0x24   : > { %2168 = vmatprep.subr.mxu1 %v210_v23  ;;  %2125 = vmatpush3.msra.mxu0 %v1726_v22  ;;  %v2846_v6 = vld [vmem:[%s2717_s6 + $0x188] sm:$0xff]  ;;  %v2849_v7 = vld [vmem:[%s2717_s6 + $0x180] sm:$0xff] }
  0x25   : > { %2169 = vmatpush3.msra.mxu1 %v210_v23  ;;  %2126 = vmatprep.subr.mxu0 %v1725_v24  ;;  %v457_v8 = vld [vmem:[%s2717_s6] sm:$0xfe]  ;;  %v458_v9 = vld [vmem:[%s2717_s6 + $0x20] sm:$0x1]  ;;  %v2860_v12 = vld [vmem:[%s2717_s6 + $0x1c8] sm:$0xff] }
  0x26   : > { %2170 = vmatprep.subr.mxu1 %v209_v25  ;;  %2127 = vmatpush3.msra.mxu0 %v1725_v24  ;;  %v2863_v13 = vld [vmem:[%s2717_s6 + $0x1c0] sm:$0xff]  ;;  %v490_v16 = vrot.slane %v457_v8, 1  ;;  %v491_v17 = vrot.slane %v458_v9, 1  ;;  %v1739_v18 = vld [vmem:[%s3258_s1 + $0x108] sm:$0xff] }
  0x27   : > { %2171 = vmatpush3.msra.mxu1 %v209_v25  ;;  %2128 = vmatprep.subr.mxu0 %v1724_v26  ;;  %v459_v14 = vld [vmem:[%s2717_s6 + $0x40] sm:$0xfe]  ;;  %v460_v15 = vld [vmem:[%s2717_s6 + $0x60] sm:$0x1]  ;;  %v1755_v19 = vld [vmem:[%s3258_s1 + $0x188] sm:$0xff] }
  0x28   : > { %2172 = vmatprep.subr.mxu1 %v208_v27  ;;  %2129 = vmatpush3.msra.mxu0 %v1724_v26  ;;  %v1738_v20 = vld [vmem:[%s3258_s1 + $0x100] sm:$0xff]  ;;  %v493_v21 = vrot.slane %v459_v14, 1  ;;  %v494_v22 = vrot.slane %v460_v15, 1  ;;  %v492_v26 = vsel %vm489_vm0, %v490_v16, %v491_v17  ;;  %v656_v16 = vld [vmem:[%s2717_s6 + $0x110] sm:$0xff] }
  0x29   : > { %2173 = vmatpush3.msra.mxu1 %v208_v27  ;;  %2130 = vmatprep.subr.mxu0 %v1723_v28  ;;  %v1754_v23 = vld [vmem:[%s3258_s1 + $0x180] sm:$0xff] }
  0x2a   : > { %2174 = vmatprep.subr.mxu1 %v207_v29  ;;  %2131 = vmatpush3.msra.mxu0 %v1723_v28  ;;  %v461_v24 = vld [vmem:[%s2717_s6 + $0x80] sm:$0xfe]  ;;  %v462_v25 = vld [vmem:[%s2717_s6 + $0xa0] sm:$0x1] }
  0x2b   : > { %2175 = vmatpush3.msra.mxu1 %v207_v29  ;;  %2132 = vmatprep.subr.mxu0 %v1722_v30  ;;  %v463_v27 = vld [vmem:[%s2717_s6 + $0xc0] sm:$0xfe]  ;;  %v464_v28 = vld [vmem:[%s2717_s6 + $0xe0] sm:$0x1]  ;;  %v652_v29 = vld [vmem:[%s2717_s6 + $0x10] sm:$0xff] }
  0x2c   : > { %2176 = vmatprep.subr.mxu1 %v206_v31  ;;  %2133 = vmatpush3.msra.mxu0 %v1722_v30  ;;  %v495_v30 = vsel %vm489_vm0, %v493_v21, %v494_v22  ;;  %v472_v8 = vld [vmem:[%s2717_s6 + $0x1e0] sm:$0x1]  ;;  %v1796_v21 = vld [vmem:[%s3258_s1 + $0x2d0] sm:$0xff] }
  0x2d   : > { %2134 = vmatprep.mubr.f32.mxu0 %v222_v32  ;;  %2177 = vmatpush3.msra.mxu1 %v206_v31  ;;  %v653_v31 = vld [vmem:[%s2717_s6 + $0x50] sm:$0xff]  ;;  %v496_v32 = vrot.slane %v461_v24, 1  ;;  %v1779_v24 = vld [vmem:[%s3258_s1 + $0x248] sm:$0xff] }
  0x2e   : > { %2178 = vmatprep.mubr.f32.mxu1 %v198_v33  ;;  %2135 = vmatmul.mubr.f32.vlgmr.msra.gmra.mxu0 %v2728_v34  ;;  %v497_v33 = vrot.slane %v462_v25, 1  ;;  %v1795_v25 = vld [vmem:[%s3258_s1 + $0x2c8] sm:$0xff] }
  0x2f   : > { %2179 = vmatmul.mubr.f32.vlgmr.msra.gmra.mxu1 %v2731_v35  ;;  %2190 = vmatprep.subr.mxu0 %v1753_v36 }
  0x30   : > { %2234 = vmatprep.subr.mxu1 %v1769_v37  ;;  %2191 = vmatpush3.msra.mxu0 %v1753_v36  ;;  %v1785_v36 = vld [vmem:[%s3258_s1 + $0x278] sm:$0xff] }
  0x31   : > { %2235 = vmatpush3.msra.mxu1 %v1769_v37  ;;  %2192 = vmatprep.subr.mxu0 %v1752_v38  ;;  %v1801_v37 = vld [vmem:[%s3258_s1 + $0x2f8] sm:$0xff] }
  0x32   : > { %2236 = vmatprep.subr.mxu1 %v1768_v39  ;;  %2193 = vmatpush3.msra.mxu0 %v1752_v38  ;;  %v499_v38 = vrot.slane %v463_v27, 1  ;;  %v1778_v27 = vld [vmem:[%s3258_s1 + $0x240] sm:$0xff] }
  0x33   : > { %2237 = vmatpush3.msra.mxu1 %v1768_v39  ;;  %2194 = vmatprep.subr.mxu0 %v1751_v40  ;;  %v500_v39 = vrot.slane %v464_v28, 1  ;;  %v659_v28 = vld [vmem:[%s2717_s6 + $0x1d0] sm:$0xff] }
  0x34   : > { %2238 = vmatprep.subr.mxu1 %v1767_v41  ;;  %2195 = vmatpush3.msra.mxu0 %v1751_v40  ;;  %v1784_v40 = vld [vmem:[%s3258_s1 + $0x270] sm:$0xff] }
  0x35   : > { %2239 = vmatpush3.msra.mxu1 %v1767_v41  ;;  %2196 = vmatprep.subr.mxu0 %v1750_v42  ;;  %v1800_v41 = vld [vmem:[%s3258_s1 + $0x2f0] sm:$0xff] }
  0x36   : > { %2240 = vmatprep.subr.mxu1 %v1766_v43  ;;  %2197 = vmatpush3.msra.mxu0 %v1750_v42  ;;  %v465_v42 = vld [vmem:[%s2717_s6 + $0x100] sm:$0xfe] }
  0x37   : > { %2241 = vmatpush3.msra.mxu1 %v1766_v43  ;;  %2198 = vmatprep.subr.mxu0 %v1749_v44  ;;  %v466_v43 = vld [vmem:[%s2717_s6 + $0x120] sm:$0x1] }
  0x38   : > { %2242 = vmatprep.subr.mxu1 %v1765_v45  ;;  %2199 = vmatpush3.msra.mxu0 %v1749_v44  ;;  %v498_v44 = vsel %vm489_vm0, %v496_v32, %v497_v33  ;;  %v1776_v32 = vld [vmem:[%s3258_s1 + $0x230] sm:$0xff] }
  0x39   : > { %2243 = vmatpush3.msra.mxu1 %v1765_v45  ;;  %2200 = vmatprep.subr.mxu0 %v1748_v46  ;;  %v467_v45 = vld [vmem:[%s2717_s6 + $0x140] sm:$0xfe]  ;;  %v1792_v33 = vld [vmem:[%s3258_s1 + $0x2b0] sm:$0xff] }
  0x3a   : > { %2244 = vmatprep.subr.mxu1 %v1764_v47  ;;  %2201 = vmatpush3.msra.mxu0 %v1748_v46  ;;  %v468_v46 = vld [vmem:[%s2717_s6 + $0x160] sm:$0x1] }
  0x3b   : > { %2245 = vmatpush3.msra.mxu1 %v1764_v47  ;;  %2202 = vmatprep.subr.mxu0 %v1747_v48  ;;  %v501_v47 = vsel %vm489_vm0, %v499_v38, %v500_v39  ;;  %v1774_v38 = vld [vmem:[%s3258_s1 + $0x220] sm:$0xff] }
  0x3c   : > { %2246 = vmatprep.subr.mxu1 %v1763_v49  ;;  %2203 = vmatpush3.msra.mxu0 %v1747_v48  ;;  %v1783_v48 = vld [vmem:[%s3258_s1 + $0x268] sm:$0xff]  ;;  %v1790_v39 = vld [vmem:[%s3258_s1 + $0x2a0] sm:$0xff] }
  0x3d   : > { %2247 = vmatpush3.msra.mxu1 %v1763_v49  ;;  %2204 = vmatprep.subr.mxu0 %v1746_v50  ;;  %v1799_v49 = vld [vmem:[%s3258_s1 + $0x2e8] sm:$0xff] }
  0x3e   : > { %2248 = vmatprep.subr.mxu1 %v1762_v51  ;;  %2205 = vmatpush3.msra.mxu0 %v1746_v50  ;;  %v502_v50 = vrot.slane %v465_v42, 1  ;;  %v1772_v42 = vld [vmem:[%s3258_s1 + $0x210] sm:$0xff] }
  0x3f   : > { %2249 = vmatpush3.msra.mxu1 %v1762_v51  ;;  %2206 = vmatprep.subr.mxu0 %v1745_v52  ;;  %v503_v51 = vrot.slane %v466_v43, 1  ;;  %v928_v43 = vld [vmem:[%s2717_s6 + $0x10] sm:$0xfe] }
  0x40   : > { %2250 = vmatprep.subr.mxu1 %v1761_v53  ;;  %2207 = vmatpush3.msra.mxu0 %v1745_v52  ;;  %v654_v52 = vld [vmem:[%s2717_s6 + $0x90] sm:$0xff] }
  0x41   : > { %2251 = vmatpush3.msra.mxu1 %v1761_v53  ;;  %2137 = vmatprep.mubr.f32.mxu0 %v2790_v54  ;;  %v505_v53 = vrot.slane %v467_v45, 1  ;;  %v1788_v45 = vld [vmem:[%s3258_s1 + $0x290] sm:$0xff] }
  0x42   : > { %2181 = vmatprep.mubr.f32.mxu1 %v2793_v55  ;;  %2208 = vmatprep.subr.mxu0 %v1744_v56 }
  0x43   : > { %2252 = vmatprep.subr.mxu1 %v1760_v57  ;;  %2138 = vmatmul.mubr.f32.gmra.mxu0 %v2802_v58 }
  0x44   : > { %2182 = vmatmul.mubr.f32.gmra.mxu1 %v2805_v59  ;;  %2209 = vmatpush3.msra.mxu0 %v1744_v56  ;;  %v506_v56 = vrot.slane %v468_v46, 1  ;;  %v930_v46 = vld [vmem:[%s2717_s6 + $0x50] sm:$0xfe] }
  0x45   : > { %2253 = vmatpush3.msra.mxu1 %v1760_v57  ;;  %2210 = vmatprep.subr.mxu0 %v1743_v60  ;;  %v655_v57 = vld [vmem:[%s2717_s6 + $0xd0] sm:$0xff] }
  0x46   : > { %2254 = vmatprep.subr.mxu1 %v1759_v61  ;;  %2211 = vmatpush3.msra.mxu0 %v1743_v60  ;;  %v1782_v60 = vld [vmem:[%s3258_s1 + $0x260] sm:$0xff]  ;;  %v507_v9 = vsel %vm489_vm0, %v505_v53, %v506_v56 }
  0x47   : > { %2255 = vmatpush3.msra.mxu1 %v1759_v61  ;;  %2140 = vmatprep.mubr.f32.mxu0 %v2818_v62  ;;  %v1798_v61 = vld [vmem:[%s3258_s1 + $0x2e0] sm:$0xff] }
  0x48   : > { %2184 = vmatprep.mubr.f32.mxu1 %v2821_v63  ;;  %2212 = vmatprep.subr.mxu0 %v1742_v0  ;;  %v1770_v56 = vld [vmem:[%s3258_s1 + $0x200] sm:$0xff] }
  0x49   : > { %2256 = vmatprep.subr.mxu1 %v1758_v1  ;;  %2141 = vmatmul.mubr.f32.gmra.mxu0 %v2830_v2 }
  0x4a   : > { %2185 = vmatmul.mubr.f32.gmra.mxu1 %v2833_v3  ;;  %2213 = vmatpush3.msra.mxu0 %v1742_v0  ;;  %v469_v0 = vld [vmem:[%s2717_s6 + $0x180] sm:$0xfe] }
  0x4b   : > { %2257 = vmatpush3.msra.mxu1 %v1758_v1  ;;  %2214 = vmatprep.subr.mxu0 %v1741_v4  ;;  %v470_v1 = vld [vmem:[%s2717_s6 + $0x1a0] sm:$0x1]  ;;  %v508_v14 = vrot.slane %v469_v0, 1  ;;  %v791_v0 = vld [vmem:[%s2717_s6 + $0x58] sm:$0xff] }
  0x4c   : > { %2258 = vmatprep.subr.mxu1 %v1757_v5  ;;  %2215 = vmatpush3.msra.mxu0 %v1741_v4  ;;  %v504_v4 = vsel %vm489_vm0, %v502_v50, %v503_v51  ;;  %v509_v15 = vrot.slane %v470_v1, 1  ;;  %v960_v50 = vrot.slane %v928_v43, 1  ;;  %v941_v43 = vld [vmem:[%s2717_s6 + $0x1b0] sm:$0x1] }
  0x4d   : > { %2259 = vmatpush3.msra.mxu1 %v1757_v5  ;;  %2143 = vmatprep.mubr.f32.mxu0 %v2846_v6  ;;  %v471_v5 = vld [vmem:[%s2717_s6 + $0x1c0] sm:$0xfe] }
  0x4e   : > { %2187 = vmatprep.mubr.f32.mxu1 %v2849_v7  ;;  %2216 = vmatprep.subr.mxu0 %v1740_v10  ;;  %v511_v17 = vrot.slane %v471_v5, 1  ;;  %v510_v22 = vsel %vm489_vm0, %v508_v14, %v509_v15  ;;  %v933_v5 = vld [vmem:[%s2717_s6 + $0xb0] sm:$0x1] }
  0x4f   : > { %2260 = vmatprep.subr.mxu1 %v1756_v11  ;;  %2144 = vmatmul.mubr.f32.gmra.mxu0 %v2860_v12  ;;  %v1824_v14 = vld [vmem:[%s3258_s1 + $0x370] sm:$0xff] }
  0x50   : > { %2188 = vmatmul.mubr.f32.gmra.mxu1 %v2863_v13  ;;  %2217 = vmatpush3.msra.mxu0 %v1740_v10  ;;  %v1781_v10 = vld [vmem:[%s3258_s1 + $0x258] sm:$0xff]  ;;  %v1848_v15 = vld [vmem:[%s3258_s1 + $0x3f0] sm:$0xff] }
  0x51   : > { %2261 = vmatpush3.msra.mxu1 %v1756_v11  ;;  %2218 = vmatprep.subr.mxu0 %v1739_v18  ;;  %v1797_v11 = vld [vmem:[%s3258_s1 + $0x2d8] sm:$0xff] }
  0x52   : > { %2262 = vmatprep.subr.mxu1 %v1755_v19  ;;  %2219 = vmatpush3.msra.mxu0 %v1739_v18  ;;  %v512_v18 = vrot.slane %v472_v8, 1  ;;  %v1825_v8 = vld [vmem:[%s3258_s1 + $0x378] sm:$0xff] }
  0x53   : > { %2263 = vmatpush3.msra.mxu1 %v1755_v19  ;;  %2220 = vmatprep.subr.mxu0 %v1738_v20  ;;  %v1780_v19 = vld [vmem:[%s3258_s1 + $0x250] sm:$0xff] }
  0x54   : > { %2264 = vmatprep.subr.mxu1 %v1754_v23  ;;  %2221 = vmatpush3.msra.mxu0 %v1738_v20  ;;  %v657_v20 = vld [vmem:[%s2717_s6 + $0x150] sm:$0xff] }
  0x55   : > { %2222 = vmatprep.mubr.f32.mxu0 %v492_v26  ;;  %2265 = vmatpush3.msra.mxu1 %v1754_v23  ;;  %v513_v23 = vsel %vm489_vm0, %v511_v17, %v512_v18  ;;  %v658_v26 = vld [vmem:[%s2717_s6 + $0x190] sm:$0xff]  ;;  %v967_v17 = vrot.slane %v933_v5, 1  ;;  %v792_v18 = vld [vmem:[%s2717_s6 + $0x98] sm:$0xff]  ;;  %v1842_v5 = vld [vmem:[%s3258_s1 + $0x3c0] sm:$0xff] }
  0x56   : > { %2266 = vmatprep.mubr.f32.mxu1 %v652_v29  ;;  %2223 = vmatmul.mubr.f32.vlgmr.msra.gmra.mxu0 %v495_v30  ;;  %v1794_v29 = vld [vmem:[%s3258_s1 + $0x2c0] sm:$0xff]  ;;  %v1777_v30 = vld [vmem:[%s3258_s1 + $0x238] sm:$0xff] }
  0x57   : > { %2267 = vmatmul.mubr.f32.vlgmr.msra.gmra.mxu1 %v653_v31  ;;  %2278 = vmatprep.subr.mxu0 %v1785_v36  ;;  %v1793_v31 = vld [vmem:[%s3258_s1 + $0x2b8] sm:$0xff] }
  0x58   : > { %2322 = vmatprep.subr.mxu1 %v1801_v37  ;;  %2279 = vmatpush3.msra.mxu0 %v1785_v36  ;;  %v1775_v36 = vld [vmem:[%s3258_s1 + $0x228] sm:$0xff] }
  0x59   : > { %2323 = vmatpush3.msra.mxu1 %v1801_v37  ;;  %2280 = vmatprep.subr.mxu0 %v1784_v40  ;;  %v1791_v37 = vld [vmem:[%s3258_s1 + $0x2a8] sm:$0xff] }
  0x5a   : > { %2324 = vmatprep.subr.mxu1 %v1800_v41  ;;  %2225 = vmatprep.mubr.f32.mxu0 %v498_v44  ;;  %v929_v44 = vld [vmem:[%s2717_s6 + $0x30] sm:$0x1] }
  0x5b   : > { %2281 = vmatpush3.msra.mxu0 %v1784_v40  ;;  %2325 = vmatpush3.msra.mxu1 %v1800_v41  ;;  %v1773_v40 = vld [vmem:[%s3258_s1 + $0x218] sm:$0xff]  ;;  %v961_v51 = vrot.slane %v929_v44, 1 }
  0x5c   : > { %2226 = vmatmul.mubr.f32.gmra.mxu0 %v501_v47  ;;  %2282 = vmatprep.subr.mxu0 %v1783_v48  ;;  %v1789_v41 = vld [vmem:[%s3258_s1 + $0x298] sm:$0xff]  ;;  %v931_v47 = vld [vmem:[%s2717_s6 + $0x70] sm:$0x1] }
  0x5d   : > { %2326 = vmatprep.subr.mxu1 %v1799_v49  ;;  %2269 = vmatprep.mubr.f32.mxu1 %v654_v52  ;;  %v963_v52 = vrot.slane %v930_v46, 1  ;;  %v964_v53 = vrot.slane %v931_v47, 1  ;;  %v942_v46 = vld [vmem:[%s2717_s6 + $0x1d0] sm:$0xfe]  ;;  %v943_v47 = vld [vmem:[%s2717_s6 + $0x1f0] sm:$0x1] }
  0x5e   : > { %2283 = vmatpush3.msra.mxu0 %v1783_v48  ;;  %2327 = vmatpush3.msra.mxu1 %v1799_v49  ;;  %v1771_v48 = vld [vmem:[%s3258_s1 + $0x208] sm:$0xff] }
  0x5f   : > { %2284 = vmatprep.subr.mxu0 %v1782_v60  ;;  %2270 = vmatmul.mubr.f32.gmra.mxu1 %v655_v57  ;;  %v1787_v49 = vld [vmem:[%s3258_s1 + $0x288] sm:$0xff]  ;;  %v1786_v57 = vld [vmem:[%s3258_s1 + $0x280] sm:$0xff]  ;;  %v965_v1 = vsel %vm489_vm0, %v963_v52, %v964_v53  ;;  %v796_v52 = vld [vmem:[%s2717_s6 + $0x198] sm:$0xff] }
  0x60   : > { %2328 = vmatprep.subr.mxu1 %v1798_v61  ;;  %2228 = vmatprep.mubr.f32.mxu0 %v504_v4  ;;  %v932_v4 = vld [vmem:[%s2717_s6 + $0x90] sm:$0xfe]  ;;  %v797_v53 = vld [vmem:[%s2717_s6 + $0x1d8] sm:$0xff] }
  0x61   : > { %2285 = vmatpush3.msra.mxu0 %v1782_v60  ;;  %2329 = vmatpush3.msra.mxu1 %v1798_v61  ;;  %v790_v60 = vld [vmem:[%s2717_s6 + $0x18] sm:$0xff]  ;;  %v962_v61 = vsel %vm489_vm0, %v960_v50, %v961_v51  ;;  %v979_v51 = vrot.slane %v941_v43, 1 }
  0x62   : > { %2229 = vmatmul.mubr.f32.gmra.mxu0 %v507_v9  ;;  %2286 = vmatprep.subr.mxu0 %v1781_v10  ;;  %v1849_v9 = vld [vmem:[%s3258_s1 + $0x3f8] sm:$0xff] }
  0x63   : > { %2330 = vmatprep.subr.mxu1 %v1797_v11  ;;  %2272 = vmatprep.mubr.f32.mxu1 %v656_v16  ;;  %v966_v16 = vrot.slane %v932_v4, 1 }
  0x64   : > { %2287 = vmatpush3.msra.mxu0 %v1781_v10  ;;  %2331 = vmatpush3.msra.mxu1 %v1797_v11  ;;  %v934_v10 = vld [vmem:[%s2717_s6 + $0xd0] sm:$0xfe]  ;;  %v935_v11 = vld [vmem:[%s2717_s6 + $0xf0] sm:$0x1] }
  0x65   : > { %2288 = vmatprep.subr.mxu0 %v1780_v19  ;;  %2273 = vmatmul.mubr.f32.gmra.mxu1 %v657_v20  ;;  %v1823_v20 = vld [vmem:[%s3258_s1 + $0x368] sm:$0xff] }
  0x66   : > { %2332 = vmatprep.subr.mxu1 %v1796_v21  ;;  %2231 = vmatprep.mubr.f32.mxu0 %v510_v22  ;;  %v970_v22 = vrot.slane %v935_v11, 1  ;;  %v1840_v11 = vld [vmem:[%s3258_s1 + $0x3b0] sm:$0xff] }
  0x67   : > { %2289 = vmatpush3.msra.mxu0 %v1780_v19  ;;  %2333 = vmatpush3.msra.mxu1 %v1796_v21  ;;  %v793_v19 = vld [vmem:[%s2717_s6 + $0xd8] sm:$0xff]  ;;  %v969_v21 = vrot.slane %v934_v10, 1  ;;  %v1816_v10 = vld [vmem:[%s3258_s1 + $0x330] sm:$0xff] }
  0x68   : > { %2232 = vmatmul.mubr.f32.gmra.mxu0 %v513_v23  ;;  %2290 = vmatprep.subr.mxu0 %v1779_v24  ;;  %v1847_v23 = vld [vmem:[%s3258_s1 + $0x3e8] sm:$0xff] }
  0x69   : > { %2334 = vmatprep.subr.mxu1 %v1795_v25  ;;  %2275 = vmatprep.mubr.f32.mxu1 %v658_v26  ;;  %v968_v26 = vsel %vm489_vm0, %v966_v16, %v967_v17  ;;  %v1814_v16 = vld [vmem:[%s3258_s1 + $0x320] sm:$0xff] }
  0x6a   : > { %2291 = vmatpush3.msra.mxu0 %v1779_v24  ;;  %2335 = vmatpush3.msra.mxu1 %v1795_v25  ;;  %v936_v24 = vld [vmem:[%s2717_s6 + $0x110] sm:$0xfe]  ;;  %v937_v25 = vld [vmem:[%s2717_s6 + $0x130] sm:$0x1]  ;;  %v1838_v17 = vld [vmem:[%s3258_s1 + $0x3a0] sm:$0xff] }
  0x6b   : > { %2292 = vmatprep.subr.mxu0 %v1778_v27  ;;  %2276 = vmatmul.mubr.f32.gmra.mxu1 %v659_v28  ;;  %v938_v28 = vld [vmem:[%s2717_s6 + $0x150] sm:$0xfe] }
  0x6c   : > { %2336 = vmatprep.subr.mxu1 %v1794_v29  ;;  %2293 = vmatpush3.msra.mxu0 %v1778_v27  ;;  %v1822_v27 = vld [vmem:[%s3258_s1 + $0x360] sm:$0xff] }
  0x6d   : > { %2337 = vmatpush3.msra.mxu1 %v1794_v29  ;;  %2294 = vmatprep.subr.mxu0 %v1777_v30  ;;  %v939_v29 = vld [vmem:[%s2717_s6 + $0x170] sm:$0x1] }
  0x6e   : > { %2338 = vmatprep.subr.mxu1 %v1793_v31  ;;  %2295 = vmatpush3.msra.mxu0 %v1777_v30  ;;  %v971_v30 = vsel %vm489_vm0, %v969_v21, %v970_v22  ;;  %v1836_v21 = vld [vmem:[%s3258_s1 + $0x390] sm:$0xff]  ;;  %v1811_v22 = vld [vmem:[%s3258_s1 + $0x308] sm:$0xff] }
  0x6f   : > { %2339 = vmatpush3.msra.mxu1 %v1793_v31  ;;  %2296 = vmatprep.subr.mxu0 %v1776_v32  ;;  %v1846_v31 = vld [vmem:[%s3258_s1 + $0x3e0] sm:$0xff] }
  0x70   : > { %2340 = vmatprep.subr.mxu1 %v1792_v33  ;;  %2297 = vmatpush3.msra.mxu0 %v1776_v32  ;;  %v972_v32 = vrot.slane %v936_v24, 1  ;;  %v1810_v24 = vld [vmem:[%s3258_s1 + $0x300] sm:$0xff] }
  0x71   : > { %2341 = vmatpush3.msra.mxu1 %v1792_v33  ;;  %2298 = vmatprep.subr.mxu0 %v1775_v36  ;;  %v973_v33 = vrot.slane %v937_v25, 1  ;;  %v1834_v25 = vld [vmem:[%s3258_s1 + $0x380] sm:$0xff] }
  0x72   : > { %2342 = vmatprep.subr.mxu1 %v1791_v37  ;;  %2299 = vmatpush3.msra.mxu0 %v1775_v36  ;;  %v794_v36 = vld [vmem:[%s2717_s6 + $0x118] sm:$0xff] }
  0x73   : > { %2343 = vmatpush3.msra.mxu1 %v1791_v37  ;;  %2300 = vmatprep.subr.mxu0 %v1774_v38  ;;  %v795_v37 = vld [vmem:[%s2717_s6 + $0x158] sm:$0xff]  ;;  %v974_v44 = vsel %vm489_vm0, %v972_v32, %v973_v33  ;;  %v1852_v32 = vld [vmem:[%s2717_s6 + $0x80] sm:$0xfe]  ;;  %v1853_v33 = vld [vmem:[%s2717_s6 + $0xa0] sm:$0x1] }
  0x74   : > { %2344 = vmatprep.subr.mxu1 %v1790_v39  ;;  %2301 = vmatpush3.msra.mxu0 %v1774_v38  ;;  %v1821_v38 = vld [vmem:[%s3258_s1 + $0x358] sm:$0xff] }
  0x75   : > { %2345 = vmatpush3.msra.mxu1 %v1790_v39  ;;  %2302 = vmatprep.subr.mxu0 %v1773_v40  ;;  %v975_v39 = vrot.slane %v938_v28, 1  ;;  %v1851_v28 = vld [vmem:[%s2717_s6 + $0x60] sm:$0x1] }
  0x76   : > { %2346 = vmatprep.subr.mxu1 %v1789_v41  ;;  %2303 = vmatpush3.msra.mxu0 %v1773_v40  ;;  %v976_v40 = vrot.slane %v939_v29, 1  ;;  %v1858_v29 = vld [vmem:[%s2717_s6 + $0x140] sm:$0xfe]  ;;  %v1435_v43 = vrot.slane %v1851_v28, 1 }
  0x77   : > { %2347 = vmatpush3.msra.mxu1 %v1789_v41  ;;  %2304 = vmatprep.subr.mxu0 %v1772_v42  ;;  %v1845_v41 = vld [vmem:[%s3258_s1 + $0x3d8] sm:$0xff] }
  0x78   : > { %2348 = vmatprep.subr.mxu1 %v1788_v45  ;;  %2305 = vmatpush3.msra.mxu0 %v1772_v42  ;;  %v940_v42 = vld [vmem:[%s2717_s6 + $0x190] sm:$0xfe] }
  0x79   : > { %2349 = vmatpush3.msra.mxu1 %v1788_v45  ;;  %2306 = vmatprep.subr.mxu0 %v1771_v48  ;;  %v1820_v45 = vld [vmem:[%s3258_s1 + $0x350] sm:$0xff]  ;;  %v978_v50 = vrot.slane %v940_v42, 1 }
  0x7a   : > { %2350 = vmatprep.subr.mxu1 %v1787_v49  ;;  %2307 = vmatpush3.msra.mxu0 %v1771_v48  ;;  %v977_v48 = vsel %vm489_vm0, %v975_v39, %v976_v40  ;;  %v1855_v39 = vld [vmem:[%s2717_s6 + $0xe0] sm:$0x1]  ;;  %v1862_v40 = vld [vmem:[%s2717_s6 + $0x1c0] sm:$0xfe] }
  0x7b   : > { %2351 = vmatpush3.msra.mxu1 %v1787_v49  ;;  %2308 = vmatprep.subr.mxu0 %v1770_v56  ;;  %v1844_v49 = vld [vmem:[%s3258_s1 + $0x3d0] sm:$0xff] }
  0x7c   : > { %2352 = vmatprep.subr.mxu1 %v1786_v57  ;;  %2309 = vmatpush3.msra.mxu0 %v1770_v56  ;;  %v981_v56 = vrot.slane %v942_v46, 1  ;;  %v1867_v46 = vld [vmem:[%s3258_s1 + $0x408] sm:$0xff] }
  0x7d   : > { %2310 = vmatprep.mubr.f32.mxu0 %v790_v60  ;;  %2353 = vmatpush3.msra.mxu1 %v1786_v57  ;;  %v982_v57 = vrot.slane %v943_v47, 1  ;;  %v1819_v60 = vld [vmem:[%s3258_s1 + $0x348] sm:$0xff]  ;;  %v1866_v47 = vld [vmem:[%s3258_s1 + $0x400] sm:$0xff] }
  0x7e   : > { %2354 = vmatprep.mubr.f32.mxu1 %v962_v61  ;;  %2311 = vmatmul.mubr.f32.vlgmr.msra.gmra.mxu0 %v791_v0  ;;  %v1843_v61 = vld [vmem:[%s3258_s1 + $0x3c8] sm:$0xff]  ;;  %v980_v0 = vsel %vm489_vm0, %v978_v50, %v979_v51 }
  0x7f   : > { %2355 = vmatmul.mubr.f32.vlgmr.msra.gmra.mxu1 %v965_v1  ;;  %2366 = vmatprep.subr.mxu0 %v1825_v8  ;;  %v1818_v1 = vld [vmem:[%s3258_s1 + $0x340] sm:$0xff]  ;;  %v983_v4 = vsel %vm489_vm0, %v981_v56, %v982_v57  ;;  %v1452_v56 = vrot.slane %v1862_v40, 1 }
  0x80   : > { %2410 = vmatprep.subr.mxu1 %v1849_v9  ;;  %2367 = vmatpush3.msra.mxu0 %v1825_v8  ;;  %v1817_v8 = vld [vmem:[%s3258_s1 + $0x338] sm:$0xff] }
  0x81   : > { %2411 = vmatpush3.msra.mxu1 %v1849_v9  ;;  %2368 = vmatprep.subr.mxu0 %v1824_v14  ;;  %v1841_v9 = vld [vmem:[%s3258_s1 + $0x3b8] sm:$0xff] }
  0x82   : > { %2412 = vmatprep.subr.mxu1 %v1848_v15  ;;  %2313 = vmatprep.mubr.f32.mxu0 %v792_v18  ;;  %v1813_v18 = vld [vmem:[%s3258_s1 + $0x318] sm:$0xff] }
  0x83   : > { %2369 = vmatpush3.msra.mxu0 %v1824_v14  ;;  %2413 = vmatpush3.msra.mxu1 %v1848_v15  ;;  %v1815_v14 = vld [vmem:[%s3258_s1 + $0x328] sm:$0xff] }
  0x84   : > { %2314 = vmatmul.mubr.f32.gmra.mxu0 %v793_v19  ;;  %2370 = vmatprep.subr.mxu0 %v1823_v20  ;;  %v1839_v15 = vld [vmem:[%s3258_s1 + $0x3a8] sm:$0xff]  ;;  %v1837_v19 = vld [vmem:[%s3258_s1 + $0x398] sm:$0xff] }
  0x85   : > { %2414 = vmatprep.subr.mxu1 %v1847_v23  ;;  %2357 = vmatprep.mubr.f32.mxu1 %v968_v26  ;;  %v1881_v26 = vld [vmem:[%s3258_s1 + $0x478] sm:$0xff] }
  0x86   : > { %2371 = vmatpush3.msra.mxu0 %v1823_v20  ;;  %2415 = vmatpush3.msra.mxu1 %v1847_v23  ;;  %v1812_v20 = vld [vmem:[%s3258_s1 + $0x310] sm:$0xff]  ;;  %v1835_v23 = vld [vmem:[%s3258_s1 + $0x388] sm:$0xff] }
  0x87   : > { %2372 = vmatprep.subr.mxu0 %v1822_v27  ;;  %2358 = vmatmul.mubr.f32.gmra.mxu1 %v971_v30  ;;  %v1868_v30 = vld [vmem:[%s3258_s1 + $0x410] sm:$0xff] }
  0x88   : > { %2416 = vmatprep.subr.mxu1 %v1846_v31  ;;  %2316 = vmatprep.mubr.f32.mxu0 %v794_v36  ;;  %v1860_v36 = vld [vmem:[%s2717_s6 + $0x180] sm:$0xfe] }
  0x89   : > { %2373 = vmatpush3.msra.mxu0 %v1822_v27  ;;  %2417 = vmatpush3.msra.mxu1 %v1846_v31  ;;  %v1880_v27 = vld [vmem:[%s3258_s1 + $0x470] sm:$0xff]  ;;  %v1859_v31 = vld [vmem:[%s2717_s6 + $0x160] sm:$0x1]  ;;  %v1449_v50 = vrot.slane %v1860_v36, 1 }
  0x8a   : > { %2317 = vmatmul.mubr.f32.gmra.mxu0 %v795_v37  ;;  %2374 = vmatprep.subr.mxu0 %v1821_v38  ;;  %v1861_v37 = vld [vmem:[%s2717_s6 + $0x1a0] sm:$0x1] }
  0x8b   : > { %2418 = vmatprep.subr.mxu1 %v1845_v41  ;;  %2360 = vmatprep.mubr.f32.mxu1 %v974_v44  ;;  %v1446_v44 = vrot.slane %v1858_v29, 1  ;;  %v1450_v51 = vrot.slane %v1861_v37, 1 }
  0x8c   : > { %2375 = vmatpush3.msra.mxu0 %v1821_v38  ;;  %2419 = vmatpush3.msra.mxu1 %v1845_v41  ;;  %v1854_v38 = vld [vmem:[%s2717_s6 + $0xc0] sm:$0xfe]  ;;  %v1863_v41 = vld [vmem:[%s2717_s6 + $0x1e0] sm:$0x1] }
  0x8d   : > { %2376 = vmatprep.subr.mxu0 %v1820_v45  ;;  %2361 = vmatmul.mubr.f32.gmra.mxu1 %v977_v48  ;;  %v1437_v48 = vrot.slane %v1852_v32, 1  ;;  %v1453_v57 = vrot.slane %v1863_v41, 1 }
  0x8e   : > { %2420 = vmatprep.subr.mxu1 %v1844_v49  ;;  %2319 = vmatprep.mubr.f32.mxu0 %v796_v52  ;;  %v1440_v52 = vrot.slane %v1854_v38, 1 }
  0x8f   : > { %2377 = vmatpush3.msra.mxu0 %v1820_v45  ;;  %2421 = vmatpush3.msra.mxu1 %v1844_v49  ;;  %v1447_v45 = vrot.slane %v1859_v31, 1  ;;  %v1438_v49 = vrot.slane %v1853_v33, 1 }
  0x90   : > { %2320 = vmatmul.mubr.f32.gmra.mxu0 %v797_v53  ;;  %2378 = vmatprep.subr.mxu0 %v1819_v60  ;;  %v1441_v53 = vrot.slane %v1855_v39, 1 }
  0x91   : > { %2422 = vmatprep.subr.mxu1 %v1843_v61  ;;  %2363 = vmatprep.mubr.f32.mxu1 %v980_v0  ;;  %v1864_v0 = vld [vmem:[%s2717_s6 + $0x200] sm:$0xfe] }
  0x92   : > { %2379 = vmatpush3.msra.mxu0 %v1819_v60  ;;  %2423 = vmatpush3.msra.mxu1 %v1843_v61  ;;  %v1856_v60 = vld [vmem:[%s2717_s6 + $0x100] sm:$0xfe]  ;;  %v1857_v61 = vld [vmem:[%s2717_s6 + $0x120] sm:$0x1] }
  0x93   : > { %2380 = vmatprep.subr.mxu0 %v1818_v1  ;;  %2364 = vmatmul.mubr.f32.gmra.mxu1 %v983_v4 }
  0x94   : > { %2424 = vmatprep.subr.mxu1 %v1842_v5  ;;  %2381 = vmatpush3.msra.mxu0 %v1818_v1  ;;  %v1865_v1 = vld [vmem:[%s2717_s6 + $0x220] sm:$0x1] }
  0x95   : > { %2425 = vmatpush3.msra.mxu1 %v1842_v5  ;;  %2382 = vmatprep.subr.mxu0 %v1817_v8  ;;  %v1448_v5 = vsel %vm489_vm0, %v1446_v44, %v1447_v45 }
  0x96   : > { %2426 = vmatprep.subr.mxu1 %v1841_v9  ;;  %2383 = vmatpush3.msra.mxu0 %v1817_v8  ;;  %v1439_v8 = vsel %vm489_vm0, %v1437_v48, %v1438_v49 }
  0x97   : > { %2427 = vmatpush3.msra.mxu1 %v1841_v9  ;;  %2384 = vmatprep.subr.mxu0 %v1816_v10  ;;  %v1451_v9 = vsel %vm489_vm0, %v1449_v50, %v1450_v51 }
  0x98   : > { %2428 = vmatprep.subr.mxu1 %v1840_v11  ;;  %2385 = vmatpush3.msra.mxu0 %v1816_v10  ;;  %v1443_v10 = vrot.slane %v1856_v60, 1 }
  0x99   : > { %2429 = vmatpush3.msra.mxu1 %v1840_v11  ;;  %2386 = vmatprep.subr.mxu0 %v1815_v14  ;;  %v1444_v11 = vrot.slane %v1857_v61, 1 }
  0x9a   : > { %2430 = vmatprep.subr.mxu1 %v1839_v15  ;;  %2387 = vmatpush3.msra.mxu0 %v1815_v14  ;;  %v1455_v14 = vrot.slane %v1864_v0, 1 }
  0x9b   : > { %2431 = vmatpush3.msra.mxu1 %v1839_v15  ;;  %2388 = vmatprep.subr.mxu0 %v1814_v16  ;;  %v1456_v15 = vrot.slane %v1865_v1, 1 }
  0x9c   : > { %2432 = vmatprep.subr.mxu1 %v1838_v17  ;;  %2389 = vmatpush3.msra.mxu0 %v1814_v16  ;;  %v1442_v16 = vsel %vm489_vm0, %v1440_v52, %v1441_v53 }
  0x9d   : > { %2433 = vmatpush3.msra.mxu1 %v1838_v17  ;;  %2390 = vmatprep.subr.mxu0 %v1813_v18  ;;  %v1454_v17 = vsel %vm489_vm0, %v1452_v56, %v1453_v57 }
  0x9e   : > { %2434 = vmatprep.subr.mxu1 %v1837_v19  ;;  %2391 = vmatpush3.msra.mxu0 %v1813_v18  ;;  %v1445_v18 = vsel %vm489_vm0, %v1443_v10, %v1444_v11 }
  0x9f   : > { %2435 = vmatpush3.msra.mxu1 %v1837_v19  ;;  %2392 = vmatprep.subr.mxu0 %v1812_v20  ;;  %v1457_v19 = vsel %vm489_vm0, %v1455_v14, %v1456_v15 }
  0xa0   : > { %2436 = vmatprep.subr.mxu1 %v1836_v21  ;;  %2393 = vmatpush3.msra.mxu0 %v1812_v20 }
  0xa1   : > { %2437 = vmatpush3.msra.mxu1 %v1836_v21  ;;  %2394 = vmatprep.subr.mxu0 %v1811_v22 }
  0xa2   : > { %2438 = vmatprep.subr.mxu1 %v1835_v23  ;;  %2395 = vmatpush3.msra.mxu0 %v1811_v22 }
  0xa3   : > { %2439 = vmatpush3.msra.mxu1 %v1835_v23  ;;  %2396 = vmatprep.subr.mxu0 %v1810_v24 }
  0xa4   : > { %2440 = vmatprep.subr.mxu1 %v1834_v25  ;;  %2397 = vmatpush3.msra.mxu0 %v1810_v24 }
  0xa5   : > { %2398 = vmatprep.mubr.f32.mxu0 %v2731_v35  ;;  %2441 = vmatpush3.msra.mxu1 %v1834_v25  ;;  %v1879_v35 = vld [vmem:[%s3258_s1 + $0x468] sm:$0xff] }
  0xa6   : > { %2442 = vmatprep.mubr.f32.mxu1 %v2728_v34  ;;  %2399 = vmatmul.mubr.f32.vlgmr.msra.gmra.mxu0 %v2793_v55  ;;  %v1878_v34 = vld [vmem:[%s3258_s1 + $0x460] sm:$0xff]  ;;  %v1876_v55 = vld [vmem:[%s3258_s1 + $0x450] sm:$0xff] }
  0xa7   : > { %2443 = vmatmul.mubr.f32.vlgmr.msra.gmra.mxu1 %v2790_v54  ;;  %2454 = vmatprep.subr.mxu0 %v1881_v26  ;;  %v1877_v54 = vld [vmem:[%s3258_s1 + $0x458] sm:$0xff] }
  0xa8   : > { %2498 = vmatprep.subr.mxu1 %v1881_v26  ;;  %2455 = vmatpush3.msra.mxu0 %v1881_v26 }
  0xa9   : > { %2514 = vmatpush3.msra.mxu1 %v1881_v26  ;;  %2456 = vmatprep.subr.mxu0 %v1880_v27 }
  0xaa   : > { %2499 = vmatprep.subr.mxu1 %v1880_v27  ;;  %2401 = vmatprep.mubr.f32.mxu0 %v2805_v59  ;;  %v1875_v59 = vld [vmem:[%s3258_s1 + $0x448] sm:$0xff] }
  0xab   : > { %2457 = vmatpush3.msra.mxu0 %v1880_v27  ;;  %2515 = vmatpush3.msra.mxu1 %v1880_v27 }
  0xac   : > { %2402 = vmatmul.mubr.f32.gmra.mxu0 %v2821_v63  ;;  %2458 = vmatprep.subr.mxu0 %v1879_v35  ;;  %v1833_v63 = vld [vmem:[%s2717_s6 + $0x208] sm:$0xff] }
  0xad   : > { %2500 = vmatprep.subr.mxu1 %v1879_v35  ;;  %2445 = vmatprep.mubr.f32.mxu1 %v2802_v58  ;;  %v1809_v58 = vld [vmem:[%s2717_s6 + $0x200] sm:$0xff] }
  0xae   : > { %2459 = vmatpush3.msra.mxu0 %v1879_v35  ;;  %2516 = vmatpush3.msra.mxu1 %v1879_v35 }
  0xaf   : > { %2460 = vmatprep.subr.mxu0 %v1878_v34  ;;  %2446 = vmatmul.mubr.f32.gmra.mxu1 %v2818_v62  ;;  %v1874_v62 = vld [vmem:[%s3258_s1 + $0x440] sm:$0xff] }
  0xb0   : > { %2501 = vmatprep.subr.mxu1 %v1878_v34  ;;  %2404 = vmatprep.mubr.f32.mxu0 %v2833_v3  ;;  %v1872_v3 = vld [vmem:[%s3258_s1 + $0x430] sm:$0xff] }
  0xb1   : > { %2461 = vmatpush3.msra.mxu0 %v1878_v34  ;;  %2517 = vmatpush3.msra.mxu1 %v1878_v34 }
  0xb2   : > { %2405 = vmatmul.mubr.f32.gmra.mxu0 %v2849_v7  ;;  %2462 = vmatprep.subr.mxu0 %v1877_v54  ;;  %v1870_v7 = vld [vmem:[%s3258_s1 + $0x420] sm:$0xff] }
  0xb3   : > { %2502 = vmatprep.subr.mxu1 %v1877_v54  ;;  %2448 = vmatprep.mubr.f32.mxu1 %v2830_v2  ;;  %v1873_v2 = vld [vmem:[%s3258_s1 + $0x438] sm:$0xff] }
  0xb4   : > { %2463 = vmatpush3.msra.mxu0 %v1877_v54  ;;  %2518 = vmatpush3.msra.mxu1 %v1877_v54 }
  0xb5   : > { %2464 = vmatprep.subr.mxu0 %v1876_v55  ;;  %2449 = vmatmul.mubr.f32.gmra.mxu1 %v2846_v6  ;;  %v1871_v6 = vld [vmem:[%s3258_s1 + $0x428] sm:$0xff] }
  0xb6   : > { %2503 = vmatprep.subr.mxu1 %v1876_v55  ;;  %2407 = vmatprep.mubr.f32.mxu0 %v2863_v13  ;;  %v1850_v13 = vld [vmem:[%s2717_s6 + $0x40] sm:$0xfe] }
  0xb7   : > { %2465 = vmatpush3.msra.mxu0 %v1876_v55  ;;  %2519 = vmatpush3.msra.mxu1 %v1876_v55  ;;  %v1434_v42 = vrot.slane %v1850_v13, 1 }
  0xb8   : > { %2408 = vmatmul.mubr.f32.gmra.mxu0 %v1809_v58  ;;  %2466 = vmatprep.subr.mxu0 %v1875_v59 }
  0xb9   : > { %2504 = vmatprep.subr.mxu1 %v1875_v59  ;;  %2451 = vmatprep.mubr.f32.mxu1 %v2860_v12  ;;  %v1869_v12 = vld [vmem:[%s3258_s1 + $0x418] sm:$0xff]  ;;  %v1436_v4 = vsel %vm489_vm0, %v1434_v42, %v1435_v43 }
  0xba   : > { %2467 = vmatpush3.msra.mxu0 %v1875_v59  ;;  %2520 = vmatpush3.msra.mxu1 %v1875_v59 }
  0xbb   : > { %2468 = vmatprep.subr.mxu0 %v1874_v62  ;;  %2452 = vmatmul.mubr.f32.gmra.mxu1 %v1833_v63 }
  0xbc   : > { %2505 = vmatprep.subr.mxu1 %v1874_v62  ;;  %2469 = vmatpush3.msra.mxu0 %v1874_v62 }
  0xbd   : > { %2521 = vmatpush3.msra.mxu1 %v1874_v62  ;;  %2470 = vmatprep.subr.mxu0 %v1873_v2 }
  0xbe   : > { %2506 = vmatprep.subr.mxu1 %v1873_v2  ;;  %2471 = vmatpush3.msra.mxu0 %v1873_v2 }
  0xbf   : > { %2522 = vmatpush3.msra.mxu1 %v1873_v2  ;;  %2472 = vmatprep.subr.mxu0 %v1872_v3 }
  0xc0   : > { %2507 = vmatprep.subr.mxu1 %v1872_v3  ;;  %2473 = vmatpush3.msra.mxu0 %v1872_v3 }
  0xc1   : > { %2523 = vmatpush3.msra.mxu1 %v1872_v3  ;;  %2474 = vmatprep.subr.mxu0 %v1871_v6 }
  0xc2   : > { %2508 = vmatprep.subr.mxu1 %v1871_v6  ;;  %2475 = vmatpush3.msra.mxu0 %v1871_v6 }
  0xc3   : > { %2524 = vmatpush3.msra.mxu1 %v1871_v6  ;;  %2476 = vmatprep.subr.mxu0 %v1870_v7 }
  0xc4   : > { %2509 = vmatprep.subr.mxu1 %v1870_v7  ;;  %2477 = vmatpush3.msra.mxu0 %v1870_v7 }
  0xc5   : > { %2525 = vmatpush3.msra.mxu1 %v1870_v7  ;;  %2478 = vmatprep.subr.mxu0 %v1869_v12 }
  0xc6   : > { %2510 = vmatprep.subr.mxu1 %v1869_v12  ;;  %2479 = vmatpush3.msra.mxu0 %v1869_v12 }
  0xc7   : > { %2526 = vmatpush3.msra.mxu1 %v1869_v12  ;;  %2480 = vmatprep.subr.mxu0 %v1868_v30 }
  0xc8   : > { %2511 = vmatprep.subr.mxu1 %v1868_v30  ;;  %2481 = vmatpush3.msra.mxu0 %v1868_v30 }
  0xc9   : > { %2527 = vmatpush3.msra.mxu1 %v1868_v30  ;;  %2482 = vmatprep.subr.mxu0 %v1867_v46 }
  0xca   : > { %2512 = vmatprep.subr.mxu1 %v1867_v46  ;;  %2483 = vmatpush3.msra.mxu0 %v1867_v46 }
  0xcb   : > { %2528 = vmatpush3.msra.mxu1 %v1867_v46  ;;  %2484 = vmatprep.subr.mxu0 %v1866_v47 }
  0xcc   : > { %2513 = vmatprep.subr.mxu1 %v1866_v47  ;;  %2485 = vmatpush3.msra.mxu0 %v1866_v47 }
  0xcd   : > { %2529 = vmatpush3.msra.mxu1 %v1866_v47  ;;  %2486 = vmatprep.mubr.f32.mxu0 %v1436_v4 }
  0xce   : > { %2492 = vmatprep.mubr.f32.mxu1 %v1448_v5  ;;  %2487 = vmatmul.mubr.f32.vlgmr.msra.gmra.mxu0 %v1439_v8 }
  0xcf   : > { %2493 = vmatmul.mubr.f32.vlgmr.msra.gmra.mxu1 %v1451_v9  ;;  %2489 = vmatprep.mubr.f32.mxu0 %v1442_v16 }
  0xd0   : > { %2495 = vmatprep.mubr.f32.mxu1 %v1454_v17 }
  0xd2   : > { %2490 = vmatmul.mubr.f32.gmra.mxu0 %v1445_v18 }
  0xd3   : > { %2496 = vmatmul.mubr.f32.gmra.mxu1 %v1457_v19 }
  0xee   : > { %v2136_v20 = vpop.f32.mrf.mxu0 }
  0xef   : > { %v2180_v23 = vpop.f32.mrf.mxu1 }
  0xf0   : > { %v313_v21 = vpop.f32.mrf.mxu0  ;;  %v424_v8 = vadd.f32 %v2180_v23, %v2136_v20 }
  0xf1   : > { %v418_v25 = vpop.f32.mrf.mxu1 }
  0xf2   : > { %v419_v14 = vadd.f32 %v418_v25, %v313_v21 }
 0x103   : > { %v3223_v22 = vpop.f32.mrf.mxu0 }
 0x104   : > { %v2183_v26 = vpop.f32.mrf.mxu1 }
 0x105   : > { %v323_v24 = vpop.f32.mrf.mxu0 }
 0x106   : > { %v428_v35 = vpop.f32.mrf.mxu1 }
 0x109   : > { %v2142_v27 = vpop.f32.mrf.mxu0 }
 0x10a   : > { %v2186_v54 = vpop.f32.mrf.mxu1 }
 0x10b   : > { %v333_v34 = vpop.f32.mrf.mxu0  ;;  %v444_v9 = vadd.f32 %v2186_v54, %v2142_v27 }
 0x10c   : > { %v438_v58 = vpop.f32.mrf.mxu1 }
 0x10d   : > { %v439_v15 = vadd.f32 %v438_v58, %v333_v34 }
 0x10f   : > { %v2145_v55 = vpop.f32.mrf.mxu0 }
 0x110   : > { %v2189_v62 = vpop.f32.mrf.mxu1 }
 0x111   : > { %v343_v59 = vpop.f32.mrf.mxu0 }
 0x112   : > { %v448_v2 = vpop.f32.mrf.mxu1 }
 0x113   : > { %v449_v20 = vadd.f32 %v448_v2, %v343_v59 }
 0x116   : > { %v2224_v63 = vpop.f32.mrf.mxu0 }
 0x117   : > { %v2268_v6 = vpop.f32.mrf.mxu1  ;;  %v645_v16 = vadd.f32 %v2224_v63, %v424_v8 }
 0x118   : > { %v605_v3 = vpop.f32.mrf.mxu0 }
 0x119   : > { %v743_v12 = vpop.f32.mrf.mxu1  ;;  %v644_v18 = vadd.f32 %v605_v3, %v419_v14  ;;  %v783_v27 = vadd.f32 %v2268_v6, %v645_v16 }
 0x11b   : > { %v782_v58 = vadd.f32 %v743_v12, %v644_v18 }
 0x11c   : > { %v2227_v7 = vpop.f32.mrf.mxu0 }
 0x11e   : > { %v615_v13 = vpop.f32.mrf.mxu0 }
 0x11f   : > { %v2271_v28 = vpop.f32.mrf.mxu1 }
 0x121   : > { %v753_v30 = vpop.f32.mrf.mxu1 }
 0x122   : > { %v2230_v29 = vpop.f32.mrf.mxu0 }
 0x123   : > { %v649_v17 = vadd.f32 %v2230_v29, %v444_v9 }
 0x124   : > { %v625_v31 = vpop.f32.mrf.mxu0 }
 0x125   : > { %v2274_v32 = vpop.f32.mrf.mxu1  ;;  %v648_v19 = vadd.f32 %v625_v31, %v439_v15 }
 0x126   : > { %v787_v54 = vadd.f32 %v2274_v32, %v649_v17 }
 0x127   : > { %v763_v36 = vpop.f32.mrf.mxu1 }
 0x128   : > { %v2233_v33 = vpop.f32.mrf.mxu0  ;;  %v786_v8 = vadd.f32 %v763_v36, %v648_v19 }
 0x12a   : > { %v635_v37 = vpop.f32.mrf.mxu0 }
 0x12b   : > { %v2277_v38 = vpop.f32.mrf.mxu1  ;;  %v650_v34 = vadd.f32 %v635_v37, %v449_v20 }
 0x12d   : > { %v773_v40 = vpop.f32.mrf.mxu1 }
 0x13e   : > { %v2312_v39 = vpop.f32.mrf.mxu0 }
 0x13f   : > { %v2356_v42 = vpop.f32.mrf.mxu1  ;;  %v921_v63 = vadd.f32 %v2312_v39, %v783_v27 }
 0x140   : > { %v881_v41 = vpop.f32.mrf.mxu0 }
 0x141   : > { %v1075_v44 = vpop.f32.mrf.mxu1  ;;  %v920_v31 = vadd.f32 %v881_v41, %v782_v58 }
 0x143   : > { %v1114_v12 = vadd.f32 %v1075_v44, %v920_v31 }
 0x144   : > { %v2315_v43 = vpop.f32.mrf.mxu0 }
 0x146   : > { %v891_v46 = vpop.f32.mrf.mxu0 }
 0x147   : > { %v3225_v45 = vpop.f32.mrf.mxu1 }
 0x148   : > { %3261 = vst [vmem:[#allocation2_spill] sm:$0xff] %v3225_v45  ;;  %v434_v45 = vadd.f32 %v2183_v26, %v3223_v22  ;;  %v788_v26 = vadd.f32 %v773_v40, %v650_v34 }
 0x149   : > { %v3227_v47 = vpop.f32.mrf.mxu1 }
 0x14a   : > { %3262 = vst [vmem:[#allocation3_spill] sm:$0xff] %v3227_v47  ;;  %v2318_v48 = vpop.f32.mrf.mxu0 }
 0x14b   : > { %v925_v9 = vadd.f32 %v2318_v48, %v787_v54 }
 0x14c   : > { %v901_v50 = vpop.f32.mrf.mxu0 }
 0x14d   : > { %v2362_v49 = vpop.f32.mrf.mxu1  ;;  %v924_v14 = vadd.f32 %v901_v50, %v786_v8 }
 0x14f   : > { %v1095_v51 = vpop.f32.mrf.mxu1 }
 0x150   : > { %v2321_v52 = vpop.f32.mrf.mxu0  ;;  %v1118_v32 = vadd.f32 %v1095_v51, %v924_v14 }
 0x152   : > { %v911_v56 = vpop.f32.mrf.mxu0 }
 0x153   : > { %v2365_v53 = vpop.f32.mrf.mxu1 }
 0x155   : > { %v1105_v60 = vpop.f32.mrf.mxu1 }
 0x166   : > { %v2400_v57 = vpop.f32.mrf.mxu0 }
 0x167   : > { %v2444_v61 = vpop.f32.mrf.mxu1 }
 0x168   : > { %v1217_v0 = vpop.f32.mrf.mxu0 }
 0x169   : > { %v3229_v1 = vpop.f32.mrf.mxu1  ;;  %v1256_v37 = vadd.f32 %v1217_v0, %v1114_v12 }
 0x16a   : > { %3263 = vst [vmem:[#allocation4_spill] sm:$0xff] %v3229_v1  ;;  %v429_v1 = vadd.f32 %v428_v35, %v323_v24  ;;  %v1115_v35 = vadd.f32 %v2356_v42, %v921_v63 }
 0x16c   : > { %v2403_v4 = vpop.f32.mrf.mxu0  ;;  %v646_v21 = vadd.f32 %v615_v13, %v429_v1 }
 0x16e   : > { %v1227_v10 = vpop.f32.mrf.mxu0  ;;  %v784_v22 = vadd.f32 %v753_v30, %v646_v21  ;;  %v3267_v30 = vld [vmem:[#allocation3_spill] sm:$0xff] }
 0x16f   : > { %v3231_v5 = vpop.f32.mrf.mxu1 }
 0x170   : > { %3264 = vst [vmem:[#allocation5_spill] sm:$0xff] %v3231_v5  ;;  %v454_v5 = vadd.f32 %v2189_v62, %v2145_v55  ;;  %v1119_v55 = vadd.f32 %v2362_v49, %v925_v9  ;;  %v922_v2 = vadd.f32 %v891_v46, %v784_v22 }
 0x171   : > { %v3233_v11 = vpop.f32.mrf.mxu1 }
 0x172   : > { %3265 = vst [vmem:[#allocation6_spill] sm:$0xff] %v3233_v11  ;;  %v2406_v47 = vpop.f32.mrf.mxu0  ;;  %v647_v11 = vadd.f32 %v2227_v7, %v434_v45  ;;  %v651_v25 = vadd.f32 %v2233_v33, %v454_v5  ;;  %v926_v7 = vadd.f32 %v911_v56, %v788_v26  ;;  %v1257_v33 = vadd.f32 %v2400_v57, %v1115_v35  ;;  %v3266_v45 = vld [vmem:[#allocation2_spill] sm:$0xff]  ;;  %v3268_v57 = vld [vmem:[#allocation4_spill] sm:$0xff] }
 0x173   : > { %v1261_v36 = vadd.f32 %v2406_v47, %v1119_v55  ;;  %v1882_v47 = vld [vmem:[%s3259_s2] ss:$0 sm:$0xff]  ;;  %v1394_v0 = vadd.f32 %v3268_v57, %v1256_v37 }
 0x174   : > { %v1237_v29 = vpop.f32.mrf.mxu0  ;;  %v785_v15 = vadd.f32 %v2271_v28, %v647_v11  ;;  %v789_v24 = vadd.f32 %v2277_v38, %v651_v25  ;;  %v1116_v38 = vadd.f32 %v3267_v30, %v922_v2  ;;  %v1120_v42 = vadd.f32 %v1105_v60, %v926_v7 }
 0x175   : > { %v2450_v23 = vpop.f32.mrf.mxu1  ;;  %v1260_v39 = vadd.f32 %v1237_v29, %v1118_v32 }
 0x176   : > { %v923_v62 = vadd.f32 %v2315_v43, %v785_v15  ;;  %v927_v6 = vadd.f32 %v2321_v52, %v789_v24  ;;  %v1395_v43 = vadd.f32 %v2444_v61, %v1257_v33  ;;  %v1399_v46 = vadd.f32 %v2450_v23, %v1261_v36 }
 0x177   : > { %v1375_v3 = vpop.f32.mrf.mxu1  ;;  %v1258_v50 = vadd.f32 %v1227_v10, %v1116_v38  ;;  %v3269_v17 = vld [vmem:[#allocation5_spill] sm:$0xff] }
 0x178   : > { %v2409_v59 = vpop.f32.mrf.mxu0  ;;  %v1117_v28 = vadd.f32 %v3266_v45, %v923_v62  ;;  %v1121_v40 = vadd.f32 %v2365_v53, %v927_v6  ;;  %v1398_v1 = vadd.f32 %v1375_v3, %v1260_v39 }
 0x179   : > { %v3270_v19 = vld [vmem:[#allocation6_spill] sm:$0xff] }
 0x17a   : > { %v1247_v41 = vpop.f32.mrf.mxu0  ;;  %v1259_v49 = vadd.f32 %v2403_v4, %v1117_v28  ;;  %v1263_v52 = vadd.f32 %v2409_v59, %v1121_v40  ;;  %v1396_v20 = vadd.f32 %v3270_v19, %v1258_v50 }
 0x17b   : > { %v2453_v13 = vpop.f32.mrf.mxu1  ;;  %v1262_v44 = vadd.f32 %v1247_v41, %v1120_v42 }
 0x17c   : > { %v1397_v18 = vadd.f32 %v3269_v17, %v1259_v49  ;;  %v1401_v23 = vadd.f32 %v2453_v13, %v1263_v52 }
 0x17d   : > { %v1385_v48 = vpop.f32.mrf.mxu1 }
 0x17e   : > { %v1400_v27 = vadd.f32 %v1385_v48, %v1262_v44 }
 0x18e   : > { %v2488_v51 = vpop.f32.mrf.mxu0 }
 0x18f   : > { %v2494_v56 = vpop.f32.mrf.mxu1  ;;  %v1589_v5 = vadd.f32 %v2488_v51, %v1395_v43 }
 0x190   : > { %v1593_v53 = vadd.f32 %v2494_v56, %v1399_v46  ;;  %v1549_v60 = vpop.f32.mrf.mxu0 }
 0x191   : > { %v1569_v11 = vpop.f32.mrf.mxu1  ;;  %v1604_v61 = vadd.f32 %v1882_v47, %v1589_v5  ;;  %v1588_v4 = vadd.f32 %v1549_v60, %v1394_v0 }
 0x192   : > { %v1608_v16 = vadd.f32 %v1882_v47, %v1593_v53  ;;  %v1592_v10 = vadd.f32 %v1569_v11, %v1398_v1  ;;  %v2491_v54 = vpop.f32.mrf.mxu0 }
 0x193   : > { %v2497_v21 = vpop.f32.mrf.mxu1  ;;  %v1612_v25 = vmax.f32 %v1604_v61, 0.0  ;;  %v1603_v58 = vadd.f32 %v1882_v47, %v1588_v4  ;;  %v1591_v63 = vadd.f32 %v2491_v54, %v1397_v18 }
 0x194   : > { %v1616_v34 = vmax.f32 %v1608_v16, 0.0  ;;  %v1607_v8 = vadd.f32 %v1882_v47, %v1592_v10  ;;  %v1595_v9 = vadd.f32 %v2497_v21, %v1401_v23  ;;  %v1559_v29 = vpop.f32.mrf.mxu0 }
 0x195   : > { %v1579_v3 = vpop.f32.mrf.mxu1  ;;  %1620 = vst [vmem:[%s192_s23 + $0x8] sm:$0xff] %v1612_v25  ;;  %v1611_v31 = vmax.f32 %v1603_v58, 0.0  ;;  %v1590_v15 = vadd.f32 %v1559_v29, %v1396_v20  ;;  %v1606_v24 = vadd.f32 %v1882_v47, %v1591_v63 }
 0x196   : > { %1624 = vst [vmem:[%s192_s23 + $0x28] sm:$0xff] %v1616_v34  ;;  %v1615_v14 = vmax.f32 %v1607_v8, 0.0  ;;  %v1594_v22 = vadd.f32 %v1579_v3, %v1400_v27  ;;  %v1610_v26 = vadd.f32 %v1882_v47, %v1595_v9 }
 0x197   : > { %1619 = vst [vmem:[%s192_s23] sm:$0xff] %v1611_v31  ;;  %v1605_v35 = vadd.f32 %v1882_v47, %v1590_v15  ;;  %v1614_v59 = vmax.f32 %v1606_v24, 0.0 }
 0x198   : > { %1623 = vst [vmem:[%s192_s23 + $0x20] sm:$0xff] %v1615_v14  ;;  %v1609_v55 = vadd.f32 %v1882_v47, %v1594_v22  ;;  %v1618_v62 = vmax.f32 %v1610_v26, 0.0 }
 0x199   : > { %v1613_v2 = vmax.f32 %v1605_v35, 0.0  ;;  %1622 = vst [vmem:[%s192_s23 + $0x18] sm:$0xff] %v1614_v59 }
 0x19a   : > { %v1617_v6 = vmax.f32 %v1609_v55, 0.0  ;;  %1626 = vst [vmem:[%s192_s23 + $0x38] sm:$0xff] %v1618_v62 }
 0x19b   : > { %1621 = vst [vmem:[%s192_s23 + $0x10] sm:$0xff] %v1613_v2 }
 0x19c   : > { %1625 = vst [vmem:[%s192_s23 + $0x30] sm:$0xff] %v1617_v6 }
 0x19d PF: > { %s13_s14 = sadd.s32 1, %s2577_s14   ;;  %s3271_s12 = smov %s2573_s13 }
 0x19e   : > { %p10_p5 = scmp.ge.s32.totalorder %s13_s14, 4   ;;  %s3272_s13 = smov %s3274_s15 }
 0x1a0   :  { %12 = sbr.rel (!%p10_p5) target bundleno = 2 (0x2), region = 72 }

// kernel: resnet_layer_fwd.5
= control target key start
LH: loop header
LB: loop body
LE: loop exit
PB: predicated region body
PF: predicated region fallthrough
CT: control target
= control target key end

     0   :  { %s2745_s18 = smov 0   ;;  %s2747_s19 = smov 0   ;;  %s3481_s0 = inlined_call_operand.vmem [shape: f32[2,10,10,128], index: 0, kind: input, shape index: {}]   ;;  %s3482_s1 = inlined_call_operand.vmem [shape: f32[9,128,128], index: 1, kind: input, shape index: {}]   ;;  %s3483_s2 = inlined_call_operand.vmem [shape: f32[1,128], index: 2, kind: input, shape index: {}]   ;;  %s3484_s3 = inlined_call_operand.vmem [shape: f32[2,8,8,128], index: 3, kind: input, shape index: {}]   ;;  %s3485_s4 = inlined_call_operand.vmem [shape: f32[128,128], index: 4, kind: input, shape index: {}]   ;;  %s3486_s5 = inlined_call_operand.vmem [shape: f32[2,8,8,128], index: 5, kind: output, shape index: {}]  }
   0x1   :  { %s2749_s20 = smov 0  }
   0x2 LB: > { %s27_s21 = sadd.s32 1, %s2709_s19  ;;  %p1799_p0 = scmp.ge.s32.totalorder %s2713_s20, 1  ;;  %s2713_s20 = sphi %s2749_s20, %s15_s20   ;;  %s2709_s19 = sphi %s2747_s19, %s3506_s19   ;;  %s2705_s18 = sphi %s2745_s18, %s3505_s18  }
   0x3   : > { %p29_p1 = scmp.ge.s32.totalorder %s27_s21, 2  ;;  %p218_p2 = scmp.lt.s32.totalorder %s2713_s20, 3 }
   0x5   : > { %s3508_s21 = smov (%p29_p1, %s27_s21), 0  ;;  %p219_p3 = pnand %p1799_p0, %p218_p2 }
   0x7   : > { %222 = sbr.rel (%p219_p3) target bundleno = 422 (0x1a6), region = 40 }
   0xc   : > { %v1820_v0 = vld [vmem:[%s3482_s1 + $0xf8] sm:$0xff]  ;;  %v1819_v2 = vld [vmem:[%s3482_s1 + $0xf0] sm:$0xff]  ;;  %v1818_v4 = vld [vmem:[%s3482_s1 + $0xe8] sm:$0xff]  ;;  %p259_p4 = scmp.lt.s32.totalorder %s2705_s18, 1 }
   0xd   : > { %v310_v1 = vld [vmem:[%s3482_s1 + $0x78] sm:$0xff]  ;;  %2226 = vmatprep.subr.mxu0 %v1820_v0  ;;  %v309_v3 = vld [vmem:[%s3482_s1 + $0x70] sm:$0xff]  ;;  %v308_v5 = vld [vmem:[%s3482_s1 + $0x68] sm:$0xff] }
   0xe   : > { %2270 = vmatprep.subr.mxu1 %v310_v1  ;;  %2227 = vmatpush3.msra.mxu0 %v1820_v0  ;;  %v1817_v6 = vld [vmem:[%s3482_s1 + $0xe0] sm:$0xff]  ;;  %v1816_v8 = vld [vmem:[%s3482_s1 + $0xd8] sm:$0xff]  ;;  %v1815_v10 = vld [vmem:[%s3482_s1 + $0xd0] sm:$0xff]  ;;  %s3510_s18 = smov (!%p259_p4, %s2705_s18), 1 }
   0xf   : > { %2271 = vmatpush3.msra.mxu1 %v310_v1  ;;  %2228 = vmatprep.subr.mxu0 %v1819_v2  ;;  %v307_v7 = vld [vmem:[%s3482_s1 + $0x60] sm:$0xff]  ;;  %v306_v9 = vld [vmem:[%s3482_s1 + $0x58] sm:$0xff]  ;;  %v305_v11 = vld [vmem:[%s3482_s1 + $0x50] sm:$0xff]  ;;  %s2666_s7 = smul.u32 160, %s3510_s18  ;;  %s1984_s10 = sshll.u32 %s3510_s18, 6 }
  0x10   : > { %2272 = vmatprep.subr.mxu1 %v309_v3  ;;  %2229 = vmatpush3.msra.mxu0 %v1819_v2  ;;  %v1814_v12 = vld [vmem:[%s3482_s1 + $0xc8] sm:$0xff]  ;;  %v1813_v14 = vld [vmem:[%s3482_s1 + $0xc0] sm:$0xff]  ;;  %v1812_v16 = vld [vmem:[%s3482_s1 + $0xb8] sm:$0xff]  ;;  %s3391_s17 = scalar_lea.vmem %s3484_s3, %s1984_s10  ;;  %s3459_s30 = scalar_lea.vmem %s3486_s5, %s1984_s10 }
  0x11   : > { %2273 = vmatpush3.msra.mxu1 %v309_v3  ;;  %2230 = vmatprep.subr.mxu0 %v1818_v4  ;;  %v304_v13 = vld [vmem:[%s3482_s1 + $0x48] sm:$0xff]  ;;  %v303_v15 = vld [vmem:[%s3482_s1 + $0x40] sm:$0xff]  ;;  %v302_v17 = vld [vmem:[%s3482_s1 + $0x38] sm:$0xff]  ;;  %s2863_s22 = scalar_lea.vmem %s3481_s0, %s2666_s7 }
  0x12   : > { %2274 = vmatprep.subr.mxu1 %v308_v5  ;;  %2231 = vmatpush3.msra.mxu0 %v1818_v4  ;;  %v1811_v18 = vld [vmem:[%s3482_s1 + $0xb0] sm:$0xff]  ;;  %v1810_v20 = vld [vmem:[%s3482_s1 + $0xa8] sm:$0xff]  ;;  %v1809_v22 = vld [vmem:[%s3482_s1 + $0xa0] sm:$0xff] }
  0x13   : > { %2275 = vmatpush3.msra.mxu1 %v308_v5  ;;  %2232 = vmatprep.subr.mxu0 %v1817_v6  ;;  %v301_v19 = vld [vmem:[%s3482_s1 + $0x30] sm:$0xff]  ;;  %v300_v21 = vld [vmem:[%s3482_s1 + $0x28] sm:$0xff]  ;;  %v299_v23 = vld [vmem:[%s3482_s1 + $0x20] sm:$0xff] }
  0x14   : > { %2276 = vmatprep.subr.mxu1 %v307_v7  ;;  %2233 = vmatpush3.msra.mxu0 %v1817_v6  ;;  %v1808_v24 = vld [vmem:[%s3482_s1 + $0x98] sm:$0xff]  ;;  %v1807_v26 = vld [vmem:[%s3482_s1 + $0x90] sm:$0xff]  ;;  %v1806_v28 = vld [vmem:[%s3482_s1 + $0x88] sm:$0xff] }
  0x15   : > { %2277 = vmatpush3.msra.mxu1 %v307_v7  ;;  %2234 = vmatprep.subr.mxu0 %v1816_v8  ;;  %v298_v25 = vld [vmem:[%s3482_s1 + $0x18] sm:$0xff]  ;;  %v297_v27 = vld [vmem:[%s3482_s1 + $0x10] sm:$0xff]  ;;  %v296_v29 = vld [vmem:[%s3482_s1 + $0x8] sm:$0xff] }
  0x16   : > { %2278 = vmatprep.subr.mxu1 %v306_v9  ;;  %2235 = vmatpush3.msra.mxu0 %v1816_v8  ;;  %v1805_v30 = vld [vmem:[%s3482_s1 + $0x80] sm:$0xff]  ;;  %v2874_v34 = vld [vmem:[%s2863_s22 + $0x11] sm:$0xff]  ;;  %v1834_v40 = vld [vmem:[%s3482_s1 + $0x168] sm:$0xff] }
  0x17   : > { %2279 = vmatpush3.msra.mxu1 %v306_v9  ;;  %2236 = vmatprep.subr.mxu0 %v1815_v10  ;;  %v295_v31 = vld [vmem:[%s3482_s1] sm:$0xff]  ;;  %v2877_v35 = vld [vmem:[%s2863_s22 + $0x10] sm:$0xff]  ;;  %v1836_v36 = vld [vmem:[%s3482_s1 + $0x178] sm:$0xff] }
  0x18   : > { %2280 = vmatprep.subr.mxu1 %v305_v11  ;;  %2237 = vmatpush3.msra.mxu0 %v1815_v10  ;;  %v311_v32 = vld [vmem:[%s2863_s22 + $0x1] sm:$0xff]  ;;  %v1860_v37 = vld [vmem:[%s3482_s1 + $0x1f8] sm:$0xff]  ;;  %v1835_v38 = vld [vmem:[%s3482_s1 + $0x170] sm:$0xff] }
  0x19   : > { %2281 = vmatpush3.msra.mxu1 %v305_v11  ;;  %2238 = vmatprep.subr.mxu0 %v1814_v12  ;;  %v287_v33 = vld [vmem:[%s2863_s22] sm:$0xff]  ;;  %v1859_v39 = vld [vmem:[%s3482_s1 + $0x1f0] sm:$0xff]  ;;  %v1858_v41 = vld [vmem:[%s3482_s1 + $0x1e8] sm:$0xff] }
  0x1a   : > { %2282 = vmatprep.subr.mxu1 %v304_v13  ;;  %2239 = vmatpush3.msra.mxu0 %v1814_v12  ;;  %v1833_v42 = vld [vmem:[%s3482_s1 + $0x160] sm:$0xff]  ;;  %v1832_v44 = vld [vmem:[%s3482_s1 + $0x158] sm:$0xff]  ;;  %v1831_v46 = vld [vmem:[%s3482_s1 + $0x150] sm:$0xff] }
  0x1b   : > { %2283 = vmatpush3.msra.mxu1 %v304_v13  ;;  %2240 = vmatprep.subr.mxu0 %v1813_v14  ;;  %v1857_v43 = vld [vmem:[%s3482_s1 + $0x1e0] sm:$0xff]  ;;  %v1856_v45 = vld [vmem:[%s3482_s1 + $0x1d8] sm:$0xff]  ;;  %v1855_v47 = vld [vmem:[%s3482_s1 + $0x1d0] sm:$0xff] }
  0x1c   : > { %2284 = vmatprep.subr.mxu1 %v303_v15  ;;  %2241 = vmatpush3.msra.mxu0 %v1813_v14  ;;  %v1830_v48 = vld [vmem:[%s3482_s1 + $0x148] sm:$0xff]  ;;  %v1829_v50 = vld [vmem:[%s3482_s1 + $0x140] sm:$0xff]  ;;  %v1828_v52 = vld [vmem:[%s3482_s1 + $0x138] sm:$0xff] }
  0x1d   : > { %2285 = vmatpush3.msra.mxu1 %v303_v15  ;;  %2242 = vmatprep.subr.mxu0 %v1812_v16  ;;  %v1854_v49 = vld [vmem:[%s3482_s1 + $0x1c8] sm:$0xff]  ;;  %v1853_v51 = vld [vmem:[%s3482_s1 + $0x1c0] sm:$0xff]  ;;  %v1852_v53 = vld [vmem:[%s3482_s1 + $0x1b8] sm:$0xff] }
  0x1e   : > { %2286 = vmatprep.subr.mxu1 %v302_v17  ;;  %2243 = vmatpush3.msra.mxu0 %v1812_v16  ;;  %v2936_v54 = vld [vmem:[%s2863_s22 + $0x21] sm:$0xff]  ;;  %v1827_v56 = vld [vmem:[%s3482_s1 + $0x130] sm:$0xff]  ;;  %v1824_v4 = vld [vmem:[%s3482_s1 + $0x118] sm:$0xff] }
  0x1f   : > { %2287 = vmatpush3.msra.mxu1 %v302_v17  ;;  %2244 = vmatprep.subr.mxu0 %v1811_v18  ;;  %v2939_v55 = vld [vmem:[%s2863_s22 + $0x20] sm:$0xff]  ;;  %v1851_v57 = vld [vmem:[%s3482_s1 + $0x1b0] sm:$0xff]  ;;  %v1826_v60 = vld [vmem:[%s3482_s1 + $0x128] sm:$0xff] }
  0x20   : > { %2288 = vmatprep.subr.mxu1 %v301_v19  ;;  %2245 = vmatpush3.msra.mxu0 %v1811_v18  ;;  %v2948_v58 = vld [vmem:[%s2863_s22 + $0x31] sm:$0xff]  ;;  %v1850_v61 = vld [vmem:[%s3482_s1 + $0x1a8] sm:$0xff]  ;;  %v2967_v63 = vld [vmem:[%s2863_s22 + $0x40] sm:$0xff] }
  0x21   : > { %2289 = vmatpush3.msra.mxu1 %v301_v19  ;;  %2246 = vmatprep.subr.mxu0 %v1810_v20  ;;  %v2951_v59 = vld [vmem:[%s2863_s22 + $0x30] sm:$0xff]  ;;  %v2964_v62 = vld [vmem:[%s2863_s22 + $0x41] sm:$0xff]  ;;  %v1848_v5 = vld [vmem:[%s3482_s1 + $0x198] sm:$0xff] }
  0x22   : > { %2290 = vmatprep.subr.mxu1 %v300_v21  ;;  %2247 = vmatpush3.msra.mxu0 %v1810_v20  ;;  %v1825_v0 = vld [vmem:[%s3482_s1 + $0x120] sm:$0xff]  ;;  %v2976_v2 = vld [vmem:[%s2863_s22 + $0x51] sm:$0xff]  ;;  %v1822_v12 = vld [vmem:[%s3482_s1 + $0x108] sm:$0xff] }
  0x23   : > { %2291 = vmatpush3.msra.mxu1 %v300_v21  ;;  %2248 = vmatprep.subr.mxu0 %v1809_v22  ;;  %v1849_v1 = vld [vmem:[%s3482_s1 + $0x1a0] sm:$0xff]  ;;  %v2979_v3 = vld [vmem:[%s2863_s22 + $0x50] sm:$0xff]  ;;  %v1846_v13 = vld [vmem:[%s3482_s1 + $0x188] sm:$0xff] }
  0x24   : > { %2292 = vmatprep.subr.mxu1 %v299_v23  ;;  %2249 = vmatpush3.msra.mxu0 %v1809_v22  ;;  %v2992_v6 = vld [vmem:[%s2863_s22 + $0x61] sm:$0xff]  ;;  %v1823_v8 = vld [vmem:[%s3482_s1 + $0x110] sm:$0xff]  ;;  %v1884_v18 = vld [vmem:[%s3482_s1 + $0x278] sm:$0xff] }
  0x25   : > { %2293 = vmatpush3.msra.mxu1 %v299_v23  ;;  %2250 = vmatprep.subr.mxu0 %v1808_v24  ;;  %v2995_v7 = vld [vmem:[%s2863_s22 + $0x60] sm:$0xff]  ;;  %v1847_v9 = vld [vmem:[%s3482_s1 + $0x190] sm:$0xff]  ;;  %v1908_v19 = vld [vmem:[%s3482_s1 + $0x2f8] sm:$0xff] }
  0x26   : > { %2294 = vmatprep.subr.mxu1 %v298_v25  ;;  %2251 = vmatpush3.msra.mxu0 %v1808_v24  ;;  %v3004_v10 = vld [vmem:[%s2863_s22 + $0x71] sm:$0xff]  ;;  %v1821_v14 = vld [vmem:[%s3482_s1 + $0x100] sm:$0xff]  ;;  %v1882_v24 = vld [vmem:[%s3482_s1 + $0x268] sm:$0xff] }
  0x27   : > { %2295 = vmatpush3.msra.mxu1 %v298_v25  ;;  %2252 = vmatprep.subr.mxu0 %v1807_v26  ;;  %v3007_v11 = vld [vmem:[%s2863_s22 + $0x70] sm:$0xff]  ;;  %v1845_v15 = vld [vmem:[%s3482_s1 + $0x180] sm:$0xff]  ;;  %v1906_v25 = vld [vmem:[%s3482_s1 + $0x2e8] sm:$0xff] }
  0x28   : > { %2296 = vmatprep.subr.mxu1 %v297_v27  ;;  %2253 = vmatpush3.msra.mxu0 %v1807_v26  ;;  %v546_v16 = vld [vmem:[%s2863_s22 + $0x2] sm:$0xff]  ;;  %v3027_v17 = vld [vmem:[%s2863_s22 + $0x12] sm:$0xff] }
  0x29   : > { %2297 = vmatpush3.msra.mxu1 %v297_v27  ;;  %2254 = vmatprep.subr.mxu0 %v1806_v28  ;;  %v1883_v20 = vld [vmem:[%s3482_s1 + $0x270] sm:$0xff]  ;;  %v3045_v22 = vld [vmem:[%s2863_s22 + $0x22] sm:$0xff] }
  0x2a   : > { %2298 = vmatprep.subr.mxu1 %v296_v29  ;;  %2255 = vmatpush3.msra.mxu0 %v1806_v28  ;;  %v1907_v21 = vld [vmem:[%s3482_s1 + $0x2f0] sm:$0xff]  ;;  %v1881_v26 = vld [vmem:[%s3482_s1 + $0x260] sm:$0xff] }
  0x2b   : > { %2299 = vmatpush3.msra.mxu1 %v296_v29  ;;  %2256 = vmatprep.subr.mxu0 %v1805_v30  ;;  %v3048_v23 = vld [vmem:[%s2863_s22 + $0x32] sm:$0xff]  ;;  %v1905_v27 = vld [vmem:[%s3482_s1 + $0x2e0] sm:$0xff] }
  0x2c   : > { %2300 = vmatprep.subr.mxu1 %v295_v31  ;;  %2257 = vmatpush3.msra.mxu0 %v1805_v30  ;;  %v3066_v28 = vld [vmem:[%s2863_s22 + $0x42] sm:$0xff]  ;;  %v3069_v29 = vld [vmem:[%s2863_s22 + $0x52] sm:$0xff] }
  0x2d   : > { %2258 = vmatprep.mubr.f32.mxu0 %v311_v32  ;;  %2301 = vmatpush3.msra.mxu1 %v295_v31  ;;  %v1880_v30 = vld [vmem:[%s3482_s1 + $0x258] sm:$0xff]  ;;  %v1879_v32 = vld [vmem:[%s3482_s1 + $0x250] sm:$0xff] }
  0x2e   : > { %2302 = vmatprep.mubr.f32.mxu1 %v287_v33  ;;  %2259 = vmatmul.mubr.f32.vlgmr.msra.gmra.mxu0 %v2874_v34  ;;  %v1904_v31 = vld [vmem:[%s3482_s1 + $0x2d8] sm:$0xff]  ;;  %v1903_v33 = vld [vmem:[%s3482_s1 + $0x2d0] sm:$0xff] }
  0x2f   : > { %2303 = vmatmul.mubr.f32.vlgmr.msra.gmra.mxu1 %v2877_v35  ;;  %2314 = vmatprep.subr.mxu0 %v1836_v36 }
  0x30   : > { %2358 = vmatprep.subr.mxu1 %v1860_v37  ;;  %2315 = vmatpush3.msra.mxu0 %v1836_v36  ;;  %v3091_v36 = vld [vmem:[%s2863_s22 + $0x72] sm:$0xff] }
  0x31   : > { %2359 = vmatpush3.msra.mxu1 %v1860_v37  ;;  %2316 = vmatprep.subr.mxu0 %v1835_v38  ;;  %v1878_v37 = vld [vmem:[%s3482_s1 + $0x248] sm:$0xff] }
  0x32   : > { %2360 = vmatprep.subr.mxu1 %v1859_v39  ;;  %2317 = vmatpush3.msra.mxu0 %v1835_v38  ;;  %v1902_v38 = vld [vmem:[%s3482_s1 + $0x2c8] sm:$0xff] }
  0x33   : > { %2361 = vmatpush3.msra.mxu1 %v1859_v39  ;;  %2318 = vmatprep.subr.mxu0 %v1834_v40  ;;  %v1877_v39 = vld [vmem:[%s3482_s1 + $0x240] sm:$0xff] }
  0x34   : > { %2362 = vmatprep.subr.mxu1 %v1858_v41  ;;  %2319 = vmatpush3.msra.mxu0 %v1834_v40  ;;  %v3106_v40 = vld [vmem:[%s2863_s22 + $0x80] sm:$0xff] }
  0x35   : > { %2363 = vmatpush3.msra.mxu1 %v1858_v41  ;;  %2320 = vmatprep.subr.mxu0 %v1833_v42  ;;  %v1901_v41 = vld [vmem:[%s3482_s1 + $0x2c0] sm:$0xff] }
  0x36   : > { %2364 = vmatprep.subr.mxu1 %v1857_v43  ;;  %2321 = vmatpush3.msra.mxu0 %v1833_v42  ;;  %v1876_v42 = vld [vmem:[%s3482_s1 + $0x238] sm:$0xff] }
  0x37   : > { %2365 = vmatpush3.msra.mxu1 %v1857_v43  ;;  %2322 = vmatprep.subr.mxu0 %v1832_v44  ;;  %v1900_v43 = vld [vmem:[%s3482_s1 + $0x2b8] sm:$0xff] }
  0x38   : > { %2366 = vmatprep.subr.mxu1 %v1856_v45  ;;  %2323 = vmatpush3.msra.mxu0 %v1832_v44  ;;  %v1875_v44 = vld [vmem:[%s3482_s1 + $0x230] sm:$0xff] }
  0x39   : > { %2367 = vmatpush3.msra.mxu1 %v1856_v45  ;;  %2324 = vmatprep.subr.mxu0 %v1831_v46  ;;  %v1899_v45 = vld [vmem:[%s3482_s1 + $0x2b0] sm:$0xff] }
  0x3a   : > { %2368 = vmatprep.subr.mxu1 %v1855_v47  ;;  %2325 = vmatpush3.msra.mxu0 %v1831_v46  ;;  %v1874_v46 = vld [vmem:[%s3482_s1 + $0x228] sm:$0xff] }
  0x3b   : > { %2369 = vmatpush3.msra.mxu1 %v1855_v47  ;;  %2326 = vmatprep.subr.mxu0 %v1830_v48  ;;  %v1898_v47 = vld [vmem:[%s3482_s1 + $0x2a8] sm:$0xff] }
  0x3c   : > { %2370 = vmatprep.subr.mxu1 %v1854_v49  ;;  %2327 = vmatpush3.msra.mxu0 %v1830_v48  ;;  %v1873_v48 = vld [vmem:[%s3482_s1 + $0x220] sm:$0xff] }
  0x3d   : > { %2371 = vmatpush3.msra.mxu1 %v1854_v49  ;;  %2328 = vmatprep.subr.mxu0 %v1829_v50  ;;  %v1897_v49 = vld [vmem:[%s3482_s1 + $0x2a0] sm:$0xff] }
  0x3e   : > { %2372 = vmatprep.subr.mxu1 %v1853_v51  ;;  %2329 = vmatpush3.msra.mxu0 %v1829_v50  ;;  %v1872_v50 = vld [vmem:[%s3482_s1 + $0x218] sm:$0xff] }
  0x3f   : > { %2373 = vmatpush3.msra.mxu1 %v1853_v51  ;;  %2330 = vmatprep.subr.mxu0 %v1828_v52  ;;  %v1896_v51 = vld [vmem:[%s3482_s1 + $0x298] sm:$0xff] }
  0x40   : > { %2374 = vmatprep.subr.mxu1 %v1852_v53  ;;  %2331 = vmatpush3.msra.mxu0 %v1828_v52  ;;  %v1871_v52 = vld [vmem:[%s3482_s1 + $0x210] sm:$0xff] }
  0x41   : > { %2375 = vmatpush3.msra.mxu1 %v1852_v53  ;;  %2261 = vmatprep.mubr.f32.mxu0 %v2936_v54  ;;  %v1895_v53 = vld [vmem:[%s3482_s1 + $0x290] sm:$0xff] }
  0x42   : > { %2305 = vmatprep.mubr.f32.mxu1 %v2939_v55  ;;  %2332 = vmatprep.subr.mxu0 %v1827_v56 }
  0x43   : > { %2376 = vmatprep.subr.mxu1 %v1851_v57  ;;  %2262 = vmatmul.mubr.f32.gmra.mxu0 %v2948_v58 }
  0x44   : > { %2306 = vmatmul.mubr.f32.gmra.mxu1 %v2951_v59  ;;  %2333 = vmatpush3.msra.mxu0 %v1827_v56  ;;  %v1870_v56 = vld [vmem:[%s3482_s1 + $0x208] sm:$0xff] }
  0x45   : > { %2377 = vmatpush3.msra.mxu1 %v1851_v57  ;;  %2334 = vmatprep.subr.mxu0 %v1826_v60  ;;  %v1894_v57 = vld [vmem:[%s3482_s1 + $0x288] sm:$0xff] }
  0x46   : > { %2378 = vmatprep.subr.mxu1 %v1850_v61  ;;  %2335 = vmatpush3.msra.mxu0 %v1826_v60  ;;  %v1869_v60 = vld [vmem:[%s3482_s1 + $0x200] sm:$0xff] }
  0x47   : > { %2379 = vmatpush3.msra.mxu1 %v1850_v61  ;;  %2264 = vmatprep.mubr.f32.mxu0 %v2964_v62  ;;  %v1893_v61 = vld [vmem:[%s3482_s1 + $0x280] sm:$0xff] }
  0x48   : > { %2308 = vmatprep.mubr.f32.mxu1 %v2967_v63  ;;  %2336 = vmatprep.subr.mxu0 %v1825_v0 }
  0x49   : > { %2380 = vmatprep.subr.mxu1 %v1849_v1  ;;  %2265 = vmatmul.mubr.f32.gmra.mxu0 %v2976_v2 }
  0x4a   : > { %2309 = vmatmul.mubr.f32.gmra.mxu1 %v2979_v3  ;;  %2337 = vmatpush3.msra.mxu0 %v1825_v0  ;;  %v1932_v0 = vld [vmem:[%s3482_s1 + $0x378] sm:$0xff] }
  0x4b   : > { %2381 = vmatpush3.msra.mxu1 %v1849_v1  ;;  %2338 = vmatprep.subr.mxu0 %v1824_v4  ;;  %v1956_v1 = vld [vmem:[%s3482_s1 + $0x3f8] sm:$0xff] }
  0x4c   : > { %2382 = vmatprep.subr.mxu1 %v1848_v5  ;;  %2339 = vmatpush3.msra.mxu0 %v1824_v4  ;;  %v1931_v4 = vld [vmem:[%s3482_s1 + $0x370] sm:$0xff] }
  0x4d   : > { %2383 = vmatpush3.msra.mxu1 %v1848_v5  ;;  %2267 = vmatprep.mubr.f32.mxu0 %v2992_v6  ;;  %v1955_v5 = vld [vmem:[%s3482_s1 + $0x3f0] sm:$0xff] }
  0x4e   : > { %2311 = vmatprep.mubr.f32.mxu1 %v2995_v7  ;;  %2340 = vmatprep.subr.mxu0 %v1823_v8 }
  0x4f   : > { %2384 = vmatprep.subr.mxu1 %v1847_v9  ;;  %2268 = vmatmul.mubr.f32.gmra.mxu0 %v3004_v10 }
  0x50   : > { %2312 = vmatmul.mubr.f32.gmra.mxu1 %v3007_v11  ;;  %2341 = vmatpush3.msra.mxu0 %v1823_v8  ;;  %v1954_v8 = vld [vmem:[%s3482_s1 + $0x3e8] sm:$0xff] }
  0x51   : > { %2385 = vmatpush3.msra.mxu1 %v1847_v9  ;;  %2342 = vmatprep.subr.mxu0 %v1822_v12  ;;  %v1929_v9 = vld [vmem:[%s3482_s1 + $0x360] sm:$0xff] }
  0x52   : > { %2386 = vmatprep.subr.mxu1 %v1846_v13  ;;  %2343 = vmatpush3.msra.mxu0 %v1822_v12  ;;  %v1953_v12 = vld [vmem:[%s3482_s1 + $0x3e0] sm:$0xff] }
  0x53   : > { %2387 = vmatpush3.msra.mxu1 %v1846_v13  ;;  %2344 = vmatprep.subr.mxu0 %v1821_v14  ;;  %v1928_v13 = vld [vmem:[%s3482_s1 + $0x358] sm:$0xff] }
  0x54   : > { %2388 = vmatprep.subr.mxu1 %v1845_v15  ;;  %2345 = vmatpush3.msra.mxu0 %v1821_v14  ;;  %v1952_v14 = vld [vmem:[%s3482_s1 + $0x3d8] sm:$0xff] }
  0x55   : > { %2346 = vmatprep.mubr.f32.mxu0 %v546_v16  ;;  %2389 = vmatpush3.msra.mxu1 %v1845_v15  ;;  %v1927_v15 = vld [vmem:[%s3482_s1 + $0x350] sm:$0xff] }
  0x56   : > { %2347 = vmatmul.mubr.f32.vlgmr.msra.gmra.mxu0 %v3027_v17  ;;  %2390 = vmatprep.mubr.f32.mxu1 %v2877_v35  ;;  %v3088_v35 = vld [vmem:[%s2863_s22 + $0x62] sm:$0xff]  ;;  %v1951_v16 = vld [vmem:[%s3482_s1 + $0x3d0] sm:$0xff] }
  0x57   : > { %2402 = vmatprep.subr.mxu0 %v1884_v18  ;;  %2446 = vmatprep.subr.mxu1 %v1908_v19 }
  0x58   : > { %2391 = vmatmul.mubr.f32.vlgmr.msra.gmra.mxu1 %v2939_v55  ;;  %2403 = vmatpush3.msra.mxu0 %v1884_v18  ;;  %v1926_v18 = vld [vmem:[%s3482_s1 + $0x348] sm:$0xff] }
  0x59   : > { %2447 = vmatpush3.msra.mxu1 %v1908_v19  ;;  %2404 = vmatprep.subr.mxu0 %v1883_v20  ;;  %v1950_v19 = vld [vmem:[%s3482_s1 + $0x3c8] sm:$0xff] }
  0x5a   : > { %2448 = vmatprep.subr.mxu1 %v1907_v21  ;;  %2349 = vmatprep.mubr.f32.mxu0 %v3045_v22 }
  0x5b   : > { %2405 = vmatpush3.msra.mxu0 %v1883_v20  ;;  %2449 = vmatpush3.msra.mxu1 %v1907_v21  ;;  %v1925_v20 = vld [vmem:[%s3482_s1 + $0x340] sm:$0xff] }
  0x5c   : > { %2350 = vmatmul.mubr.f32.gmra.mxu0 %v3048_v23  ;;  %2406 = vmatprep.subr.mxu0 %v1882_v24  ;;  %v3224_v21 = vld [vmem:[%s2863_s22 + $0x82] sm:$0xff] }
  0x5d   : > { %2450 = vmatprep.subr.mxu1 %v1906_v25  ;;  %2393 = vmatprep.mubr.f32.mxu1 %v2951_v59 }
  0x5e   : > { %2407 = vmatpush3.msra.mxu0 %v1882_v24  ;;  %2451 = vmatpush3.msra.mxu1 %v1906_v25  ;;  %v1949_v24 = vld [vmem:[%s3482_s1 + $0x3c0] sm:$0xff]  ;;  %v1924_v25 = vld [vmem:[%s3482_s1 + $0x338] sm:$0xff] }
  0x5f   : > { %2408 = vmatprep.subr.mxu0 %v1881_v26  ;;  %2394 = vmatmul.mubr.f32.gmra.mxu1 %v2967_v63 }
  0x60   : > { %2452 = vmatprep.subr.mxu1 %v1905_v27  ;;  %2352 = vmatprep.mubr.f32.mxu0 %v3066_v28 }
  0x61   : > { %2409 = vmatpush3.msra.mxu0 %v1881_v26  ;;  %2453 = vmatpush3.msra.mxu1 %v1905_v27  ;;  %v1948_v26 = vld [vmem:[%s3482_s1 + $0x3b8] sm:$0xff]  ;;  %v1923_v27 = vld [vmem:[%s3482_s1 + $0x330] sm:$0xff] }
  0x62   : > { %2353 = vmatmul.mubr.f32.gmra.mxu0 %v3069_v29  ;;  %2410 = vmatprep.subr.mxu0 %v1880_v30 }
  0x63   : > { %2454 = vmatprep.subr.mxu1 %v1904_v31  ;;  %2396 = vmatprep.mubr.f32.mxu1 %v2979_v3 }
  0x64   : > { %2411 = vmatpush3.msra.mxu0 %v1880_v30  ;;  %2455 = vmatpush3.msra.mxu1 %v1904_v31  ;;  %v1947_v30 = vld [vmem:[%s3482_s1 + $0x3b0] sm:$0xff]  ;;  %v1922_v31 = vld [vmem:[%s3482_s1 + $0x328] sm:$0xff] }
  0x65   : > { %2412 = vmatprep.subr.mxu0 %v1879_v32  ;;  %2397 = vmatmul.mubr.f32.gmra.mxu1 %v2995_v7 }
  0x66   : > { %2456 = vmatprep.subr.mxu1 %v1903_v33  ;;  %2355 = vmatprep.mubr.f32.mxu0 %v3088_v35 }
  0x67   : > { %2413 = vmatpush3.msra.mxu0 %v1879_v32  ;;  %2457 = vmatpush3.msra.mxu1 %v1903_v33  ;;  %v1946_v32 = vld [vmem:[%s3482_s1 + $0x3a8] sm:$0xff]  ;;  %v1921_v33 = vld [vmem:[%s3482_s1 + $0x320] sm:$0xff] }
  0x68   : > { %2356 = vmatmul.mubr.f32.gmra.mxu0 %v3091_v36  ;;  %2414 = vmatprep.subr.mxu0 %v1878_v37 }
  0x69   : > { %2458 = vmatprep.subr.mxu1 %v1902_v38  ;;  %2399 = vmatprep.mubr.f32.mxu1 %v3007_v11 }
  0x6a   : > { %2415 = vmatpush3.msra.mxu0 %v1878_v37  ;;  %2459 = vmatpush3.msra.mxu1 %v1902_v38  ;;  %v1945_v37 = vld [vmem:[%s3482_s1 + $0x3a0] sm:$0xff]  ;;  %v1920_v38 = vld [vmem:[%s3482_s1 + $0x318] sm:$0xff] }
  0x6b   : > { %2416 = vmatprep.subr.mxu0 %v1877_v39  ;;  %2400 = vmatmul.mubr.f32.gmra.mxu1 %v3106_v40 }
  0x6c   : > { %2460 = vmatprep.subr.mxu1 %v1901_v41  ;;  %2417 = vmatpush3.msra.mxu0 %v1877_v39  ;;  %v1944_v39 = vld [vmem:[%s3482_s1 + $0x398] sm:$0xff] }
  0x6d   : > { %2461 = vmatpush3.msra.mxu1 %v1901_v41  ;;  %2418 = vmatprep.subr.mxu0 %v1876_v42  ;;  %v1919_v41 = vld [vmem:[%s3482_s1 + $0x310] sm:$0xff] }
  0x6e   : > { %2462 = vmatprep.subr.mxu1 %v1900_v43  ;;  %2419 = vmatpush3.msra.mxu0 %v1876_v42  ;;  %v1943_v42 = vld [vmem:[%s3482_s1 + $0x390] sm:$0xff] }
  0x6f   : > { %2463 = vmatpush3.msra.mxu1 %v1900_v43  ;;  %2420 = vmatprep.subr.mxu0 %v1875_v44  ;;  %v1918_v43 = vld [vmem:[%s3482_s1 + $0x308] sm:$0xff] }
  0x70   : > { %2464 = vmatprep.subr.mxu1 %v1899_v45  ;;  %2421 = vmatpush3.msra.mxu0 %v1875_v44  ;;  %v1942_v44 = vld [vmem:[%s3482_s1 + $0x388] sm:$0xff] }
  0x71   : > { %2465 = vmatpush3.msra.mxu1 %v1899_v45  ;;  %2422 = vmatprep.subr.mxu0 %v1874_v46  ;;  %v1917_v45 = vld [vmem:[%s3482_s1 + $0x300] sm:$0xff] }
  0x72   : > { %2466 = vmatprep.subr.mxu1 %v1898_v47  ;;  %2423 = vmatpush3.msra.mxu0 %v1874_v46  ;;  %v1941_v46 = vld [vmem:[%s3482_s1 + $0x380] sm:$0xff] }
  0x73   : > { %2467 = vmatpush3.msra.mxu1 %v1898_v47  ;;  %2424 = vmatprep.subr.mxu0 %v1873_v48  ;;  %v1980_v47 = vld [vmem:[%s3482_s1 + $0x478] sm:$0xff] }
  0x74   : > { %2468 = vmatprep.subr.mxu1 %v1897_v49  ;;  %2425 = vmatpush3.msra.mxu0 %v1873_v48  ;;  %v1541_v48 = vld [vmem:[%s3485_s4 + $0x78] sm:$0xff] }
  0x75   : > { %2469 = vmatpush3.msra.mxu1 %v1897_v49  ;;  %2426 = vmatprep.subr.mxu0 %v1872_v50  ;;  %v1979_v49 = vld [vmem:[%s3482_s1 + $0x470] sm:$0xff] }
  0x76   : > { %2470 = vmatprep.subr.mxu1 %v1896_v51  ;;  %2427 = vmatpush3.msra.mxu0 %v1872_v50  ;;  %v1540_v50 = vld [vmem:[%s3485_s4 + $0x70] sm:$0xff] }
  0x77   : > { %2471 = vmatpush3.msra.mxu1 %v1896_v51  ;;  %2428 = vmatprep.subr.mxu0 %v1871_v52  ;;  %v1535_v51 = vld [vmem:[%s3485_s4 + $0x48] sm:$0xff] }
  0x78   : > { %2472 = vmatprep.subr.mxu1 %v1895_v53  ;;  %2429 = vmatpush3.msra.mxu0 %v1871_v52  ;;  %v1534_v52 = vld [vmem:[%s3485_s4 + $0x40] sm:$0xff] }
  0x79   : > { %2473 = vmatpush3.msra.mxu1 %v1895_v53  ;;  %2430 = vmatprep.subr.mxu0 %v1870_v56  ;;  %v1533_v53 = vld [vmem:[%s3485_s4 + $0x38] sm:$0xff] }
  0x7a   : > { %2474 = vmatprep.subr.mxu1 %v1894_v57  ;;  %2431 = vmatpush3.msra.mxu0 %v1870_v56  ;;  %v1971_v56 = vld [vmem:[%s3482_s1 + $0x430] sm:$0xff] }
  0x7b   : > { %2475 = vmatpush3.msra.mxu1 %v1894_v57  ;;  %2432 = vmatprep.subr.mxu0 %v1869_v60  ;;  %v1532_v57 = vld [vmem:[%s3485_s4 + $0x30] sm:$0xff] }
  0x7c   : > { %2476 = vmatprep.subr.mxu1 %v1893_v61  ;;  %2433 = vmatpush3.msra.mxu0 %v1869_v60  ;;  %v1970_v60 = vld [vmem:[%s3482_s1 + $0x428] sm:$0xff] }
  0x7d   : > { %2434 = vmatprep.mubr.f32.mxu0 %v2874_v34  ;;  %2477 = vmatpush3.msra.mxu1 %v1893_v61  ;;  %v1930_v34 = vld [vmem:[%s3482_s1 + $0x368] sm:$0xff] }
  0x7e   : > { %2435 = vmatmul.mubr.f32.vlgmr.msra.gmra.mxu0 %v2936_v54  ;;  %2478 = vmatprep.mubr.f32.mxu1 %v3027_v17  ;;  %v3209_v17 = vld [vmem:[%s2863_s22 + $0x81] sm:$0xff] }
  0x7f   : > { %2490 = vmatprep.subr.mxu0 %v1932_v0  ;;  %2534 = vmatprep.subr.mxu1 %v1956_v1  ;;  %v1531_v61 = vld [vmem:[%s3485_s4 + $0x28] sm:$0xff] }
  0x80   : > { %2479 = vmatmul.mubr.f32.vlgmr.msra.gmra.mxu1 %v3045_v22  ;;  %2491 = vmatpush3.msra.mxu0 %v1932_v0  ;;  %v1969_v0 = vld [vmem:[%s3482_s1 + $0x420] sm:$0xff] }
  0x81   : > { %2535 = vmatpush3.msra.mxu1 %v1956_v1  ;;  %2492 = vmatprep.subr.mxu0 %v1931_v4  ;;  %v1530_v1 = vld [vmem:[%s3485_s4 + $0x20] sm:$0xff] }
  0x82   : > { %2536 = vmatprep.subr.mxu1 %v1955_v5  ;;  %2437 = vmatprep.mubr.f32.mxu0 %v2948_v58 }
  0x83   : > { %2493 = vmatpush3.msra.mxu0 %v1931_v4  ;;  %2537 = vmatpush3.msra.mxu1 %v1955_v5  ;;  %v1968_v4 = vld [vmem:[%s3482_s1 + $0x418] sm:$0xff] }
  0x84   : > { %2438 = vmatmul.mubr.f32.gmra.mxu0 %v2964_v62  ;;  %2494 = vmatprep.subr.mxu0 %v1930_v34  ;;  %v1529_v5 = vld [vmem:[%s3485_s4 + $0x18] sm:$0xff] }
  0x85   : > { %2538 = vmatprep.subr.mxu1 %v1954_v8  ;;  %2481 = vmatprep.mubr.f32.mxu1 %v3048_v23 }
  0x86   : > { %2495 = vmatpush3.msra.mxu0 %v1930_v34  ;;  %2539 = vmatpush3.msra.mxu1 %v1954_v8  ;;  %v1967_v34 = vld [vmem:[%s3482_s1 + $0x410] sm:$0xff] }
  0x87   : > { %2496 = vmatprep.subr.mxu0 %v1929_v9  ;;  %2482 = vmatmul.mubr.f32.gmra.mxu1 %v3066_v28  ;;  %v1528_v8 = vld [vmem:[%s3485_s4 + $0x10] sm:$0xff] }
  0x88   : > { %2540 = vmatprep.subr.mxu1 %v1953_v12  ;;  %2440 = vmatprep.mubr.f32.mxu0 %v2976_v2 }
  0x89   : > { %2497 = vmatpush3.msra.mxu0 %v1929_v9  ;;  %2541 = vmatpush3.msra.mxu1 %v1953_v12  ;;  %v1966_v9 = vld [vmem:[%s3482_s1 + $0x408] sm:$0xff] }
  0x8a   : > { %2441 = vmatmul.mubr.f32.gmra.mxu0 %v2992_v6  ;;  %2498 = vmatprep.subr.mxu0 %v1928_v13  ;;  %v1527_v12 = vld [vmem:[%s3485_s4 + $0x8] sm:$0xff] }
  0x8b   : > { %2542 = vmatprep.subr.mxu1 %v1952_v14  ;;  %2484 = vmatprep.mubr.f32.mxu1 %v3069_v29 }
  0x8c   : > { %2499 = vmatpush3.msra.mxu0 %v1928_v13  ;;  %2543 = vmatpush3.msra.mxu1 %v1952_v14  ;;  %v1965_v13 = vld [vmem:[%s3482_s1 + $0x400] sm:$0xff] }
  0x8d   : > { %2500 = vmatprep.subr.mxu0 %v1927_v15  ;;  %2485 = vmatmul.mubr.f32.gmra.mxu1 %v3088_v35  ;;  %v1526_v14 = vld [vmem:[%s3485_s4] sm:$0xff] }
  0x8e   : > { %2544 = vmatprep.subr.mxu1 %v1951_v16  ;;  %2443 = vmatprep.mubr.f32.mxu0 %v3004_v10 }
  0x8f   : > { %2501 = vmatpush3.msra.mxu0 %v1927_v15  ;;  %2545 = vmatpush3.msra.mxu1 %v1951_v16  ;;  %v1518_v15 = vld [vmem:[%s3391_s17] sm:$0xff]  ;;  %v1519_v16 = vld [vmem:[%s3391_s17 + $0x8] sm:$0xff] }
  0x90   : > { %2444 = vmatmul.mubr.f32.gmra.mxu0 %v3209_v17  ;;  %2502 = vmatprep.subr.mxu0 %v1926_v18 }
  0x91   : > { %2546 = vmatprep.subr.mxu1 %v1950_v19  ;;  %2487 = vmatprep.mubr.f32.mxu1 %v3091_v36 }
  0x92   : > { %2503 = vmatpush3.msra.mxu0 %v1926_v18  ;;  %2547 = vmatpush3.msra.mxu1 %v1950_v19  ;;  %v1521_v18 = vld [vmem:[%s3391_s17 + $0x18] sm:$0xff]  ;;  %v1522_v19 = vld [vmem:[%s3391_s17 + $0x20] sm:$0xff] }
  0x93   : > { %2504 = vmatprep.subr.mxu0 %v1925_v20  ;;  %2488 = vmatmul.mubr.f32.gmra.mxu1 %v3224_v21 }
  0x94   : > { %2548 = vmatprep.subr.mxu1 %v1949_v24  ;;  %2505 = vmatpush3.msra.mxu0 %v1925_v20  ;;  %v1524_v20 = vld [vmem:[%s3391_s17 + $0x30] sm:$0xff] }
  0x95   : > { %2549 = vmatpush3.msra.mxu1 %v1949_v24  ;;  %2506 = vmatprep.subr.mxu0 %v1924_v25  ;;  %v1525_v24 = vld [vmem:[%s3391_s17 + $0x38] sm:$0xff] }
  0x96   : > { %2550 = vmatprep.subr.mxu1 %v1948_v26  ;;  %2507 = vmatpush3.msra.mxu0 %v1924_v25 }
  0x97   : > { %2551 = vmatpush3.msra.mxu1 %v1948_v26  ;;  %2508 = vmatprep.subr.mxu0 %v1923_v27 }
  0x98   : > { %2552 = vmatprep.subr.mxu1 %v1947_v30  ;;  %2509 = vmatpush3.msra.mxu0 %v1923_v27 }
  0x99   : > { %2553 = vmatpush3.msra.mxu1 %v1947_v30  ;;  %2510 = vmatprep.subr.mxu0 %v1922_v31 }
  0x9a   : > { %2554 = vmatprep.subr.mxu1 %v1946_v32  ;;  %2511 = vmatpush3.msra.mxu0 %v1922_v31 }
  0x9b   : > { %2555 = vmatpush3.msra.mxu1 %v1946_v32  ;;  %2512 = vmatprep.subr.mxu0 %v1921_v33 }
  0x9c   : > { %2556 = vmatprep.subr.mxu1 %v1945_v37  ;;  %2513 = vmatpush3.msra.mxu0 %v1921_v33 }
  0x9d   : > { %2557 = vmatpush3.msra.mxu1 %v1945_v37  ;;  %2514 = vmatprep.subr.mxu0 %v1920_v38 }
  0x9e   : > { %2558 = vmatprep.subr.mxu1 %v1944_v39  ;;  %2515 = vmatpush3.msra.mxu0 %v1920_v38 }
  0x9f   : > { %2559 = vmatpush3.msra.mxu1 %v1944_v39  ;;  %2516 = vmatprep.subr.mxu0 %v1919_v41 }
  0xa0   : > { %2560 = vmatprep.subr.mxu1 %v1943_v42  ;;  %2517 = vmatpush3.msra.mxu0 %v1919_v41 }
  0xa1   : > { %2561 = vmatpush3.msra.mxu1 %v1943_v42  ;;  %2518 = vmatprep.subr.mxu0 %v1918_v43 }
  0xa2   : > { %2562 = vmatprep.subr.mxu1 %v1942_v44  ;;  %2519 = vmatpush3.msra.mxu0 %v1918_v43 }
  0xa3   : > { %2563 = vmatpush3.msra.mxu1 %v1942_v44  ;;  %2520 = vmatprep.subr.mxu0 %v1917_v45 }
  0xa4   : > { %2564 = vmatprep.subr.mxu1 %v1941_v46  ;;  %2521 = vmatpush3.msra.mxu0 %v1917_v45 }
  0xa5   : > { %2522 = vmatprep.mubr.f32.mxu0 %v2939_v55  ;;  %2565 = vmatpush3.msra.mxu1 %v1941_v46  ;;  %v1539_v55 = vld [vmem:[%s3485_s4 + $0x68] sm:$0xff] }
  0xa6   : > { %2523 = vmatmul.mubr.f32.vlgmr.msra.gmra.mxu0 %v2951_v59  ;;  %2566 = vmatprep.mubr.f32.mxu1 %v2936_v54  ;;  %v1978_v54 = vld [vmem:[%s3482_s1 + $0x468] sm:$0xff]  ;;  %v1538_v59 = vld [vmem:[%s3485_s4 + $0x60] sm:$0xff] }
  0xa7   : > { %2578 = vmatprep.subr.mxu0 %v1980_v47  ;;  %2622 = vmatprep.subr.mxu1 %v1541_v48 }
  0xa8   : > { %2567 = vmatmul.mubr.f32.vlgmr.msra.gmra.mxu1 %v2948_v58  ;;  %2579 = vmatpush3.msra.mxu0 %v1980_v47  ;;  %v1977_v58 = vld [vmem:[%s3482_s1 + $0x460] sm:$0xff] }
  0xa9   : > { %2623 = vmatpush3.msra.mxu1 %v1541_v48  ;;  %2580 = vmatprep.subr.mxu0 %v1979_v49 }
  0xaa   : > { %2624 = vmatprep.subr.mxu1 %v1540_v50  ;;  %2525 = vmatprep.mubr.f32.mxu0 %v2967_v63  ;;  %v1976_v63 = vld [vmem:[%s3482_s1 + $0x458] sm:$0xff] }
  0xab   : > { %2581 = vmatpush3.msra.mxu0 %v1979_v49  ;;  %2625 = vmatpush3.msra.mxu1 %v1540_v50 }
  0xac   : > { %2526 = vmatmul.mubr.f32.gmra.mxu0 %v2979_v3  ;;  %2582 = vmatprep.subr.mxu0 %v1978_v54  ;;  %v1537_v3 = vld [vmem:[%s3485_s4 + $0x58] sm:$0xff] }
  0xad   : > { %2626 = vmatprep.subr.mxu1 %v1539_v55  ;;  %2569 = vmatprep.mubr.f32.mxu1 %v2964_v62  ;;  %v1975_v62 = vld [vmem:[%s3482_s1 + $0x450] sm:$0xff] }
  0xae   : > { %2583 = vmatpush3.msra.mxu0 %v1978_v54  ;;  %2627 = vmatpush3.msra.mxu1 %v1539_v55 }
  0xaf   : > { %2584 = vmatprep.subr.mxu0 %v1977_v58  ;;  %2570 = vmatmul.mubr.f32.gmra.mxu1 %v2976_v2  ;;  %v1536_v2 = vld [vmem:[%s3485_s4 + $0x50] sm:$0xff] }
  0xb0   : > { %2628 = vmatprep.subr.mxu1 %v1538_v59  ;;  %2528 = vmatprep.mubr.f32.mxu0 %v2995_v7  ;;  %v1916_v7 = vld [vmem:[%s2863_s22 + $0x90] sm:$0xff] }
  0xb1   : > { %2585 = vmatpush3.msra.mxu0 %v1977_v58  ;;  %2629 = vmatpush3.msra.mxu1 %v1538_v59 }
  0xb2   : > { %2529 = vmatmul.mubr.f32.gmra.mxu0 %v3007_v11  ;;  %2586 = vmatprep.subr.mxu0 %v1976_v63  ;;  %v1974_v11 = vld [vmem:[%s3482_s1 + $0x448] sm:$0xff] }
  0xb3   : > { %2630 = vmatprep.subr.mxu1 %v1537_v3  ;;  %2572 = vmatprep.mubr.f32.mxu1 %v2992_v6  ;;  %v1973_v6 = vld [vmem:[%s3482_s1 + $0x440] sm:$0xff] }
  0xb4   : > { %2587 = vmatpush3.msra.mxu0 %v1976_v63  ;;  %2631 = vmatpush3.msra.mxu1 %v1537_v3 }
  0xb5   : > { %2588 = vmatprep.subr.mxu0 %v1975_v62  ;;  %2573 = vmatmul.mubr.f32.gmra.mxu1 %v3004_v10  ;;  %v1940_v10 = vld [vmem:[%s2863_s22 + $0x91] sm:$0xff] }
  0xb6   : > { %2632 = vmatprep.subr.mxu1 %v1536_v2  ;;  %2531 = vmatprep.mubr.f32.mxu0 %v3106_v40  ;;  %v1972_v40 = vld [vmem:[%s3482_s1 + $0x438] sm:$0xff] }
  0xb7   : > { %2589 = vmatpush3.msra.mxu0 %v1975_v62  ;;  %2633 = vmatpush3.msra.mxu1 %v1536_v2 }
  0xb8   : > { %2532 = vmatmul.mubr.f32.gmra.mxu0 %v1916_v7  ;;  %2590 = vmatprep.subr.mxu0 %v1974_v11 }
  0xb9   : > { %2634 = vmatprep.subr.mxu1 %v1535_v51  ;;  %2575 = vmatprep.mubr.f32.mxu1 %v3209_v17  ;;  %v1520_v17 = vld [vmem:[%s3391_s17 + $0x10] sm:$0xff] }
  0xba   : > { %2591 = vmatpush3.msra.mxu0 %v1974_v11  ;;  %2635 = vmatpush3.msra.mxu1 %v1535_v51 }
  0xbb   : > { %2592 = vmatprep.subr.mxu0 %v1973_v6  ;;  %2576 = vmatmul.mubr.f32.gmra.mxu1 %v1940_v10 }
  0xbc   : > { %2636 = vmatprep.subr.mxu1 %v1534_v52  ;;  %2593 = vmatpush3.msra.mxu0 %v1973_v6 }
  0xbd   : > { %2637 = vmatpush3.msra.mxu1 %v1534_v52  ;;  %2594 = vmatprep.subr.mxu0 %v1972_v40 }
  0xbe   : > { %2638 = vmatprep.subr.mxu1 %v1533_v53  ;;  %2595 = vmatpush3.msra.mxu0 %v1972_v40 }
  0xbf   : > { %2639 = vmatpush3.msra.mxu1 %v1533_v53  ;;  %2596 = vmatprep.subr.mxu0 %v1971_v56 }
  0xc0   : > { %2640 = vmatprep.subr.mxu1 %v1532_v57  ;;  %2597 = vmatpush3.msra.mxu0 %v1971_v56 }
  0xc1   : > { %2641 = vmatpush3.msra.mxu1 %v1532_v57  ;;  %2598 = vmatprep.subr.mxu0 %v1970_v60 }
  0xc2   : > { %2642 = vmatprep.subr.mxu1 %v1531_v61  ;;  %2599 = vmatpush3.msra.mxu0 %v1970_v60 }
  0xc3   : > { %2643 = vmatpush3.msra.mxu1 %v1531_v61  ;;  %2600 = vmatprep.subr.mxu0 %v1969_v0 }
  0xc4   : > { %2644 = vmatprep.subr.mxu1 %v1530_v1  ;;  %2601 = vmatpush3.msra.mxu0 %v1969_v0 }
  0xc5   : > { %2645 = vmatpush3.msra.mxu1 %v1530_v1  ;;  %2602 = vmatprep.subr.mxu0 %v1968_v4 }
  0xc6   : > { %2646 = vmatprep.subr.mxu1 %v1529_v5  ;;  %2603 = vmatpush3.msra.mxu0 %v1968_v4 }
  0xc7   : > { %2647 = vmatpush3.msra.mxu1 %v1529_v5  ;;  %2604 = vmatprep.subr.mxu0 %v1967_v34 }
  0xc8   : > { %2648 = vmatprep.subr.mxu1 %v1528_v8  ;;  %2605 = vmatpush3.msra.mxu0 %v1967_v34 }
  0xc9   : > { %2649 = vmatpush3.msra.mxu1 %v1528_v8  ;;  %2606 = vmatprep.subr.mxu0 %v1966_v9 }
  0xca   : > { %2650 = vmatprep.subr.mxu1 %v1527_v12  ;;  %2607 = vmatpush3.msra.mxu0 %v1966_v9 }
  0xcb   : > { %2651 = vmatpush3.msra.mxu1 %v1527_v12  ;;  %2608 = vmatprep.subr.mxu0 %v1965_v13 }
  0xcc   : > { %2652 = vmatprep.subr.mxu1 %v1526_v14  ;;  %2609 = vmatpush3.msra.mxu0 %v1965_v13 }
  0xcd   : > { %2610 = vmatprep.mubr.f32.mxu0 %v3045_v22  ;;  %2653 = vmatpush3.msra.mxu1 %v1526_v14  ;;  %v1523_v22 = vld [vmem:[%s3391_s17 + $0x28] sm:$0xff] }
  0xce   : > { %2654 = vmatprep.mubr.f32.mxu1 %v1518_v15  ;;  %2611 = vmatmul.mubr.f32.vlgmr.msra.gmra.mxu0 %v3048_v23  ;;  %v1964_v23 = vld [vmem:[%s2863_s22 + $0x92] sm:$0xff] }
  0xcf   : > { %2655 = vmatmul.mubr.f32.vlgmr.msra.gmra.mxu1 %v1519_v16  ;;  %2613 = vmatprep.mubr.f32.mxu0 %v3066_v28 }
  0xd0   : > { %2657 = vmatprep.mubr.f32.mxu1 %v1520_v17 }
  0xd2   : > { %2614 = vmatmul.mubr.f32.gmra.mxu0 %v3069_v29 }
  0xd3   : > { %2658 = vmatmul.mubr.f32.gmra.mxu1 %v1521_v18  ;;  %2616 = vmatprep.mubr.f32.mxu0 %v3088_v35 }
  0xd4   : > { %2660 = vmatprep.mubr.f32.mxu1 %v1522_v19 }
  0xd6   : > { %2617 = vmatmul.mubr.f32.gmra.mxu0 %v3091_v36 }
  0xd7   : > { %2661 = vmatmul.mubr.f32.gmra.mxu1 %v1523_v22  ;;  %2619 = vmatprep.mubr.f32.mxu0 %v3224_v21 }
  0xd8   : > { %2663 = vmatprep.mubr.f32.mxu1 %v1524_v20 }
  0xda   : > { %2620 = vmatmul.mubr.f32.gmra.mxu0 %v1964_v23 }
  0xdb   : > { %2664 = vmatmul.mubr.f32.gmra.mxu1 %v1525_v24 }
  0xee   : > { %v2260_v28 = vpop.f32.mrf.mxu0 }
  0xef   : > { %v2304_v25 = vpop.f32.mrf.mxu1 }
  0xf0   : > { %v402_v26 = vpop.f32.mrf.mxu0  ;;  %v513_v14 = vadd.f32 %v2304_v25, %v2260_v28 }
  0xf1   : > { %v507_v29 = vpop.f32.mrf.mxu1 }
  0xf2   : > { %v508_v17 = vadd.f32 %v507_v29, %v402_v26 }
 0x103   : > { %v2263_v27 = vpop.f32.mrf.mxu0 }
 0x104   : > { %v2307_v30 = vpop.f32.mrf.mxu1 }
 0x105   : > { %v412_v35 = vpop.f32.mrf.mxu0  ;;  %v523_v19 = vadd.f32 %v2307_v30, %v2263_v27 }
 0x106   : > { %v517_v31 = vpop.f32.mrf.mxu1 }
 0x107   : > { %v518_v24 = vadd.f32 %v517_v31, %v412_v35 }
 0x109   : > { %v2266_v32 = vpop.f32.mrf.mxu0 }
 0x10a   : > { %v2310_v33 = vpop.f32.mrf.mxu1 }
 0x10b   : > { %v422_v37 = vpop.f32.mrf.mxu0 }
 0x10c   : > { %v527_v36 = vpop.f32.mrf.mxu1 }
 0x10f   : > { %v3415_v38 = vpop.f32.mrf.mxu0 }
 0x110   : > { %v3417_v21 = vpop.f32.mrf.mxu1 }
 0x111   : > { %v3419_v39 = vpop.f32.mrf.mxu0  ;;  %v543_v29 = vadd.f32 %v3417_v21, %v3415_v38 }
 0x112   : > { %3487 = vst [vmem:[#allocation2_spill] sm:$0xff] %v3419_v39  ;;  %v3421_v41 = vpop.f32.mrf.mxu1 }
 0x113   : > { %3488 = vst [vmem:[#allocation3_spill] sm:$0xff] %v3421_v41  ;;  %v528_v41 = vadd.f32 %v527_v36, %v422_v37 }
 0x116   : > { %v2348_v42 = vpop.f32.mrf.mxu0 }
 0x117   : > { %v677_v18 = vadd.f32 %v2348_v42, %v513_v14 }
 0x118   : > { %v2392_v43 = vpop.f32.mrf.mxu1  ;;  %v637_v44 = vpop.f32.mrf.mxu0 }
 0x119   : > { %v676_v22 = vadd.f32 %v637_v44, %v508_v17  ;;  %v3496_v31 = vld [vmem:[#allocation2_spill] sm:$0xff] }
 0x11a   : > { %v778_v45 = vpop.f32.mrf.mxu1 }
 0x11c   : > { %v2351_v46 = vpop.f32.mrf.mxu0 }
 0x11e   : > { %v647_v48 = vpop.f32.mrf.mxu0 }
 0x11f   : > { %v2395_v47 = vpop.f32.mrf.mxu1 }
 0x121   : > { %v788_v49 = vpop.f32.mrf.mxu1 }
 0x122   : > { %v2354_v50 = vpop.f32.mrf.mxu0 }
 0x124   : > { %v657_v55 = vpop.f32.mrf.mxu0 }
 0x125   : > { %v2398_v54 = vpop.f32.mrf.mxu1  ;;  %v680_v27 = vadd.f32 %v657_v55, %v528_v41 }
 0x127   : > { %v798_v58 = vpop.f32.mrf.mxu1 }
 0x128   : > { %v2357_v59 = vpop.f32.mrf.mxu0 }
 0x129   : > { %v683_v44 = vadd.f32 %v2357_v59, %v543_v29 }
 0x12a   : > { %v667_v3 = vpop.f32.mrf.mxu0 }
 0x12b   : > { %v3423_v63 = vpop.f32.mrf.mxu1 }
 0x12c   : > { %3489 = vst [vmem:[#allocation4_spill] sm:$0xff] %v3423_v63 }
 0x12d   : > { %v3425_v62 = vpop.f32.mrf.mxu1 }
 0x12e   : > { %3490 = vst [vmem:[#allocation5_spill] sm:$0xff] %v3425_v62  ;;  %v678_v62 = vadd.f32 %v647_v48, %v518_v24 }
 0x130   : > { %v819_v30 = vadd.f32 %v788_v49, %v678_v62 }
 0x133   : > { %v3498_v38 = vld [vmem:[#allocation4_spill] sm:$0xff] }
 0x134   : > { %v824_v21 = vadd.f32 %v3498_v38, %v683_v44 }
 0x13e   : > { %v2436_v2 = vpop.f32.mrf.mxu0 }
 0x140   : > { %v2480_v7 = vpop.f32.mrf.mxu1  ;;  %v916_v11 = vpop.f32.mrf.mxu0 }
 0x142   : > { %v1054_v51 = vpop.f32.mrf.mxu1 }
 0x144   : > { %v2439_v6 = vpop.f32.mrf.mxu0 }
 0x146   : > { %v926_v52 = vpop.f32.mrf.mxu0 }
 0x147   : > { %v2483_v10 = vpop.f32.mrf.mxu1 }
 0x149   : > { %v1064_v40 = vpop.f32.mrf.mxu1 }
 0x14a   : > { %v2442_v53 = vpop.f32.mrf.mxu0 }
 0x14c   : > { %v936_v57 = vpop.f32.mrf.mxu0 }
 0x14d   : > { %v2486_v56 = vpop.f32.mrf.mxu1 }
 0x14f   : > { %v3427_v60 = vpop.f32.mrf.mxu1 }
 0x150   : > { %3491 = vst [vmem:[#allocation6_spill] sm:$0xff] %v3427_v60  ;;  %v2445_v61 = vpop.f32.mrf.mxu0  ;;  %v817_v60 = vadd.f32 %v778_v45, %v676_v22 }
 0x152   : > { %v3431_v1 = vpop.f32.mrf.mxu0  ;;  %v955_v26 = vadd.f32 %v916_v11, %v817_v60 }
 0x153   : > { %v3429_v0 = vpop.f32.mrf.mxu1  ;;  %3493 = vst [vmem:[#allocation8_spill] sm:$0xff] %v3431_v1  ;;  %v533_v1 = vadd.f32 %v2310_v33, %v2266_v32 }
 0x154   : > { %3492 = vst [vmem:[#allocation7_spill] sm:$0xff] %v3429_v0  ;;  %v818_v0 = vadd.f32 %v2392_v43, %v677_v18  ;;  %v3497_v43 = vld [vmem:[#allocation3_spill] sm:$0xff]  ;;  %v1093_v36 = vadd.f32 %v1054_v51, %v955_v26 }
 0x155   : > { %v3433_v4 = vpop.f32.mrf.mxu1  ;;  %v681_v39 = vadd.f32 %v2354_v50, %v533_v1  ;;  %v538_v32 = vadd.f32 %v3497_v43, %v3496_v31  ;;  %v821_v50 = vadd.f32 %v798_v58, %v680_v27 }
 0x156   : > { %3494 = vst [vmem:[#allocation9_spill] sm:$0xff] %v3433_v4  ;;  %v679_v4 = vadd.f32 %v2351_v46, %v523_v19  ;;  %v956_v63 = vadd.f32 %v2436_v2, %v818_v0  ;;  %v957_v46 = vadd.f32 %v926_v52, %v819_v30 }
 0x157   : > { %v822_v33 = vadd.f32 %v2398_v54, %v681_v39  ;;  %v959_v41 = vadd.f32 %v936_v57, %v821_v50  ;;  %v3499_v39 = vld [vmem:[#allocation5_spill] sm:$0xff] }
 0x158   : > { %v1094_v42 = vadd.f32 %v2480_v7, %v956_v63  ;;  %v1095_v63 = vadd.f32 %v1064_v40, %v957_v46  ;;  %v1981_v40 = vld [vmem:[%s3483_s2] ss:$0 sm:$0xff] }
 0x159   : > { %v960_v2 = vadd.f32 %v2442_v53, %v822_v33  ;;  %v3500_v53 = vld [vmem:[#allocation6_spill] sm:$0xff] }
 0x15a   : > { %v3501_v1 = vld [vmem:[#allocation8_spill] sm:$0xff] }
 0x15b   : > { %v1098_v59 = vadd.f32 %v2486_v56, %v960_v2 }
 0x166   : > { %v2524_v5 = vpop.f32.mrf.mxu0 }
 0x167   : > { %v1235_v48 = vadd.f32 %v2524_v5, %v1094_v42 }
 0x168   : > { %v2568_v34 = vpop.f32.mrf.mxu1  ;;  %v1195_v8 = vpop.f32.mrf.mxu0 }
 0x169   : > { %v1234_v60 = vadd.f32 %v1195_v8, %v1093_v36  ;;  %v1373_v62 = vadd.f32 %v2568_v34, %v1235_v48 }
 0x16a   : > { %v1333_v9 = vpop.f32.mrf.mxu1 }
 0x16b   : > { %v1372_v0 = vadd.f32 %v1333_v9, %v1234_v60 }
 0x16c   : > { %v2527_v12 = vpop.f32.mrf.mxu0 }
 0x16e   : > { %v1205_v15 = vpop.f32.mrf.mxu0 }
 0x16f   : > { %v2571_v13 = vpop.f32.mrf.mxu1  ;;  %v1236_v58 = vadd.f32 %v1205_v15, %v1095_v63 }
 0x171   : > { %v3435_v16 = vpop.f32.mrf.mxu1 }
 0x172   : > { %3495 = vst [vmem:[#allocation10_spill] sm:$0xff] %v3435_v16  ;;  %v2530_v20 = vpop.f32.mrf.mxu0  ;;  %v820_v16 = vadd.f32 %v2395_v47, %v679_v4  ;;  %v682_v47 = vadd.f32 %v667_v3, %v538_v32 }
 0x173   : > { %v1239_v57 = vadd.f32 %v2530_v20, %v1098_v59  ;;  %v3504_v20 = vld [vmem:[#allocation9_spill] sm:$0xff] }
 0x174   : > { %v1215_v28 = vpop.f32.mrf.mxu0  ;;  %v958_v35 = vadd.f32 %v2439_v6, %v820_v16  ;;  %v823_v54 = vadd.f32 %v3499_v39, %v682_v47  ;;  %v962_v6 = vadd.f32 %v2445_v61, %v824_v21 }
 0x175   : > { %v3437_v23 = vpop.f32.mrf.mxu1 }
 0x176   : > { %v1096_v11 = vadd.f32 %v2483_v10, %v958_v35  ;;  %v1097_v10 = vadd.f32 %v3500_v53, %v959_v41  ;;  %v961_v4 = vadd.f32 %v3501_v1, %v823_v54  ;;  %v1377_v26 = vadd.f32 %v3437_v23, %v1239_v57 }
 0x177   : > { %v3439_v25 = vpop.f32.mrf.mxu1 }
 0x178   : > { %v2533_v45 = vpop.f32.mrf.mxu0  ;;  %v1237_v7 = vadd.f32 %v2527_v12, %v1096_v11  ;;  %v3502_v12 = vld [vmem:[#allocation7_spill] sm:$0xff]  ;;  %v1238_v9 = vadd.f32 %v1215_v28, %v1097_v10 }
 0x179   : > { %v1100_v14 = vadd.f32 %v3502_v12, %v962_v6  ;;  %v3503_v17 = vld [vmem:[#allocation10_spill] sm:$0xff] }
 0x17a   : > { %v1225_v49 = vpop.f32.mrf.mxu0  ;;  %v1375_v8 = vadd.f32 %v2571_v13, %v1237_v7  ;;  %v1374_v18 = vadd.f32 %v3503_v17, %v1236_v58  ;;  %v1099_v13 = vadd.f32 %v3504_v20, %v961_v4  ;;  %v1376_v43 = vadd.f32 %v3439_v25, %v1238_v9 }
 0x17b   : > { %v2577_v37 = vpop.f32.mrf.mxu1  ;;  %v1241_v29 = vadd.f32 %v2533_v45, %v1100_v14 }
 0x17c   : > { %v1240_v32 = vadd.f32 %v1225_v49, %v1099_v13 }
 0x17d   : > { %v1363_v55 = vpop.f32.mrf.mxu1  ;;  %v1379_v23 = vadd.f32 %v2577_v37, %v1241_v29 }
 0x17e   : > { %v1378_v25 = vadd.f32 %v1363_v55, %v1240_v32 }
 0x18e   : > { %v2612_v51 = vpop.f32.mrf.mxu0 }
 0x18f   : > { %v2656_v52 = vpop.f32.mrf.mxu1  ;;  %v1511_v3 = vadd.f32 %v2612_v51, %v1373_v62 }
 0x190   : > { %v1471_v5 = vpop.f32.mrf.mxu0 }
 0x191   : > { %v1608_v34 = vpop.f32.mrf.mxu1  ;;  %v1648_v56 = vadd.f32 %v2656_v52, %v1511_v3  ;;  %v1510_v61 = vadd.f32 %v1471_v5, %v1372_v0 }
 0x192   : > { %v2615_v15 = vpop.f32.mrf.mxu0 }
 0x193   : > { %v2659_v16 = vpop.f32.mrf.mxu1  ;;  %v1663_v19 = vadd.f32 %v1981_v40, %v1648_v56  ;;  %v1647_v22 = vadd.f32 %v1608_v34, %v1510_v61  ;;  %v1513_v24 = vadd.f32 %v2615_v15, %v1375_v8 }
 0x194   : > { %v1481_v28 = vpop.f32.mrf.mxu0 }
 0x195   : > { %v1618_v27 = vpop.f32.mrf.mxu1  ;;  %v1671_v30 = vmax.f32 %v1663_v19, 0.0  ;;  %v1662_v42 = vadd.f32 %v1981_v40, %v1647_v22  ;;  %v1650_v35 = vadd.f32 %v2659_v16, %v1513_v24  ;;  %v1512_v31 = vadd.f32 %v1481_v28, %v1374_v18 }
 0x196   : > { %v2618_v33 = vpop.f32.mrf.mxu0 }
 0x197   : > { %v2662_v44 = vpop.f32.mrf.mxu1  ;;  %1679 = vst [vmem:[%s3459_s30 + $0x8] sm:$0xff] %v1671_v30  ;;  %v1670_v36 = vmax.f32 %v1662_v42, 0.0  ;;  %v1665_v46 = vadd.f32 %v1981_v40, %v1650_v35  ;;  %v1649_v48 = vadd.f32 %v1618_v27, %v1512_v31  ;;  %v1515_v50 = vadd.f32 %v2618_v33, %v1377_v26 }
 0x198   : > { %v1491_v45 = vpop.f32.mrf.mxu0 }
 0x199   : > { %v1628_v47 = vpop.f32.mrf.mxu1  ;;  %1678 = vst [vmem:[%s3459_s30] sm:$0xff] %v1670_v36  ;;  %v1673_v2 = vmax.f32 %v1665_v46, 0.0  ;;  %v1664_v11 = vadd.f32 %v1981_v40, %v1649_v48  ;;  %v1652_v60 = vadd.f32 %v2662_v44, %v1515_v50  ;;  %v1514_v38 = vadd.f32 %v1491_v45, %v1376_v43 }
 0x19a   : > { %v2621_v21 = vpop.f32.mrf.mxu0 }
 0x19b   : > { %v2665_v41 = vpop.f32.mrf.mxu1  ;;  %1681 = vst [vmem:[%s3459_s30 + $0x18] sm:$0xff] %v1673_v2  ;;  %v1672_v49 = vmax.f32 %v1664_v11, 0.0  ;;  %v1667_v63 = vadd.f32 %v1981_v40, %v1652_v60  ;;  %v1651_v62 = vadd.f32 %v1628_v47, %v1514_v38  ;;  %v1517_v7 = vadd.f32 %v2621_v21, %v1379_v23 }
 0x19c   : > { %v1501_v37 = vpop.f32.mrf.mxu0 }
 0x19d   : > { %1680 = vst [vmem:[%s3459_s30 + $0x10] sm:$0xff] %v1672_v49  ;;  %v1675_v39 = vmax.f32 %v1667_v63, 0.0  ;;  %v1666_v54 = vadd.f32 %v1981_v40, %v1651_v62  ;;  %v1654_v59 = vadd.f32 %v2665_v41, %v1517_v7  ;;  %v1516_v6 = vadd.f32 %v1501_v37, %v1378_v25  ;;  %v1638_v51 = vpop.f32.mrf.mxu1 }
 0x19f   : > { %1683 = vst [vmem:[%s3459_s30 + $0x28] sm:$0xff] %v1675_v39  ;;  %v1674_v52 = vmax.f32 %v1666_v54, 0.0  ;;  %v1669_v55 = vadd.f32 %v1981_v40, %v1654_v59  ;;  %v1653_v0 = vadd.f32 %v1638_v51, %v1516_v6 }
 0x1a1   : > { %1682 = vst [vmem:[%s3459_s30 + $0x20] sm:$0xff] %v1674_v52  ;;  %v1677_v58 = vmax.f32 %v1669_v55, 0.0  ;;  %v1668_v3 = vadd.f32 %v1981_v40, %v1653_v0 }
 0x1a3   : > { %1685 = vst [vmem:[%s3459_s30 + $0x38] sm:$0xff] %v1677_v58  ;;  %v1676_v53 = vmax.f32 %v1668_v3, 0.0 }
 0x1a5   : > { %1684 = vst [vmem:[%s3459_s30 + $0x30] sm:$0xff] %v1676_v53 }
 0x1a6 PF: > { %s15_s20 = sadd.s32 1, %s2713_s20   ;;  %s3505_s18 = smov %s2709_s19 }
 0x1a7   : > { %p12_p5 = scmp.ge.s32.totalorder %s15_s20, 4   ;;  %s3506_s19 = smov %s3508_s21 }
 0x1a9   :  { %14 = sbr.rel (!%p12_p5) target bundleno = 2 (0x2), region = 84 }

// kernel: resnet_layer_fwd.6
= control target key start
LH: loop header
LB: loop body
LE: loop exit
PB: predicated region body
PF: predicated region fallthrough
CT: control target
= control target key end

     0   :  { %s2451_s12 = smov 0   ;;  %s2453_s13 = smov 0   ;;  %s3091_s0 = inlined_call_operand.vmem [shape: f32[2,10,10,128], index: 0, kind: input, shape index: {}]   ;;  %s3092_s1 = inlined_call_operand.vmem [shape: f32[9,128,128], index: 1, kind: input, shape index: {}]   ;;  %s3093_s2 = inlined_call_operand.vmem [shape: f32[1,128], index: 2, kind: input, shape index: {}]   ;;  %s3094_s3 = inlined_call_operand.vmem [shape: f32[2,8,8,128], index: 3, kind: output, shape index: {}]  }
   0x1   :  { %s2455_s14 = smov 0  }
   0x2 LB: > { %s25_s15 = sadd.s32 1, %s2425_s13  ;;  %p1554_p0 = scmp.ge.s32.totalorder %s2429_s14, 1  ;;  %s2429_s14 = sphi %s2455_s14, %s13_s14   ;;  %s2425_s13 = sphi %s2453_s13, %s3106_s13   ;;  %s2421_s12 = sphi %s2451_s12, %s3105_s12  }
   0x3   : > { %p27_p1 = scmp.ge.s32.totalorder %s25_s15, 2  ;;  %p151_p2 = scmp.lt.s32.totalorder %s2429_s14, 3 }
   0x5   : > { %s3108_s15 = smov (%p27_p1, %s25_s15), 0  ;;  %p152_p3 = pnand %p1554_p0, %p151_p2 }
   0x7   : > { %155 = sbr.rel (%p152_p3) target bundleno = 413 (0x19d), region = 32 }
   0xc   : > { %v1573_v0 = vld [vmem:[%s3092_s1 + $0xf8] sm:$0xff]  ;;  %v1572_v2 = vld [vmem:[%s3092_s1 + $0xf0] sm:$0xff]  ;;  %v1571_v4 = vld [vmem:[%s3092_s1 + $0xe8] sm:$0xff]  ;;  %p179_p4 = scmp.lt.s32.totalorder %s2421_s12, 1 }
   0xd   : > { %v220_v1 = vld [vmem:[%s3092_s1 + $0x78] sm:$0xff]  ;;  %1954 = vmatprep.subr.mxu0 %v1573_v0  ;;  %v219_v3 = vld [vmem:[%s3092_s1 + $0x70] sm:$0xff]  ;;  %v218_v5 = vld [vmem:[%s3092_s1 + $0x68] sm:$0xff] }
   0xe   : > { %1998 = vmatprep.subr.mxu1 %v220_v1  ;;  %1955 = vmatpush3.msra.mxu0 %v1573_v0  ;;  %v1570_v6 = vld [vmem:[%s3092_s1 + $0xe0] sm:$0xff]  ;;  %v1569_v8 = vld [vmem:[%s3092_s1 + $0xd8] sm:$0xff]  ;;  %v1568_v10 = vld [vmem:[%s3092_s1 + $0xd0] sm:$0xff]  ;;  %s3110_s12 = smov (!%p179_p4, %s2421_s12), 1 }
   0xf   : > { %1999 = vmatpush3.msra.mxu1 %v220_v1  ;;  %1956 = vmatprep.subr.mxu0 %v1572_v2  ;;  %v217_v7 = vld [vmem:[%s3092_s1 + $0x60] sm:$0xff]  ;;  %v216_v9 = vld [vmem:[%s3092_s1 + $0x58] sm:$0xff]  ;;  %v215_v11 = vld [vmem:[%s3092_s1 + $0x50] sm:$0xff]  ;;  %s2382_s22 = smul.u32 160, %s3110_s12  ;;  %s1737_s20 = sshll.u32 %s3110_s12, 6 }
  0x10   : > { %2000 = vmatprep.subr.mxu1 %v219_v3  ;;  %1957 = vmatpush3.msra.mxu0 %v1572_v2  ;;  %v1567_v12 = vld [vmem:[%s3092_s1 + $0xc8] sm:$0xff]  ;;  %v1566_v14 = vld [vmem:[%s3092_s1 + $0xc0] sm:$0xff]  ;;  %v1565_v16 = vld [vmem:[%s3092_s1 + $0xb8] sm:$0xff]  ;;  %s192_s23 = scalar_lea.vmem %s3094_s3, %s1737_s20 }
  0x11   : > { %2001 = vmatpush3.msra.mxu1 %v219_v3  ;;  %1958 = vmatprep.subr.mxu0 %v1571_v4  ;;  %v214_v13 = vld [vmem:[%s3092_s1 + $0x48] sm:$0xff]  ;;  %v213_v15 = vld [vmem:[%s3092_s1 + $0x40] sm:$0xff]  ;;  %v212_v17 = vld [vmem:[%s3092_s1 + $0x38] sm:$0xff]  ;;  %s2569_s6 = scalar_lea.vmem %s3091_s0, %s2382_s22 }
  0x12   : > { %2002 = vmatprep.subr.mxu1 %v218_v5  ;;  %1959 = vmatpush3.msra.mxu0 %v1571_v4  ;;  %v1564_v18 = vld [vmem:[%s3092_s1 + $0xb0] sm:$0xff]  ;;  %v1563_v20 = vld [vmem:[%s3092_s1 + $0xa8] sm:$0xff]  ;;  %v1562_v22 = vld [vmem:[%s3092_s1 + $0xa0] sm:$0xff] }
  0x13   : > { %2003 = vmatpush3.msra.mxu1 %v218_v5  ;;  %1960 = vmatprep.subr.mxu0 %v1570_v6  ;;  %v211_v19 = vld [vmem:[%s3092_s1 + $0x30] sm:$0xff]  ;;  %v210_v21 = vld [vmem:[%s3092_s1 + $0x28] sm:$0xff]  ;;  %v209_v23 = vld [vmem:[%s3092_s1 + $0x20] sm:$0xff] }
  0x14   : > { %2004 = vmatprep.subr.mxu1 %v217_v7  ;;  %1961 = vmatpush3.msra.mxu0 %v1570_v6  ;;  %v1561_v24 = vld [vmem:[%s3092_s1 + $0x98] sm:$0xff]  ;;  %v1560_v26 = vld [vmem:[%s3092_s1 + $0x90] sm:$0xff]  ;;  %v1559_v28 = vld [vmem:[%s3092_s1 + $0x88] sm:$0xff] }
  0x15   : > { %2005 = vmatpush3.msra.mxu1 %v217_v7  ;;  %1962 = vmatprep.subr.mxu0 %v1569_v8  ;;  %v208_v25 = vld [vmem:[%s3092_s1 + $0x18] sm:$0xff]  ;;  %v207_v27 = vld [vmem:[%s3092_s1 + $0x10] sm:$0xff]  ;;  %v206_v29 = vld [vmem:[%s3092_s1 + $0x8] sm:$0xff] }
  0x16   : > { %2006 = vmatprep.subr.mxu1 %v216_v9  ;;  %1963 = vmatpush3.msra.mxu0 %v1569_v8  ;;  %v1558_v30 = vld [vmem:[%s3092_s1 + $0x80] sm:$0xff]  ;;  %v2580_v34 = vld [vmem:[%s2569_s6 + $0x11] sm:$0xff]  ;;  %v1587_v40 = vld [vmem:[%s3092_s1 + $0x168] sm:$0xff] }
  0x17   : > { %2007 = vmatpush3.msra.mxu1 %v216_v9  ;;  %1964 = vmatprep.subr.mxu0 %v1568_v10  ;;  %v205_v31 = vld [vmem:[%s3092_s1] sm:$0xff]  ;;  %v2583_v35 = vld [vmem:[%s2569_s6 + $0x10] sm:$0xff]  ;;  %v1589_v36 = vld [vmem:[%s3092_s1 + $0x178] sm:$0xff] }
  0x18   : > { %2008 = vmatprep.subr.mxu1 %v215_v11  ;;  %1965 = vmatpush3.msra.mxu0 %v1568_v10  ;;  %v221_v32 = vld [vmem:[%s2569_s6 + $0x1] sm:$0xff]  ;;  %v1613_v37 = vld [vmem:[%s3092_s1 + $0x1f8] sm:$0xff]  ;;  %v1588_v38 = vld [vmem:[%s3092_s1 + $0x170] sm:$0xff] }
  0x19   : > { %2009 = vmatpush3.msra.mxu1 %v215_v11  ;;  %1966 = vmatprep.subr.mxu0 %v1567_v12  ;;  %v197_v33 = vld [vmem:[%s2569_s6] sm:$0xff]  ;;  %v1612_v39 = vld [vmem:[%s3092_s1 + $0x1f0] sm:$0xff]  ;;  %v1611_v41 = vld [vmem:[%s3092_s1 + $0x1e8] sm:$0xff] }
  0x1a   : > { %2010 = vmatprep.subr.mxu1 %v214_v13  ;;  %1967 = vmatpush3.msra.mxu0 %v1567_v12  ;;  %v1586_v42 = vld [vmem:[%s3092_s1 + $0x160] sm:$0xff]  ;;  %v1585_v44 = vld [vmem:[%s3092_s1 + $0x158] sm:$0xff]  ;;  %v1584_v46 = vld [vmem:[%s3092_s1 + $0x150] sm:$0xff] }
  0x1b   : > { %2011 = vmatpush3.msra.mxu1 %v214_v13  ;;  %1968 = vmatprep.subr.mxu0 %v1566_v14  ;;  %v1610_v43 = vld [vmem:[%s3092_s1 + $0x1e0] sm:$0xff]  ;;  %v1609_v45 = vld [vmem:[%s3092_s1 + $0x1d8] sm:$0xff]  ;;  %v1608_v47 = vld [vmem:[%s3092_s1 + $0x1d0] sm:$0xff] }
  0x1c   : > { %2012 = vmatprep.subr.mxu1 %v213_v15  ;;  %1969 = vmatpush3.msra.mxu0 %v1566_v14  ;;  %v1583_v48 = vld [vmem:[%s3092_s1 + $0x148] sm:$0xff]  ;;  %v1582_v50 = vld [vmem:[%s3092_s1 + $0x140] sm:$0xff]  ;;  %v1581_v52 = vld [vmem:[%s3092_s1 + $0x138] sm:$0xff] }
  0x1d   : > { %2013 = vmatpush3.msra.mxu1 %v213_v15  ;;  %1970 = vmatprep.subr.mxu0 %v1565_v16  ;;  %v1607_v49 = vld [vmem:[%s3092_s1 + $0x1c8] sm:$0xff]  ;;  %v1606_v51 = vld [vmem:[%s3092_s1 + $0x1c0] sm:$0xff]  ;;  %v1605_v53 = vld [vmem:[%s3092_s1 + $0x1b8] sm:$0xff] }
  0x1e   : > { %2014 = vmatprep.subr.mxu1 %v212_v17  ;;  %1971 = vmatpush3.msra.mxu0 %v1565_v16  ;;  %v2642_v54 = vld [vmem:[%s2569_s6 + $0x21] sm:$0xff]  ;;  %v1580_v56 = vld [vmem:[%s3092_s1 + $0x130] sm:$0xff]  ;;  %v1577_v4 = vld [vmem:[%s3092_s1 + $0x118] sm:$0xff] }
  0x1f   : > { %2015 = vmatpush3.msra.mxu1 %v212_v17  ;;  %1972 = vmatprep.subr.mxu0 %v1564_v18  ;;  %v2645_v55 = vld [vmem:[%s2569_s6 + $0x20] sm:$0xff]  ;;  %v1604_v57 = vld [vmem:[%s3092_s1 + $0x1b0] sm:$0xff]  ;;  %v1579_v60 = vld [vmem:[%s3092_s1 + $0x128] sm:$0xff] }
  0x20   : > { %2016 = vmatprep.subr.mxu1 %v211_v19  ;;  %1973 = vmatpush3.msra.mxu0 %v1564_v18  ;;  %v2654_v58 = vld [vmem:[%s2569_s6 + $0x31] sm:$0xff]  ;;  %v1603_v61 = vld [vmem:[%s3092_s1 + $0x1a8] sm:$0xff]  ;;  %v2673_v63 = vld [vmem:[%s2569_s6 + $0x40] sm:$0xff] }
  0x21   : > { %2017 = vmatpush3.msra.mxu1 %v211_v19  ;;  %1974 = vmatprep.subr.mxu0 %v1563_v20  ;;  %v2657_v59 = vld [vmem:[%s2569_s6 + $0x30] sm:$0xff]  ;;  %v2670_v62 = vld [vmem:[%s2569_s6 + $0x41] sm:$0xff]  ;;  %v1601_v5 = vld [vmem:[%s3092_s1 + $0x198] sm:$0xff] }
  0x22   : > { %2018 = vmatprep.subr.mxu1 %v210_v21  ;;  %1975 = vmatpush3.msra.mxu0 %v1563_v20  ;;  %v1578_v0 = vld [vmem:[%s3092_s1 + $0x120] sm:$0xff]  ;;  %v2682_v2 = vld [vmem:[%s2569_s6 + $0x51] sm:$0xff]  ;;  %v1575_v12 = vld [vmem:[%s3092_s1 + $0x108] sm:$0xff] }
  0x23   : > { %2019 = vmatpush3.msra.mxu1 %v210_v21  ;;  %1976 = vmatprep.subr.mxu0 %v1562_v22  ;;  %v1602_v1 = vld [vmem:[%s3092_s1 + $0x1a0] sm:$0xff]  ;;  %v2685_v3 = vld [vmem:[%s2569_s6 + $0x50] sm:$0xff]  ;;  %v1599_v13 = vld [vmem:[%s3092_s1 + $0x188] sm:$0xff] }
  0x24   : > { %2020 = vmatprep.subr.mxu1 %v209_v23  ;;  %1977 = vmatpush3.msra.mxu0 %v1562_v22  ;;  %v2698_v6 = vld [vmem:[%s2569_s6 + $0x61] sm:$0xff]  ;;  %v1576_v8 = vld [vmem:[%s3092_s1 + $0x110] sm:$0xff]  ;;  %v1637_v18 = vld [vmem:[%s3092_s1 + $0x278] sm:$0xff] }
  0x25   : > { %2021 = vmatpush3.msra.mxu1 %v209_v23  ;;  %1978 = vmatprep.subr.mxu0 %v1561_v24  ;;  %v2701_v7 = vld [vmem:[%s2569_s6 + $0x60] sm:$0xff]  ;;  %v1600_v9 = vld [vmem:[%s3092_s1 + $0x190] sm:$0xff]  ;;  %v1661_v19 = vld [vmem:[%s3092_s1 + $0x2f8] sm:$0xff] }
  0x26   : > { %2022 = vmatprep.subr.mxu1 %v208_v25  ;;  %1979 = vmatpush3.msra.mxu0 %v1561_v24  ;;  %v2710_v10 = vld [vmem:[%s2569_s6 + $0x71] sm:$0xff]  ;;  %v1574_v14 = vld [vmem:[%s3092_s1 + $0x100] sm:$0xff]  ;;  %v1635_v24 = vld [vmem:[%s3092_s1 + $0x268] sm:$0xff] }
  0x27   : > { %2023 = vmatpush3.msra.mxu1 %v208_v25  ;;  %1980 = vmatprep.subr.mxu0 %v1560_v26  ;;  %v2713_v11 = vld [vmem:[%s2569_s6 + $0x70] sm:$0xff]  ;;  %v1598_v15 = vld [vmem:[%s3092_s1 + $0x180] sm:$0xff]  ;;  %v1659_v25 = vld [vmem:[%s3092_s1 + $0x2e8] sm:$0xff] }
  0x28   : > { %2024 = vmatprep.subr.mxu1 %v207_v27  ;;  %1981 = vmatpush3.msra.mxu0 %v1560_v26  ;;  %v456_v16 = vld [vmem:[%s2569_s6 + $0x2] sm:$0xff]  ;;  %v2733_v17 = vld [vmem:[%s2569_s6 + $0x12] sm:$0xff] }
  0x29   : > { %2025 = vmatpush3.msra.mxu1 %v207_v27  ;;  %1982 = vmatprep.subr.mxu0 %v1559_v28  ;;  %v1636_v20 = vld [vmem:[%s3092_s1 + $0x270] sm:$0xff]  ;;  %v2751_v22 = vld [vmem:[%s2569_s6 + $0x22] sm:$0xff] }
  0x2a   : > { %2026 = vmatprep.subr.mxu1 %v206_v29  ;;  %1983 = vmatpush3.msra.mxu0 %v1559_v28  ;;  %v1660_v21 = vld [vmem:[%s3092_s1 + $0x2f0] sm:$0xff]  ;;  %v1634_v26 = vld [vmem:[%s3092_s1 + $0x260] sm:$0xff] }
  0x2b   : > { %2027 = vmatpush3.msra.mxu1 %v206_v29  ;;  %1984 = vmatprep.subr.mxu0 %v1558_v30  ;;  %v2754_v23 = vld [vmem:[%s2569_s6 + $0x32] sm:$0xff]  ;;  %v1658_v27 = vld [vmem:[%s3092_s1 + $0x2e0] sm:$0xff] }
  0x2c   : > { %2028 = vmatprep.subr.mxu1 %v205_v31  ;;  %1985 = vmatpush3.msra.mxu0 %v1558_v30  ;;  %v2772_v28 = vld [vmem:[%s2569_s6 + $0x42] sm:$0xff]  ;;  %v2775_v29 = vld [vmem:[%s2569_s6 + $0x52] sm:$0xff] }
  0x2d   : > { %1986 = vmatprep.mubr.f32.mxu0 %v221_v32  ;;  %2029 = vmatpush3.msra.mxu1 %v205_v31  ;;  %v1633_v30 = vld [vmem:[%s3092_s1 + $0x258] sm:$0xff]  ;;  %v1632_v32 = vld [vmem:[%s3092_s1 + $0x250] sm:$0xff] }
  0x2e   : > { %2030 = vmatprep.mubr.f32.mxu1 %v197_v33  ;;  %1987 = vmatmul.mubr.f32.vlgmr.msra.gmra.mxu0 %v2580_v34  ;;  %v1657_v31 = vld [vmem:[%s3092_s1 + $0x2d8] sm:$0xff]  ;;  %v1656_v33 = vld [vmem:[%s3092_s1 + $0x2d0] sm:$0xff] }
  0x2f   : > { %2031 = vmatmul.mubr.f32.vlgmr.msra.gmra.mxu1 %v2583_v35  ;;  %2042 = vmatprep.subr.mxu0 %v1589_v36 }
  0x30   : > { %2086 = vmatprep.subr.mxu1 %v1613_v37  ;;  %2043 = vmatpush3.msra.mxu0 %v1589_v36  ;;  %v2797_v36 = vld [vmem:[%s2569_s6 + $0x72] sm:$0xff] }
  0x31   : > { %2087 = vmatpush3.msra.mxu1 %v1613_v37  ;;  %2044 = vmatprep.subr.mxu0 %v1588_v38  ;;  %v1631_v37 = vld [vmem:[%s3092_s1 + $0x248] sm:$0xff] }
  0x32   : > { %2088 = vmatprep.subr.mxu1 %v1612_v39  ;;  %2045 = vmatpush3.msra.mxu0 %v1588_v38  ;;  %v1655_v38 = vld [vmem:[%s3092_s1 + $0x2c8] sm:$0xff] }
  0x33   : > { %2089 = vmatpush3.msra.mxu1 %v1612_v39  ;;  %2046 = vmatprep.subr.mxu0 %v1587_v40  ;;  %v1630_v39 = vld [vmem:[%s3092_s1 + $0x240] sm:$0xff] }
  0x34   : > { %2090 = vmatprep.subr.mxu1 %v1611_v41  ;;  %2047 = vmatpush3.msra.mxu0 %v1587_v40  ;;  %v2812_v40 = vld [vmem:[%s2569_s6 + $0x80] sm:$0xff] }
  0x35   : > { %2091 = vmatpush3.msra.mxu1 %v1611_v41  ;;  %2048 = vmatprep.subr.mxu0 %v1586_v42  ;;  %v1654_v41 = vld [vmem:[%s3092_s1 + $0x2c0] sm:$0xff] }
  0x36   : > { %2092 = vmatprep.subr.mxu1 %v1610_v43  ;;  %2049 = vmatpush3.msra.mxu0 %v1586_v42  ;;  %v1629_v42 = vld [vmem:[%s3092_s1 + $0x238] sm:$0xff] }
  0x37   : > { %2093 = vmatpush3.msra.mxu1 %v1610_v43  ;;  %2050 = vmatprep.subr.mxu0 %v1585_v44  ;;  %v1653_v43 = vld [vmem:[%s3092_s1 + $0x2b8] sm:$0xff] }
  0x38   : > { %2094 = vmatprep.subr.mxu1 %v1609_v45  ;;  %2051 = vmatpush3.msra.mxu0 %v1585_v44  ;;  %v1628_v44 = vld [vmem:[%s3092_s1 + $0x230] sm:$0xff] }
  0x39   : > { %2095 = vmatpush3.msra.mxu1 %v1609_v45  ;;  %2052 = vmatprep.subr.mxu0 %v1584_v46  ;;  %v1652_v45 = vld [vmem:[%s3092_s1 + $0x2b0] sm:$0xff] }
  0x3a   : > { %2096 = vmatprep.subr.mxu1 %v1608_v47  ;;  %2053 = vmatpush3.msra.mxu0 %v1584_v46  ;;  %v1627_v46 = vld [vmem:[%s3092_s1 + $0x228] sm:$0xff] }
  0x3b   : > { %2097 = vmatpush3.msra.mxu1 %v1608_v47  ;;  %2054 = vmatprep.subr.mxu0 %v1583_v48  ;;  %v1651_v47 = vld [vmem:[%s3092_s1 + $0x2a8] sm:$0xff] }
  0x3c   : > { %2098 = vmatprep.subr.mxu1 %v1607_v49  ;;  %2055 = vmatpush3.msra.mxu0 %v1583_v48  ;;  %v1626_v48 = vld [vmem:[%s3092_s1 + $0x220] sm:$0xff] }
  0x3d   : > { %2099 = vmatpush3.msra.mxu1 %v1607_v49  ;;  %2056 = vmatprep.subr.mxu0 %v1582_v50  ;;  %v1650_v49 = vld [vmem:[%s3092_s1 + $0x2a0] sm:$0xff] }
  0x3e   : > { %2100 = vmatprep.subr.mxu1 %v1606_v51  ;;  %2057 = vmatpush3.msra.mxu0 %v1582_v50  ;;  %v1625_v50 = vld [vmem:[%s3092_s1 + $0x218] sm:$0xff] }
  0x3f   : > { %2101 = vmatpush3.msra.mxu1 %v1606_v51  ;;  %2058 = vmatprep.subr.mxu0 %v1581_v52  ;;  %v1649_v51 = vld [vmem:[%s3092_s1 + $0x298] sm:$0xff] }
  0x40   : > { %2102 = vmatprep.subr.mxu1 %v1605_v53  ;;  %2059 = vmatpush3.msra.mxu0 %v1581_v52  ;;  %v1624_v52 = vld [vmem:[%s3092_s1 + $0x210] sm:$0xff] }
  0x41   : > { %2103 = vmatpush3.msra.mxu1 %v1605_v53  ;;  %1989 = vmatprep.mubr.f32.mxu0 %v2642_v54  ;;  %v1648_v53 = vld [vmem:[%s3092_s1 + $0x290] sm:$0xff] }
  0x42   : > { %2033 = vmatprep.mubr.f32.mxu1 %v2645_v55  ;;  %2060 = vmatprep.subr.mxu0 %v1580_v56 }
  0x43   : > { %2104 = vmatprep.subr.mxu1 %v1604_v57  ;;  %1990 = vmatmul.mubr.f32.gmra.mxu0 %v2654_v58 }
  0x44   : > { %2034 = vmatmul.mubr.f32.gmra.mxu1 %v2657_v59  ;;  %2061 = vmatpush3.msra.mxu0 %v1580_v56  ;;  %v1623_v56 = vld [vmem:[%s3092_s1 + $0x208] sm:$0xff] }
  0x45   : > { %2105 = vmatpush3.msra.mxu1 %v1604_v57  ;;  %2062 = vmatprep.subr.mxu0 %v1579_v60  ;;  %v1647_v57 = vld [vmem:[%s3092_s1 + $0x288] sm:$0xff] }
  0x46   : > { %2106 = vmatprep.subr.mxu1 %v1603_v61  ;;  %2063 = vmatpush3.msra.mxu0 %v1579_v60  ;;  %v1622_v60 = vld [vmem:[%s3092_s1 + $0x200] sm:$0xff] }
  0x47   : > { %2107 = vmatpush3.msra.mxu1 %v1603_v61  ;;  %1992 = vmatprep.mubr.f32.mxu0 %v2670_v62  ;;  %v1646_v61 = vld [vmem:[%s3092_s1 + $0x280] sm:$0xff] }
  0x48   : > { %2036 = vmatprep.mubr.f32.mxu1 %v2673_v63  ;;  %2064 = vmatprep.subr.mxu0 %v1578_v0 }
  0x49   : > { %2108 = vmatprep.subr.mxu1 %v1602_v1  ;;  %1993 = vmatmul.mubr.f32.gmra.mxu0 %v2682_v2 }
  0x4a   : > { %2037 = vmatmul.mubr.f32.gmra.mxu1 %v2685_v3  ;;  %2065 = vmatpush3.msra.mxu0 %v1578_v0  ;;  %v1685_v0 = vld [vmem:[%s3092_s1 + $0x378] sm:$0xff] }
  0x4b   : > { %2109 = vmatpush3.msra.mxu1 %v1602_v1  ;;  %2066 = vmatprep.subr.mxu0 %v1577_v4  ;;  %v1709_v1 = vld [vmem:[%s3092_s1 + $0x3f8] sm:$0xff] }
  0x4c   : > { %2110 = vmatprep.subr.mxu1 %v1601_v5  ;;  %2067 = vmatpush3.msra.mxu0 %v1577_v4  ;;  %v1684_v4 = vld [vmem:[%s3092_s1 + $0x370] sm:$0xff] }
  0x4d   : > { %2111 = vmatpush3.msra.mxu1 %v1601_v5  ;;  %1995 = vmatprep.mubr.f32.mxu0 %v2698_v6  ;;  %v1683_v5 = vld [vmem:[%s3092_s1 + $0x368] sm:$0xff] }
  0x4e   : > { %2039 = vmatprep.mubr.f32.mxu1 %v2701_v7  ;;  %2068 = vmatprep.subr.mxu0 %v1576_v8 }
  0x4f   : > { %2112 = vmatprep.subr.mxu1 %v1600_v9  ;;  %1996 = vmatmul.mubr.f32.gmra.mxu0 %v2710_v10 }
  0x50   : > { %2040 = vmatmul.mubr.f32.gmra.mxu1 %v2713_v11  ;;  %2069 = vmatpush3.msra.mxu0 %v1576_v8  ;;  %v1707_v8 = vld [vmem:[%s3092_s1 + $0x3e8] sm:$0xff] }
  0x51   : > { %2113 = vmatpush3.msra.mxu1 %v1600_v9  ;;  %2070 = vmatprep.subr.mxu0 %v1575_v12  ;;  %v1682_v9 = vld [vmem:[%s3092_s1 + $0x360] sm:$0xff] }
  0x52   : > { %2114 = vmatprep.subr.mxu1 %v1599_v13  ;;  %2071 = vmatpush3.msra.mxu0 %v1575_v12  ;;  %v1706_v12 = vld [vmem:[%s3092_s1 + $0x3e0] sm:$0xff] }
  0x53   : > { %2115 = vmatpush3.msra.mxu1 %v1599_v13  ;;  %2072 = vmatprep.subr.mxu0 %v1574_v14  ;;  %v1681_v13 = vld [vmem:[%s3092_s1 + $0x358] sm:$0xff] }
  0x54   : > { %2116 = vmatprep.subr.mxu1 %v1598_v15  ;;  %2073 = vmatpush3.msra.mxu0 %v1574_v14  ;;  %v1705_v14 = vld [vmem:[%s3092_s1 + $0x3d8] sm:$0xff] }
  0x55   : > { %2074 = vmatprep.mubr.f32.mxu0 %v456_v16  ;;  %2117 = vmatpush3.msra.mxu1 %v1598_v15  ;;  %v1680_v15 = vld [vmem:[%s3092_s1 + $0x350] sm:$0xff] }
  0x56   : > { %2118 = vmatprep.mubr.f32.mxu1 %v2583_v35  ;;  %2075 = vmatmul.mubr.f32.vlgmr.msra.gmra.mxu0 %v2733_v17  ;;  %v2794_v35 = vld [vmem:[%s2569_s6 + $0x62] sm:$0xff]  ;;  %v1704_v16 = vld [vmem:[%s3092_s1 + $0x3d0] sm:$0xff] }
  0x57   : > { %2119 = vmatmul.mubr.f32.vlgmr.msra.gmra.mxu1 %v2645_v55  ;;  %2130 = vmatprep.subr.mxu0 %v1637_v18 }
  0x58   : > { %2174 = vmatprep.subr.mxu1 %v1661_v19  ;;  %2131 = vmatpush3.msra.mxu0 %v1637_v18  ;;  %v1679_v18 = vld [vmem:[%s3092_s1 + $0x348] sm:$0xff] }
  0x59   : > { %2175 = vmatpush3.msra.mxu1 %v1661_v19  ;;  %2132 = vmatprep.subr.mxu0 %v1636_v20  ;;  %v1703_v19 = vld [vmem:[%s3092_s1 + $0x3c8] sm:$0xff] }
  0x5a   : > { %2176 = vmatprep.subr.mxu1 %v1660_v21  ;;  %2077 = vmatprep.mubr.f32.mxu0 %v2751_v22 }
  0x5b   : > { %2133 = vmatpush3.msra.mxu0 %v1636_v20  ;;  %2177 = vmatpush3.msra.mxu1 %v1660_v21  ;;  %v1678_v20 = vld [vmem:[%s3092_s1 + $0x340] sm:$0xff] }
  0x5c   : > { %2078 = vmatmul.mubr.f32.gmra.mxu0 %v2754_v23  ;;  %2134 = vmatprep.subr.mxu0 %v1635_v24  ;;  %v2930_v21 = vld [vmem:[%s2569_s6 + $0x82] sm:$0xff] }
  0x5d   : > { %2178 = vmatprep.subr.mxu1 %v1659_v25  ;;  %2121 = vmatprep.mubr.f32.mxu1 %v2657_v59 }
  0x5e   : > { %2135 = vmatpush3.msra.mxu0 %v1635_v24  ;;  %2179 = vmatpush3.msra.mxu1 %v1659_v25  ;;  %v1702_v24 = vld [vmem:[%s3092_s1 + $0x3c0] sm:$0xff]  ;;  %v1677_v25 = vld [vmem:[%s3092_s1 + $0x338] sm:$0xff] }
  0x5f   : > { %2136 = vmatprep.subr.mxu0 %v1634_v26  ;;  %2122 = vmatmul.mubr.f32.gmra.mxu1 %v2673_v63 }
  0x60   : > { %2180 = vmatprep.subr.mxu1 %v1658_v27  ;;  %2080 = vmatprep.mubr.f32.mxu0 %v2772_v28 }
  0x61   : > { %2137 = vmatpush3.msra.mxu0 %v1634_v26  ;;  %2181 = vmatpush3.msra.mxu1 %v1658_v27  ;;  %v1701_v26 = vld [vmem:[%s3092_s1 + $0x3b8] sm:$0xff]  ;;  %v1676_v27 = vld [vmem:[%s3092_s1 + $0x330] sm:$0xff] }
  0x62   : > { %2081 = vmatmul.mubr.f32.gmra.mxu0 %v2775_v29  ;;  %2138 = vmatprep.subr.mxu0 %v1633_v30 }
  0x63   : > { %2182 = vmatprep.subr.mxu1 %v1657_v31  ;;  %2124 = vmatprep.mubr.f32.mxu1 %v2685_v3 }
  0x64   : > { %2139 = vmatpush3.msra.mxu0 %v1633_v30  ;;  %2183 = vmatpush3.msra.mxu1 %v1657_v31  ;;  %v1700_v30 = vld [vmem:[%s3092_s1 + $0x3b0] sm:$0xff]  ;;  %v1675_v31 = vld [vmem:[%s3092_s1 + $0x328] sm:$0xff] }
  0x65   : > { %2140 = vmatprep.subr.mxu0 %v1632_v32  ;;  %2125 = vmatmul.mubr.f32.gmra.mxu1 %v2701_v7 }
  0x66   : > { %2184 = vmatprep.subr.mxu1 %v1656_v33  ;;  %2083 = vmatprep.mubr.f32.mxu0 %v2794_v35 }
  0x67   : > { %2141 = vmatpush3.msra.mxu0 %v1632_v32  ;;  %2185 = vmatpush3.msra.mxu1 %v1656_v33  ;;  %v1699_v32 = vld [vmem:[%s3092_s1 + $0x3a8] sm:$0xff]  ;;  %v1674_v33 = vld [vmem:[%s3092_s1 + $0x320] sm:$0xff] }
  0x68   : > { %2084 = vmatmul.mubr.f32.gmra.mxu0 %v2797_v36  ;;  %2142 = vmatprep.subr.mxu0 %v1631_v37 }
  0x69   : > { %2186 = vmatprep.subr.mxu1 %v1655_v38  ;;  %2127 = vmatprep.mubr.f32.mxu1 %v2713_v11 }
  0x6a   : > { %2143 = vmatpush3.msra.mxu0 %v1631_v37  ;;  %2187 = vmatpush3.msra.mxu1 %v1655_v38  ;;  %v1698_v37 = vld [vmem:[%s3092_s1 + $0x3a0] sm:$0xff]  ;;  %v1673_v38 = vld [vmem:[%s3092_s1 + $0x318] sm:$0xff] }
  0x6b   : > { %2144 = vmatprep.subr.mxu0 %v1630_v39  ;;  %2128 = vmatmul.mubr.f32.gmra.mxu1 %v2812_v40 }
  0x6c   : > { %2188 = vmatprep.subr.mxu1 %v1654_v41  ;;  %2145 = vmatpush3.msra.mxu0 %v1630_v39  ;;  %v1697_v39 = vld [vmem:[%s3092_s1 + $0x398] sm:$0xff] }
  0x6d   : > { %2189 = vmatpush3.msra.mxu1 %v1654_v41  ;;  %2146 = vmatprep.subr.mxu0 %v1629_v42  ;;  %v1672_v41 = vld [vmem:[%s3092_s1 + $0x310] sm:$0xff] }
  0x6e   : > { %2190 = vmatprep.subr.mxu1 %v1653_v43  ;;  %2147 = vmatpush3.msra.mxu0 %v1629_v42  ;;  %v1696_v42 = vld [vmem:[%s3092_s1 + $0x390] sm:$0xff] }
  0x6f   : > { %2191 = vmatpush3.msra.mxu1 %v1653_v43  ;;  %2148 = vmatprep.subr.mxu0 %v1628_v44  ;;  %v1671_v43 = vld [vmem:[%s3092_s1 + $0x308] sm:$0xff] }
  0x70   : > { %2192 = vmatprep.subr.mxu1 %v1652_v45  ;;  %2149 = vmatpush3.msra.mxu0 %v1628_v44  ;;  %v1695_v44 = vld [vmem:[%s3092_s1 + $0x388] sm:$0xff] }
  0x71   : > { %2193 = vmatpush3.msra.mxu1 %v1652_v45  ;;  %2150 = vmatprep.subr.mxu0 %v1627_v46  ;;  %v1670_v45 = vld [vmem:[%s3092_s1 + $0x300] sm:$0xff] }
  0x72   : > { %2194 = vmatprep.subr.mxu1 %v1651_v47  ;;  %2151 = vmatpush3.msra.mxu0 %v1627_v46  ;;  %v1694_v46 = vld [vmem:[%s3092_s1 + $0x380] sm:$0xff] }
  0x73   : > { %2195 = vmatpush3.msra.mxu1 %v1651_v47  ;;  %2152 = vmatprep.subr.mxu0 %v1626_v48  ;;  %v1733_v47 = vld [vmem:[%s3092_s1 + $0x478] sm:$0xff] }
  0x74   : > { %2196 = vmatprep.subr.mxu1 %v1650_v49  ;;  %2153 = vmatpush3.msra.mxu0 %v1626_v48  ;;  %v1732_v48 = vld [vmem:[%s3092_s1 + $0x470] sm:$0xff] }
  0x75   : > { %2197 = vmatpush3.msra.mxu1 %v1650_v49  ;;  %2154 = vmatprep.subr.mxu0 %v1625_v50  ;;  %v1720_v49 = vld [vmem:[%s3092_s1 + $0x410] sm:$0xff] }
  0x76   : > { %2198 = vmatprep.subr.mxu1 %v1649_v51  ;;  %2155 = vmatpush3.msra.mxu0 %v1625_v50  ;;  %v1719_v50 = vld [vmem:[%s3092_s1 + $0x408] sm:$0xff] }
  0x77   : > { %2199 = vmatpush3.msra.mxu1 %v1649_v51  ;;  %2156 = vmatprep.subr.mxu0 %v1624_v52  ;;  %v1718_v51 = vld [vmem:[%s3092_s1 + $0x400] sm:$0xff] }
  0x78   : > { %2200 = vmatprep.subr.mxu1 %v1648_v53  ;;  %2157 = vmatpush3.msra.mxu0 %v1624_v52  ;;  %v1717_v52 = vld [vmem:[%s2569_s6 + $0x92] sm:$0xff] }
  0x79   : > { %2201 = vmatpush3.msra.mxu1 %v1648_v53  ;;  %2158 = vmatprep.subr.mxu0 %v1623_v56 }
  0x7a   : > { %2202 = vmatprep.subr.mxu1 %v1647_v57  ;;  %2159 = vmatpush3.msra.mxu0 %v1623_v56 }
  0x7b   : > { %2203 = vmatpush3.msra.mxu1 %v1647_v57  ;;  %2160 = vmatprep.subr.mxu0 %v1622_v60 }
  0x7c   : > { %2204 = vmatprep.subr.mxu1 %v1646_v61  ;;  %2161 = vmatpush3.msra.mxu0 %v1622_v60 }
  0x7d   : > { %2162 = vmatprep.mubr.f32.mxu0 %v2580_v34  ;;  %2205 = vmatpush3.msra.mxu1 %v1646_v61  ;;  %v1708_v34 = vld [vmem:[%s3092_s1 + $0x3f0] sm:$0xff] }
  0x7e   : > { %2206 = vmatprep.mubr.f32.mxu1 %v2733_v17  ;;  %2163 = vmatmul.mubr.f32.vlgmr.msra.gmra.mxu0 %v2642_v54  ;;  %v2915_v17 = vld [vmem:[%s2569_s6 + $0x81] sm:$0xff] }
  0x7f   : > { %2207 = vmatmul.mubr.f32.vlgmr.msra.gmra.mxu1 %v2751_v22  ;;  %2218 = vmatprep.subr.mxu0 %v1685_v0 }
  0x80   : > { %2262 = vmatprep.subr.mxu1 %v1709_v1  ;;  %2219 = vmatpush3.msra.mxu0 %v1685_v0 }
  0x81   : > { %2263 = vmatpush3.msra.mxu1 %v1709_v1  ;;  %2220 = vmatprep.subr.mxu0 %v1684_v4 }
  0x82   : > { %2264 = vmatprep.subr.mxu1 %v1708_v34  ;;  %2165 = vmatprep.mubr.f32.mxu0 %v2654_v58 }
  0x83   : > { %2221 = vmatpush3.msra.mxu0 %v1684_v4  ;;  %2265 = vmatpush3.msra.mxu1 %v1708_v34 }
  0x84   : > { %2166 = vmatmul.mubr.f32.gmra.mxu0 %v2670_v62  ;;  %2222 = vmatprep.subr.mxu0 %v1683_v5 }
  0x85   : > { %2266 = vmatprep.subr.mxu1 %v1707_v8  ;;  %2209 = vmatprep.mubr.f32.mxu1 %v2754_v23 }
  0x86   : > { %2223 = vmatpush3.msra.mxu0 %v1683_v5  ;;  %2267 = vmatpush3.msra.mxu1 %v1707_v8 }
  0x87   : > { %2224 = vmatprep.subr.mxu0 %v1682_v9  ;;  %2210 = vmatmul.mubr.f32.gmra.mxu1 %v2772_v28 }
  0x88   : > { %2268 = vmatprep.subr.mxu1 %v1706_v12  ;;  %2168 = vmatprep.mubr.f32.mxu0 %v2682_v2 }
  0x89   : > { %2225 = vmatpush3.msra.mxu0 %v1682_v9  ;;  %2269 = vmatpush3.msra.mxu1 %v1706_v12 }
  0x8a   : > { %2169 = vmatmul.mubr.f32.gmra.mxu0 %v2698_v6  ;;  %2226 = vmatprep.subr.mxu0 %v1681_v13 }
  0x8b   : > { %2270 = vmatprep.subr.mxu1 %v1705_v14  ;;  %2212 = vmatprep.mubr.f32.mxu1 %v2775_v29 }
  0x8c   : > { %2227 = vmatpush3.msra.mxu0 %v1681_v13  ;;  %2271 = vmatpush3.msra.mxu1 %v1705_v14 }
  0x8d   : > { %2228 = vmatprep.subr.mxu0 %v1680_v15  ;;  %2213 = vmatmul.mubr.f32.gmra.mxu1 %v2794_v35 }
  0x8e   : > { %2272 = vmatprep.subr.mxu1 %v1704_v16  ;;  %2171 = vmatprep.mubr.f32.mxu0 %v2710_v10 }
  0x8f   : > { %2229 = vmatpush3.msra.mxu0 %v1680_v15  ;;  %2273 = vmatpush3.msra.mxu1 %v1704_v16 }
  0x90   : > { %2172 = vmatmul.mubr.f32.gmra.mxu0 %v2915_v17  ;;  %2230 = vmatprep.subr.mxu0 %v1679_v18 }
  0x91   : > { %2274 = vmatprep.subr.mxu1 %v1703_v19  ;;  %2215 = vmatprep.mubr.f32.mxu1 %v2797_v36 }
  0x92   : > { %2231 = vmatpush3.msra.mxu0 %v1679_v18  ;;  %2275 = vmatpush3.msra.mxu1 %v1703_v19 }
  0x93   : > { %2232 = vmatprep.subr.mxu0 %v1678_v20  ;;  %2216 = vmatmul.mubr.f32.gmra.mxu1 %v2930_v21 }
  0x94   : > { %2276 = vmatprep.subr.mxu1 %v1702_v24  ;;  %2233 = vmatpush3.msra.mxu0 %v1678_v20 }
  0x95   : > { %2277 = vmatpush3.msra.mxu1 %v1702_v24  ;;  %2234 = vmatprep.subr.mxu0 %v1677_v25 }
  0x96   : > { %2278 = vmatprep.subr.mxu1 %v1701_v26  ;;  %2235 = vmatpush3.msra.mxu0 %v1677_v25 }
  0x97   : > { %2279 = vmatpush3.msra.mxu1 %v1701_v26  ;;  %2236 = vmatprep.subr.mxu0 %v1676_v27 }
  0x98   : > { %2280 = vmatprep.subr.mxu1 %v1700_v30  ;;  %2237 = vmatpush3.msra.mxu0 %v1676_v27 }
  0x99   : > { %2281 = vmatpush3.msra.mxu1 %v1700_v30  ;;  %2238 = vmatprep.subr.mxu0 %v1675_v31 }
  0x9a   : > { %2282 = vmatprep.subr.mxu1 %v1699_v32  ;;  %2239 = vmatpush3.msra.mxu0 %v1675_v31 }
  0x9b   : > { %2283 = vmatpush3.msra.mxu1 %v1699_v32  ;;  %2240 = vmatprep.subr.mxu0 %v1674_v33 }
  0x9c   : > { %2284 = vmatprep.subr.mxu1 %v1698_v37  ;;  %2241 = vmatpush3.msra.mxu0 %v1674_v33 }
  0x9d   : > { %2285 = vmatpush3.msra.mxu1 %v1698_v37  ;;  %2242 = vmatprep.subr.mxu0 %v1673_v38 }
  0x9e   : > { %2286 = vmatprep.subr.mxu1 %v1697_v39  ;;  %2243 = vmatpush3.msra.mxu0 %v1673_v38 }
  0x9f   : > { %2287 = vmatpush3.msra.mxu1 %v1697_v39  ;;  %2244 = vmatprep.subr.mxu0 %v1672_v41 }
  0xa0   : > { %2288 = vmatprep.subr.mxu1 %v1696_v42  ;;  %2245 = vmatpush3.msra.mxu0 %v1672_v41 }
  0xa1   : > { %2289 = vmatpush3.msra.mxu1 %v1696_v42  ;;  %2246 = vmatprep.subr.mxu0 %v1671_v43 }
  0xa2   : > { %2290 = vmatprep.subr.mxu1 %v1695_v44  ;;  %2247 = vmatpush3.msra.mxu0 %v1671_v43 }
  0xa3   : > { %2291 = vmatpush3.msra.mxu1 %v1695_v44  ;;  %2248 = vmatprep.subr.mxu0 %v1670_v45 }
  0xa4   : > { %2292 = vmatprep.subr.mxu1 %v1694_v46  ;;  %2249 = vmatpush3.msra.mxu0 %v1670_v45 }
  0xa5   : > { %2250 = vmatprep.mubr.f32.mxu0 %v2645_v55  ;;  %2293 = vmatpush3.msra.mxu1 %v1694_v46  ;;  %v1731_v55 = vld [vmem:[%s3092_s1 + $0x468] sm:$0xff] }
  0xa6   : > { %2294 = vmatprep.mubr.f32.mxu1 %v2642_v54  ;;  %2251 = vmatmul.mubr.f32.vlgmr.msra.gmra.mxu0 %v2657_v59  ;;  %v1730_v54 = vld [vmem:[%s3092_s1 + $0x460] sm:$0xff]  ;;  %v1728_v59 = vld [vmem:[%s3092_s1 + $0x450] sm:$0xff] }
  0xa7   : > { %2295 = vmatmul.mubr.f32.vlgmr.msra.gmra.mxu1 %v2654_v58  ;;  %2306 = vmatprep.subr.mxu0 %v1733_v47  ;;  %v1729_v58 = vld [vmem:[%s3092_s1 + $0x458] sm:$0xff] }
  0xa8   : > { %2350 = vmatprep.subr.mxu1 %v1733_v47  ;;  %2307 = vmatpush3.msra.mxu0 %v1733_v47 }
  0xa9   : > { %2366 = vmatpush3.msra.mxu1 %v1733_v47  ;;  %2308 = vmatprep.subr.mxu0 %v1732_v48 }
  0xaa   : > { %2351 = vmatprep.subr.mxu1 %v1732_v48  ;;  %2253 = vmatprep.mubr.f32.mxu0 %v2673_v63  ;;  %v1727_v63 = vld [vmem:[%s3092_s1 + $0x448] sm:$0xff] }
  0xab   : > { %2309 = vmatpush3.msra.mxu0 %v1732_v48  ;;  %2367 = vmatpush3.msra.mxu1 %v1732_v48 }
  0xac   : > { %2254 = vmatmul.mubr.f32.gmra.mxu0 %v2685_v3  ;;  %2310 = vmatprep.subr.mxu0 %v1731_v55  ;;  %v1693_v3 = vld [vmem:[%s2569_s6 + $0x91] sm:$0xff] }
  0xad   : > { %2352 = vmatprep.subr.mxu1 %v1731_v55  ;;  %2297 = vmatprep.mubr.f32.mxu1 %v2670_v62  ;;  %v1669_v62 = vld [vmem:[%s2569_s6 + $0x90] sm:$0xff] }
  0xae   : > { %2311 = vmatpush3.msra.mxu0 %v1731_v55  ;;  %2368 = vmatpush3.msra.mxu1 %v1731_v55 }
  0xaf   : > { %2312 = vmatprep.subr.mxu0 %v1730_v54  ;;  %2298 = vmatmul.mubr.f32.gmra.mxu1 %v2682_v2  ;;  %v1726_v2 = vld [vmem:[%s3092_s1 + $0x440] sm:$0xff] }
  0xb0   : > { %2353 = vmatprep.subr.mxu1 %v1730_v54  ;;  %2256 = vmatprep.mubr.f32.mxu0 %v2701_v7  ;;  %v1724_v7 = vld [vmem:[%s3092_s1 + $0x430] sm:$0xff] }
  0xb1   : > { %2313 = vmatpush3.msra.mxu0 %v1730_v54  ;;  %2369 = vmatpush3.msra.mxu1 %v1730_v54 }
  0xb2   : > { %2257 = vmatmul.mubr.f32.gmra.mxu0 %v2713_v11  ;;  %2314 = vmatprep.subr.mxu0 %v1729_v58  ;;  %v1722_v11 = vld [vmem:[%s3092_s1 + $0x420] sm:$0xff] }
  0xb3   : > { %2354 = vmatprep.subr.mxu1 %v1729_v58  ;;  %2300 = vmatprep.mubr.f32.mxu1 %v2698_v6  ;;  %v1725_v6 = vld [vmem:[%s3092_s1 + $0x438] sm:$0xff] }
  0xb4   : > { %2315 = vmatpush3.msra.mxu0 %v1729_v58  ;;  %2370 = vmatpush3.msra.mxu1 %v1729_v58 }
  0xb5   : > { %2316 = vmatprep.subr.mxu0 %v1728_v59  ;;  %2301 = vmatmul.mubr.f32.gmra.mxu1 %v2710_v10  ;;  %v1723_v10 = vld [vmem:[%s3092_s1 + $0x428] sm:$0xff] }
  0xb6   : > { %2355 = vmatprep.subr.mxu1 %v1728_v59  ;;  %2259 = vmatprep.mubr.f32.mxu0 %v2812_v40  ;;  %v1721_v40 = vld [vmem:[%s3092_s1 + $0x418] sm:$0xff] }
  0xb7   : > { %2317 = vmatpush3.msra.mxu0 %v1728_v59  ;;  %2371 = vmatpush3.msra.mxu1 %v1728_v59 }
  0xb8   : > { %2260 = vmatmul.mubr.f32.gmra.mxu0 %v1669_v62  ;;  %2318 = vmatprep.subr.mxu0 %v1727_v63 }
  0xb9   : > { %2356 = vmatprep.subr.mxu1 %v1727_v63  ;;  %2303 = vmatprep.mubr.f32.mxu1 %v2915_v17 }
  0xba   : > { %2319 = vmatpush3.msra.mxu0 %v1727_v63  ;;  %2372 = vmatpush3.msra.mxu1 %v1727_v63 }
  0xbb   : > { %2320 = vmatprep.subr.mxu0 %v1726_v2  ;;  %2304 = vmatmul.mubr.f32.gmra.mxu1 %v1693_v3 }
  0xbc   : > { %2357 = vmatprep.subr.mxu1 %v1726_v2  ;;  %2321 = vmatpush3.msra.mxu0 %v1726_v2 }
  0xbd   : > { %2373 = vmatpush3.msra.mxu1 %v1726_v2  ;;  %2322 = vmatprep.subr.mxu0 %v1725_v6 }
  0xbe   : > { %2358 = vmatprep.subr.mxu1 %v1725_v6  ;;  %2323 = vmatpush3.msra.mxu0 %v1725_v6 }
  0xbf   : > { %2374 = vmatpush3.msra.mxu1 %v1725_v6  ;;  %2324 = vmatprep.subr.mxu0 %v1724_v7 }
  0xc0   : > { %2359 = vmatprep.subr.mxu1 %v1724_v7  ;;  %2325 = vmatpush3.msra.mxu0 %v1724_v7 }
  0xc1   : > { %2375 = vmatpush3.msra.mxu1 %v1724_v7  ;;  %2326 = vmatprep.subr.mxu0 %v1723_v10 }
  0xc2   : > { %2360 = vmatprep.subr.mxu1 %v1723_v10  ;;  %2327 = vmatpush3.msra.mxu0 %v1723_v10 }
  0xc3   : > { %2376 = vmatpush3.msra.mxu1 %v1723_v10  ;;  %2328 = vmatprep.subr.mxu0 %v1722_v11 }
  0xc4   : > { %2361 = vmatprep.subr.mxu1 %v1722_v11  ;;  %2329 = vmatpush3.msra.mxu0 %v1722_v11 }
  0xc5   : > { %2377 = vmatpush3.msra.mxu1 %v1722_v11  ;;  %2330 = vmatprep.subr.mxu0 %v1721_v40 }
  0xc6   : > { %2362 = vmatprep.subr.mxu1 %v1721_v40  ;;  %2331 = vmatpush3.msra.mxu0 %v1721_v40 }
  0xc7   : > { %2378 = vmatpush3.msra.mxu1 %v1721_v40  ;;  %2332 = vmatprep.subr.mxu0 %v1720_v49 }
  0xc8   : > { %2363 = vmatprep.subr.mxu1 %v1720_v49  ;;  %2333 = vmatpush3.msra.mxu0 %v1720_v49 }
  0xc9   : > { %2379 = vmatpush3.msra.mxu1 %v1720_v49  ;;  %2334 = vmatprep.subr.mxu0 %v1719_v50 }
  0xca   : > { %2364 = vmatprep.subr.mxu1 %v1719_v50  ;;  %2335 = vmatpush3.msra.mxu0 %v1719_v50 }
  0xcb   : > { %2380 = vmatpush3.msra.mxu1 %v1719_v50  ;;  %2336 = vmatprep.subr.mxu0 %v1718_v51 }
  0xcc   : > { %2365 = vmatprep.subr.mxu1 %v1718_v51  ;;  %2337 = vmatpush3.msra.mxu0 %v1718_v51 }
  0xcd   : > { %2381 = vmatpush3.msra.mxu1 %v1718_v51  ;;  %2338 = vmatprep.mubr.f32.mxu0 %v2751_v22 }
  0xce   : > { %2344 = vmatprep.mubr.f32.mxu1 %v2794_v35  ;;  %2339 = vmatmul.mubr.f32.vlgmr.msra.gmra.mxu0 %v2754_v23 }
  0xcf   : > { %2345 = vmatmul.mubr.f32.vlgmr.msra.gmra.mxu1 %v2797_v36  ;;  %2341 = vmatprep.mubr.f32.mxu0 %v2772_v28 }
  0xd0   : > { %2347 = vmatprep.mubr.f32.mxu1 %v2930_v21 }
  0xd2   : > { %2342 = vmatmul.mubr.f32.gmra.mxu0 %v2775_v29 }
  0xd3   : > { %2348 = vmatmul.mubr.f32.gmra.mxu1 %v1717_v52 }
  0xee   : > { %v1988_v53 = vpop.f32.mrf.mxu0 }
  0xef   : > { %v2032_v60 = vpop.f32.mrf.mxu1 }
  0xf0   : > { %v312_v56 = vpop.f32.mrf.mxu0  ;;  %v423_v3 = vadd.f32 %v2032_v60, %v1988_v53 }
  0xf1   : > { %v417_v61 = vpop.f32.mrf.mxu1 }
  0xf2   : > { %v418_v11 = vadd.f32 %v417_v61, %v312_v56 }
 0x103   : > { %v3057_v57 = vpop.f32.mrf.mxu0 }
 0x104   : > { %v2035_v35 = vpop.f32.mrf.mxu1 }
 0x105   : > { %v322_v22 = vpop.f32.mrf.mxu0 }
 0x106   : > { %v427_v23 = vpop.f32.mrf.mxu1 }
 0x109   : > { %v1994_v0 = vpop.f32.mrf.mxu0 }
 0x10a   : > { %v2038_v36 = vpop.f32.mrf.mxu1 }
 0x10b   : > { %v332_v1 = vpop.f32.mrf.mxu0  ;;  %v443_v6 = vadd.f32 %v2038_v36, %v1994_v0 }
 0x10c   : > { %v437_v28 = vpop.f32.mrf.mxu1 }
 0x10d   : > { %v438_v40 = vadd.f32 %v437_v28, %v332_v1 }
 0x10f   : > { %v1997_v4 = vpop.f32.mrf.mxu0 }
 0x110   : > { %v2041_v5 = vpop.f32.mrf.mxu1 }
 0x111   : > { %v342_v34 = vpop.f32.mrf.mxu0 }
 0x112   : > { %v447_v9 = vpop.f32.mrf.mxu1 }
 0x113   : > { %v448_v53 = vadd.f32 %v447_v9, %v342_v34 }
 0x116   : > { %v2076_v8 = vpop.f32.mrf.mxu0 }
 0x117   : > { %v2120_v12 = vpop.f32.mrf.mxu1  ;;  %v587_v49 = vadd.f32 %v2076_v8, %v423_v3 }
 0x118   : > { %v547_v29 = vpop.f32.mrf.mxu0 }
 0x119   : > { %v688_v14 = vpop.f32.mrf.mxu1  ;;  %v586_v51 = vadd.f32 %v547_v29, %v418_v11  ;;  %v728_v0 = vadd.f32 %v2120_v12, %v587_v49 }
 0x11b   : > { %v727_v28 = vadd.f32 %v688_v14, %v586_v51 }
 0x11c   : > { %v2079_v13 = vpop.f32.mrf.mxu0 }
 0x11e   : > { %v557_v15 = vpop.f32.mrf.mxu0 }
 0x11f   : > { %v2123_v16 = vpop.f32.mrf.mxu1 }
 0x121   : > { %v698_v18 = vpop.f32.mrf.mxu1 }
 0x122   : > { %v2082_v17 = vpop.f32.mrf.mxu0 }
 0x123   : > { %v591_v50 = vadd.f32 %v2082_v17, %v443_v6 }
 0x124   : > { %v567_v19 = vpop.f32.mrf.mxu0 }
 0x125   : > { %v2126_v20 = vpop.f32.mrf.mxu1  ;;  %v590_v52 = vadd.f32 %v567_v19, %v438_v40 }
 0x126   : > { %v732_v36 = vadd.f32 %v2126_v20, %v591_v50 }
 0x127   : > { %v708_v24 = vpop.f32.mrf.mxu1 }
 0x128   : > { %v2085_v21 = vpop.f32.mrf.mxu0  ;;  %v731_v3 = vadd.f32 %v708_v24, %v590_v52 }
 0x12a   : > { %v577_v25 = vpop.f32.mrf.mxu0 }
 0x12b   : > { %v2129_v26 = vpop.f32.mrf.mxu1  ;;  %v592_v1 = vadd.f32 %v577_v25, %v448_v53 }
 0x12d   : > { %v718_v30 = vpop.f32.mrf.mxu1 }
 0x13e   : > { %v2164_v27 = vpop.f32.mrf.mxu0 }
 0x13f   : > { %v2208_v32 = vpop.f32.mrf.mxu1  ;;  %v866_v8 = vadd.f32 %v2164_v27, %v728_v0 }
 0x140   : > { %v826_v31 = vpop.f32.mrf.mxu0 }
 0x141   : > { %v964_v37 = vpop.f32.mrf.mxu1  ;;  %v865_v19 = vadd.f32 %v826_v31, %v727_v28 }
 0x143   : > { %v1003_v14 = vadd.f32 %v964_v37, %v865_v19 }
 0x144   : > { %v2167_v33 = vpop.f32.mrf.mxu0 }
 0x146   : > { %v836_v39 = vpop.f32.mrf.mxu0 }
 0x147   : > { %v3059_v38 = vpop.f32.mrf.mxu1 }
 0x148   : > { %3095 = vst [vmem:[#allocation2_spill] sm:$0xff] %v3059_v38  ;;  %v433_v38 = vadd.f32 %v2035_v35, %v3057_v57  ;;  %v733_v35 = vadd.f32 %v718_v30, %v592_v1 }
 0x149   : > { %v3061_v41 = vpop.f32.mrf.mxu1 }
 0x14a   : > { %3096 = vst [vmem:[#allocation3_spill] sm:$0xff] %v3061_v41  ;;  %v2170_v42 = vpop.f32.mrf.mxu0 }
 0x14b   : > { %v870_v6 = vadd.f32 %v2170_v42, %v732_v36 }
 0x14c   : > { %v846_v44 = vpop.f32.mrf.mxu0 }
 0x14d   : > { %v2214_v43 = vpop.f32.mrf.mxu1  ;;  %v869_v11 = vadd.f32 %v846_v44, %v731_v3 }
 0x14f   : > { %v984_v45 = vpop.f32.mrf.mxu1 }
 0x150   : > { %v2173_v46 = vpop.f32.mrf.mxu0  ;;  %v1007_v20 = vadd.f32 %v984_v45, %v869_v11 }
 0x152   : > { %v856_v48 = vpop.f32.mrf.mxu0 }
 0x153   : > { %v2217_v47 = vpop.f32.mrf.mxu1 }
 0x155   : > { %v994_v54 = vpop.f32.mrf.mxu1 }
 0x166   : > { %v2252_v55 = vpop.f32.mrf.mxu0 }
 0x167   : > { %v2296_v58 = vpop.f32.mrf.mxu1 }
 0x168   : > { %v1105_v59 = vpop.f32.mrf.mxu0 }
 0x169   : > { %v3063_v62 = vpop.f32.mrf.mxu1  ;;  %v1144_v25 = vadd.f32 %v1105_v59, %v1003_v14 }
 0x16a   : > { %3097 = vst [vmem:[#allocation4_spill] sm:$0xff] %v3063_v62  ;;  %v428_v62 = vadd.f32 %v427_v23, %v322_v22  ;;  %v1004_v23 = vadd.f32 %v2208_v32, %v866_v8 }
 0x16c   : > { %v2255_v63 = vpop.f32.mrf.mxu0  ;;  %v588_v56 = vadd.f32 %v557_v15, %v428_v62 }
 0x16e   : > { %v1115_v7 = vpop.f32.mrf.mxu0  ;;  %v729_v57 = vadd.f32 %v698_v18, %v588_v56  ;;  %v3101_v18 = vld [vmem:[#allocation3_spill] sm:$0xff] }
 0x16f   : > { %v3065_v2 = vpop.f32.mrf.mxu1 }
 0x170   : > { %3098 = vst [vmem:[#allocation5_spill] sm:$0xff] %v3065_v2  ;;  %v453_v2 = vadd.f32 %v2041_v5, %v1997_v4  ;;  %v1008_v4 = vadd.f32 %v2214_v43, %v870_v6  ;;  %v867_v9 = vadd.f32 %v836_v39, %v729_v57 }
 0x171   : > { %v3067_v10 = vpop.f32.mrf.mxu1 }
 0x172   : > { %3099 = vst [vmem:[#allocation6_spill] sm:$0xff] %v3067_v10  ;;  %v2258_v41 = vpop.f32.mrf.mxu0  ;;  %v589_v10 = vadd.f32 %v2079_v13, %v433_v38  ;;  %v593_v61 = vadd.f32 %v2085_v21, %v453_v2  ;;  %v871_v13 = vadd.f32 %v856_v48, %v733_v35  ;;  %v1145_v21 = vadd.f32 %v2252_v55, %v1004_v23  ;;  %v3100_v38 = vld [vmem:[#allocation2_spill] sm:$0xff]  ;;  %v3102_v55 = vld [vmem:[#allocation4_spill] sm:$0xff] }
 0x173   : > { %v1149_v24 = vadd.f32 %v2258_v41, %v1008_v4  ;;  %v1734_v41 = vld [vmem:[%s3093_s2] ss:$0 sm:$0xff]  ;;  %v1282_v59 = vadd.f32 %v3102_v55, %v1144_v25 }
 0x174   : > { %v1125_v17 = vpop.f32.mrf.mxu0  ;;  %v730_v40 = vadd.f32 %v2123_v16, %v589_v10  ;;  %v734_v22 = vadd.f32 %v2129_v26, %v593_v61  ;;  %v1005_v26 = vadd.f32 %v3101_v18, %v867_v9  ;;  %v1009_v32 = vadd.f32 %v994_v54, %v871_v13 }
 0x175   : > { %v2302_v60 = vpop.f32.mrf.mxu1  ;;  %v1148_v27 = vadd.f32 %v1125_v17, %v1007_v20 }
 0x176   : > { %v868_v5 = vadd.f32 %v2167_v33, %v730_v40  ;;  %v872_v12 = vadd.f32 %v2173_v46, %v734_v22  ;;  %v1283_v33 = vadd.f32 %v2296_v58, %v1145_v21  ;;  %v1287_v39 = vadd.f32 %v2302_v60, %v1149_v24 }
 0x177   : > { %v1263_v29 = vpop.f32.mrf.mxu1  ;;  %v1146_v44 = vadd.f32 %v1115_v7, %v1005_v26  ;;  %v3103_v50 = vld [vmem:[#allocation5_spill] sm:$0xff] }
 0x178   : > { %v2261_v34 = vpop.f32.mrf.mxu0  ;;  %v1006_v16 = vadd.f32 %v3100_v38, %v868_v5  ;;  %v1010_v30 = vadd.f32 %v2217_v47, %v872_v12  ;;  %v1286_v62 = vadd.f32 %v1263_v29, %v1148_v27 }
 0x179   : > { %v3104_v52 = vld [vmem:[#allocation6_spill] sm:$0xff] }
 0x17a   : > { %v1135_v31 = vpop.f32.mrf.mxu0  ;;  %v1147_v43 = vadd.f32 %v2255_v63, %v1006_v16  ;;  %v1151_v46 = vadd.f32 %v2261_v34, %v1010_v30  ;;  %v1284_v53 = vadd.f32 %v3104_v52, %v1146_v44 }
 0x17b   : > { %v2305_v15 = vpop.f32.mrf.mxu1  ;;  %v1150_v37 = vadd.f32 %v1135_v31, %v1009_v32 }
 0x17c   : > { %v1285_v51 = vadd.f32 %v3103_v50, %v1147_v43  ;;  %v1289_v60 = vadd.f32 %v2305_v15, %v1151_v46 }
 0x17d   : > { %v1273_v42 = vpop.f32.mrf.mxu1 }
 0x17e   : > { %v1288_v0 = vadd.f32 %v1273_v42, %v1150_v37 }
 0x18e   : > { %v2340_v45 = vpop.f32.mrf.mxu0 }
 0x18f   : > { %v2346_v48 = vpop.f32.mrf.mxu1  ;;  %v1421_v2 = vadd.f32 %v2340_v45, %v1283_v33 }
 0x190   : > { %v1425_v47 = vadd.f32 %v2346_v48, %v1287_v39  ;;  %v1381_v54 = vpop.f32.mrf.mxu0 }
 0x191   : > { %v1401_v10 = vpop.f32.mrf.mxu1  ;;  %v1436_v58 = vadd.f32 %v1734_v41, %v1421_v2  ;;  %v1420_v63 = vadd.f32 %v1381_v54, %v1282_v59 }
 0x192   : > { %v1440_v49 = vadd.f32 %v1734_v41, %v1425_v47  ;;  %v1424_v7 = vadd.f32 %v1401_v10, %v1286_v62  ;;  %v2343_v36 = vpop.f32.mrf.mxu0 }
 0x193   : > { %v2349_v56 = vpop.f32.mrf.mxu1  ;;  %v1444_v61 = vmax.f32 %v1436_v58, 0.0  ;;  %v1435_v28 = vadd.f32 %v1734_v41, %v1420_v63  ;;  %v1423_v8 = vadd.f32 %v2343_v36, %v1285_v51 }
 0x194   : > { %v1448_v1 = vmax.f32 %v1440_v49, 0.0  ;;  %v1439_v3 = vadd.f32 %v1734_v41, %v1424_v7  ;;  %v1427_v6 = vadd.f32 %v2349_v56, %v1289_v60  ;;  %v1391_v17 = vpop.f32.mrf.mxu0 }
 0x195   : > { %v1411_v29 = vpop.f32.mrf.mxu1  ;;  %1452 = vst [vmem:[%s192_s23 + $0x8] sm:$0xff] %v1444_v61  ;;  %v1443_v19 = vmax.f32 %v1435_v28, 0.0  ;;  %v1422_v40 = vadd.f32 %v1391_v17, %v1284_v53  ;;  %v1438_v22 = vadd.f32 %v1734_v41, %v1423_v8 }
 0x196   : > { %1456 = vst [vmem:[%s192_s23 + $0x28] sm:$0xff] %v1448_v1  ;;  %v1447_v11 = vmax.f32 %v1439_v3, 0.0  ;;  %v1426_v57 = vadd.f32 %v1411_v29, %v1288_v0  ;;  %v1442_v35 = vadd.f32 %v1734_v41, %v1427_v6 }
 0x197   : > { %1451 = vst [vmem:[%s192_s23] sm:$0xff] %v1443_v19  ;;  %v1437_v23 = vadd.f32 %v1734_v41, %v1422_v40  ;;  %v1446_v34 = vmax.f32 %v1438_v22, 0.0 }
 0x198   : > { %1455 = vst [vmem:[%s192_s23 + $0x20] sm:$0xff] %v1447_v11  ;;  %v1441_v4 = vadd.f32 %v1734_v41, %v1426_v57  ;;  %v1450_v5 = vmax.f32 %v1442_v35, 0.0 }
 0x199   : > { %v1445_v9 = vmax.f32 %v1437_v23, 0.0  ;;  %1454 = vst [vmem:[%s192_s23 + $0x18] sm:$0xff] %v1446_v34 }
 0x19a   : > { %v1449_v12 = vmax.f32 %v1441_v4, 0.0  ;;  %1458 = vst [vmem:[%s192_s23 + $0x38] sm:$0xff] %v1450_v5 }
 0x19b   : > { %1453 = vst [vmem:[%s192_s23 + $0x10] sm:$0xff] %v1445_v9 }
 0x19c   : > { %1457 = vst [vmem:[%s192_s23 + $0x30] sm:$0xff] %v1449_v12 }
 0x19d PF: > { %s13_s14 = sadd.s32 1, %s2429_s14   ;;  %s3105_s12 = smov %s2425_s13 }
 0x19e   : > { %p10_p5 = scmp.ge.s32.totalorder %s13_s14, 4   ;;  %s3106_s13 = smov %s3108_s15 }
 0x1a0   :  { %12 = sbr.rel (!%p10_p5) target bundleno = 2 (0x2), region = 73 }

// kernel: resnet_layer_fwd.7
= control target key start
LH: loop header
LB: loop body
LE: loop exit
PB: predicated region body
PF: predicated region fallthrough
CT: control target
= control target key end

     0   :  { %s2556_s15 = smov 0   ;;  %s2558_s16 = smov 0   ;;  %s3232_s0 = inlined_call_operand.vmem [shape: f32[2,10,10,128], index: 0, kind: input, shape index: {}]   ;;  %s3233_s1 = inlined_call_operand.vmem [shape: f32[9,128,128], index: 1, kind: input, shape index: {}]   ;;  %s3234_s2 = inlined_call_operand.vmem [shape: f32[1,128], index: 2, kind: input, shape index: {}]   ;;  %s3235_s3 = inlined_call_operand.vmem [shape: f32[2,8,8,128], index: 3, kind: input, shape index: {}]   ;;  %s3236_s4 = inlined_call_operand.vmem [shape: f32[2,8,8,128], index: 4, kind: output, shape index: {}]  }
   0x1   :  { %s2560_s17 = smov 0  }
   0x2 LB: > { %s26_s18 = sadd.s32 1, %s2525_s16  ;;  %p1651_p0 = scmp.ge.s32.totalorder %s2529_s17, 1  ;;  %s2529_s17 = sphi %s2560_s17, %s14_s17   ;;  %s2525_s16 = sphi %s2558_s16, %s3256_s16   ;;  %s2521_s15 = sphi %s2556_s15, %s3255_s15  }
   0x3   : > { %p28_p1 = scmp.ge.s32.totalorder %s26_s18, 2  ;;  %p193_p2 = scmp.lt.s32.totalorder %s2529_s17, 3 }
   0x5   : > { %s3258_s18 = smov (%p28_p1, %s26_s18), 0  ;;  %p194_p3 = pnand %p1651_p0, %p193_p2 }
   0x7   : > { %197 = sbr.rel (%p194_p3) target bundleno = 415 (0x19f), region = 36 }
   0xc   : > { %v1672_v0 = vld [vmem:[%s3233_s1 + $0xf8] sm:$0xff]  ;;  %v1671_v2 = vld [vmem:[%s3233_s1 + $0xf0] sm:$0xff]  ;;  %v1670_v4 = vld [vmem:[%s3233_s1 + $0xe8] sm:$0xff]  ;;  %p232_p4 = scmp.lt.s32.totalorder %s2521_s15, 1 }
   0xd   : > { %v283_v1 = vld [vmem:[%s3233_s1 + $0x78] sm:$0xff]  ;;  %2054 = vmatprep.subr.mxu0 %v1672_v0  ;;  %v282_v3 = vld [vmem:[%s3233_s1 + $0x70] sm:$0xff]  ;;  %v281_v5 = vld [vmem:[%s3233_s1 + $0x68] sm:$0xff] }
   0xe   : > { %2098 = vmatprep.subr.mxu1 %v283_v1  ;;  %2055 = vmatpush3.msra.mxu0 %v1672_v0  ;;  %v1669_v6 = vld [vmem:[%s3233_s1 + $0xe0] sm:$0xff]  ;;  %v1668_v8 = vld [vmem:[%s3233_s1 + $0xd8] sm:$0xff]  ;;  %v1667_v10 = vld [vmem:[%s3233_s1 + $0xd0] sm:$0xff]  ;;  %s3260_s15 = smov (!%p232_p4, %s2521_s15), 1 }
   0xf   : > { %2099 = vmatpush3.msra.mxu1 %v283_v1  ;;  %2056 = vmatprep.subr.mxu0 %v1671_v2  ;;  %v280_v7 = vld [vmem:[%s3233_s1 + $0x60] sm:$0xff]  ;;  %v279_v9 = vld [vmem:[%s3233_s1 + $0x58] sm:$0xff]  ;;  %v278_v11 = vld [vmem:[%s3233_s1 + $0x50] sm:$0xff]  ;;  %s2482_s27 = smul.u32 160, %s3260_s15 }
  0x10   : > { %2100 = vmatprep.subr.mxu1 %v282_v3  ;;  %2057 = vmatpush3.msra.mxu0 %v1671_v2  ;;  %v1666_v12 = vld [vmem:[%s3233_s1 + $0xc8] sm:$0xff]  ;;  %v1665_v14 = vld [vmem:[%s3233_s1 + $0xc0] sm:$0xff]  ;;  %v1664_v16 = vld [vmem:[%s3233_s1 + $0xb8] sm:$0xff] }
  0x11   : > { %2101 = vmatpush3.msra.mxu1 %v282_v3  ;;  %2058 = vmatprep.subr.mxu0 %v1670_v4  ;;  %v277_v13 = vld [vmem:[%s3233_s1 + $0x48] sm:$0xff]  ;;  %v276_v15 = vld [vmem:[%s3233_s1 + $0x40] sm:$0xff]  ;;  %v275_v17 = vld [vmem:[%s3233_s1 + $0x38] sm:$0xff]  ;;  %s2674_s12 = scalar_lea.vmem %s3232_s0, %s2482_s27 }
  0x12   : > { %2102 = vmatprep.subr.mxu1 %v281_v5  ;;  %2059 = vmatpush3.msra.mxu0 %v1670_v4  ;;  %v1663_v18 = vld [vmem:[%s3233_s1 + $0xb0] sm:$0xff]  ;;  %v1662_v20 = vld [vmem:[%s3233_s1 + $0xa8] sm:$0xff]  ;;  %v1661_v22 = vld [vmem:[%s3233_s1 + $0xa0] sm:$0xff] }
  0x13   : > { %2103 = vmatpush3.msra.mxu1 %v281_v5  ;;  %2060 = vmatprep.subr.mxu0 %v1669_v6  ;;  %v274_v19 = vld [vmem:[%s3233_s1 + $0x30] sm:$0xff]  ;;  %v273_v21 = vld [vmem:[%s3233_s1 + $0x28] sm:$0xff]  ;;  %v272_v23 = vld [vmem:[%s3233_s1 + $0x20] sm:$0xff] }
  0x14   : > { %2104 = vmatprep.subr.mxu1 %v280_v7  ;;  %2061 = vmatpush3.msra.mxu0 %v1669_v6  ;;  %v1660_v24 = vld [vmem:[%s3233_s1 + $0x98] sm:$0xff]  ;;  %v1659_v26 = vld [vmem:[%s3233_s1 + $0x90] sm:$0xff]  ;;  %v1658_v28 = vld [vmem:[%s3233_s1 + $0x88] sm:$0xff] }
  0x15   : > { %2105 = vmatpush3.msra.mxu1 %v280_v7  ;;  %2062 = vmatprep.subr.mxu0 %v1668_v8  ;;  %v271_v25 = vld [vmem:[%s3233_s1 + $0x18] sm:$0xff]  ;;  %v270_v27 = vld [vmem:[%s3233_s1 + $0x10] sm:$0xff]  ;;  %v269_v29 = vld [vmem:[%s3233_s1 + $0x8] sm:$0xff] }
  0x16   : > { %2106 = vmatprep.subr.mxu1 %v279_v9  ;;  %2063 = vmatpush3.msra.mxu0 %v1668_v8  ;;  %v1657_v30 = vld [vmem:[%s3233_s1 + $0x80] sm:$0xff]  ;;  %v2685_v34 = vld [vmem:[%s2674_s12 + $0x11] sm:$0xff]  ;;  %v1686_v40 = vld [vmem:[%s3233_s1 + $0x168] sm:$0xff] }
  0x17   : > { %2107 = vmatpush3.msra.mxu1 %v279_v9  ;;  %2064 = vmatprep.subr.mxu0 %v1667_v10  ;;  %v268_v31 = vld [vmem:[%s3233_s1] sm:$0xff]  ;;  %v2688_v35 = vld [vmem:[%s2674_s12 + $0x10] sm:$0xff]  ;;  %v1688_v36 = vld [vmem:[%s3233_s1 + $0x178] sm:$0xff] }
  0x18   : > { %2108 = vmatprep.subr.mxu1 %v278_v11  ;;  %2065 = vmatpush3.msra.mxu0 %v1667_v10  ;;  %v284_v32 = vld [vmem:[%s2674_s12 + $0x1] sm:$0xff]  ;;  %v1712_v37 = vld [vmem:[%s3233_s1 + $0x1f8] sm:$0xff]  ;;  %v1687_v38 = vld [vmem:[%s3233_s1 + $0x170] sm:$0xff] }
  0x19   : > { %2109 = vmatpush3.msra.mxu1 %v278_v11  ;;  %2066 = vmatprep.subr.mxu0 %v1666_v12  ;;  %v260_v33 = vld [vmem:[%s2674_s12] sm:$0xff]  ;;  %v1711_v39 = vld [vmem:[%s3233_s1 + $0x1f0] sm:$0xff]  ;;  %v1710_v41 = vld [vmem:[%s3233_s1 + $0x1e8] sm:$0xff] }
  0x1a   : > { %2110 = vmatprep.subr.mxu1 %v277_v13  ;;  %2067 = vmatpush3.msra.mxu0 %v1666_v12  ;;  %v1685_v42 = vld [vmem:[%s3233_s1 + $0x160] sm:$0xff]  ;;  %v1684_v44 = vld [vmem:[%s3233_s1 + $0x158] sm:$0xff]  ;;  %v1683_v46 = vld [vmem:[%s3233_s1 + $0x150] sm:$0xff] }
  0x1b   : > { %2111 = vmatpush3.msra.mxu1 %v277_v13  ;;  %2068 = vmatprep.subr.mxu0 %v1665_v14  ;;  %v1709_v43 = vld [vmem:[%s3233_s1 + $0x1e0] sm:$0xff]  ;;  %v1708_v45 = vld [vmem:[%s3233_s1 + $0x1d8] sm:$0xff]  ;;  %v1707_v47 = vld [vmem:[%s3233_s1 + $0x1d0] sm:$0xff] }
  0x1c   : > { %2112 = vmatprep.subr.mxu1 %v276_v15  ;;  %2069 = vmatpush3.msra.mxu0 %v1665_v14  ;;  %v1682_v48 = vld [vmem:[%s3233_s1 + $0x148] sm:$0xff]  ;;  %v1681_v50 = vld [vmem:[%s3233_s1 + $0x140] sm:$0xff]  ;;  %v1680_v52 = vld [vmem:[%s3233_s1 + $0x138] sm:$0xff] }
  0x1d   : > { %2113 = vmatpush3.msra.mxu1 %v276_v15  ;;  %2070 = vmatprep.subr.mxu0 %v1664_v16  ;;  %v1706_v49 = vld [vmem:[%s3233_s1 + $0x1c8] sm:$0xff]  ;;  %v1705_v51 = vld [vmem:[%s3233_s1 + $0x1c0] sm:$0xff]  ;;  %v1704_v53 = vld [vmem:[%s3233_s1 + $0x1b8] sm:$0xff] }
  0x1e   : > { %2114 = vmatprep.subr.mxu1 %v275_v17  ;;  %2071 = vmatpush3.msra.mxu0 %v1664_v16  ;;  %v2747_v54 = vld [vmem:[%s2674_s12 + $0x21] sm:$0xff]  ;;  %v1679_v56 = vld [vmem:[%s3233_s1 + $0x130] sm:$0xff]  ;;  %v1676_v4 = vld [vmem:[%s3233_s1 + $0x118] sm:$0xff] }
  0x1f   : > { %2115 = vmatpush3.msra.mxu1 %v275_v17  ;;  %2072 = vmatprep.subr.mxu0 %v1663_v18  ;;  %v2750_v55 = vld [vmem:[%s2674_s12 + $0x20] sm:$0xff]  ;;  %v1703_v57 = vld [vmem:[%s3233_s1 + $0x1b0] sm:$0xff]  ;;  %v1678_v60 = vld [vmem:[%s3233_s1 + $0x128] sm:$0xff] }
  0x20   : > { %2116 = vmatprep.subr.mxu1 %v274_v19  ;;  %2073 = vmatpush3.msra.mxu0 %v1663_v18  ;;  %v2759_v58 = vld [vmem:[%s2674_s12 + $0x31] sm:$0xff]  ;;  %v1702_v61 = vld [vmem:[%s3233_s1 + $0x1a8] sm:$0xff]  ;;  %v2778_v63 = vld [vmem:[%s2674_s12 + $0x40] sm:$0xff] }
  0x21   : > { %2117 = vmatpush3.msra.mxu1 %v274_v19  ;;  %2074 = vmatprep.subr.mxu0 %v1662_v20  ;;  %v2762_v59 = vld [vmem:[%s2674_s12 + $0x30] sm:$0xff]  ;;  %v2775_v62 = vld [vmem:[%s2674_s12 + $0x41] sm:$0xff]  ;;  %v1700_v5 = vld [vmem:[%s3233_s1 + $0x198] sm:$0xff] }
  0x22   : > { %2118 = vmatprep.subr.mxu1 %v273_v21  ;;  %2075 = vmatpush3.msra.mxu0 %v1662_v20  ;;  %v1677_v0 = vld [vmem:[%s3233_s1 + $0x120] sm:$0xff]  ;;  %v2787_v2 = vld [vmem:[%s2674_s12 + $0x51] sm:$0xff]  ;;  %v1674_v12 = vld [vmem:[%s3233_s1 + $0x108] sm:$0xff] }
  0x23   : > { %2119 = vmatpush3.msra.mxu1 %v273_v21  ;;  %2076 = vmatprep.subr.mxu0 %v1661_v22  ;;  %v1701_v1 = vld [vmem:[%s3233_s1 + $0x1a0] sm:$0xff]  ;;  %v2790_v3 = vld [vmem:[%s2674_s12 + $0x50] sm:$0xff]  ;;  %v1698_v13 = vld [vmem:[%s3233_s1 + $0x188] sm:$0xff] }
  0x24   : > { %2120 = vmatprep.subr.mxu1 %v272_v23  ;;  %2077 = vmatpush3.msra.mxu0 %v1661_v22  ;;  %v2803_v6 = vld [vmem:[%s2674_s12 + $0x61] sm:$0xff]  ;;  %v1675_v8 = vld [vmem:[%s3233_s1 + $0x110] sm:$0xff]  ;;  %v1736_v18 = vld [vmem:[%s3233_s1 + $0x278] sm:$0xff] }
  0x25   : > { %2121 = vmatpush3.msra.mxu1 %v272_v23  ;;  %2078 = vmatprep.subr.mxu0 %v1660_v24  ;;  %v2806_v7 = vld [vmem:[%s2674_s12 + $0x60] sm:$0xff]  ;;  %v1699_v9 = vld [vmem:[%s3233_s1 + $0x190] sm:$0xff]  ;;  %v1760_v19 = vld [vmem:[%s3233_s1 + $0x2f8] sm:$0xff] }
  0x26   : > { %2122 = vmatprep.subr.mxu1 %v271_v25  ;;  %2079 = vmatpush3.msra.mxu0 %v1660_v24  ;;  %v2815_v10 = vld [vmem:[%s2674_s12 + $0x71] sm:$0xff]  ;;  %v1673_v14 = vld [vmem:[%s3233_s1 + $0x100] sm:$0xff]  ;;  %v1734_v24 = vld [vmem:[%s3233_s1 + $0x268] sm:$0xff] }
  0x27   : > { %2123 = vmatpush3.msra.mxu1 %v271_v25  ;;  %2080 = vmatprep.subr.mxu0 %v1659_v26  ;;  %v2818_v11 = vld [vmem:[%s2674_s12 + $0x70] sm:$0xff]  ;;  %v1697_v15 = vld [vmem:[%s3233_s1 + $0x180] sm:$0xff]  ;;  %v1758_v25 = vld [vmem:[%s3233_s1 + $0x2e8] sm:$0xff] }
  0x28   : > { %2124 = vmatprep.subr.mxu1 %v270_v27  ;;  %2081 = vmatpush3.msra.mxu0 %v1659_v26  ;;  %v519_v16 = vld [vmem:[%s2674_s12 + $0x2] sm:$0xff]  ;;  %v2838_v17 = vld [vmem:[%s2674_s12 + $0x12] sm:$0xff] }
  0x29   : > { %2125 = vmatpush3.msra.mxu1 %v270_v27  ;;  %2082 = vmatprep.subr.mxu0 %v1658_v28  ;;  %v1735_v20 = vld [vmem:[%s3233_s1 + $0x270] sm:$0xff]  ;;  %v2856_v22 = vld [vmem:[%s2674_s12 + $0x22] sm:$0xff] }
  0x2a   : > { %2126 = vmatprep.subr.mxu1 %v269_v29  ;;  %2083 = vmatpush3.msra.mxu0 %v1658_v28  ;;  %v1759_v21 = vld [vmem:[%s3233_s1 + $0x2f0] sm:$0xff]  ;;  %v1733_v26 = vld [vmem:[%s3233_s1 + $0x260] sm:$0xff] }
  0x2b   : > { %2127 = vmatpush3.msra.mxu1 %v269_v29  ;;  %2084 = vmatprep.subr.mxu0 %v1657_v30  ;;  %v2859_v23 = vld [vmem:[%s2674_s12 + $0x32] sm:$0xff]  ;;  %v1757_v27 = vld [vmem:[%s3233_s1 + $0x2e0] sm:$0xff] }
  0x2c   : > { %2128 = vmatprep.subr.mxu1 %v268_v31  ;;  %2085 = vmatpush3.msra.mxu0 %v1657_v30  ;;  %v2877_v28 = vld [vmem:[%s2674_s12 + $0x42] sm:$0xff]  ;;  %v2880_v29 = vld [vmem:[%s2674_s12 + $0x52] sm:$0xff] }
  0x2d   : > { %2086 = vmatprep.mubr.f32.mxu0 %v284_v32  ;;  %2129 = vmatpush3.msra.mxu1 %v268_v31  ;;  %v1732_v30 = vld [vmem:[%s3233_s1 + $0x258] sm:$0xff]  ;;  %v1731_v32 = vld [vmem:[%s3233_s1 + $0x250] sm:$0xff] }
  0x2e   : > { %2130 = vmatprep.mubr.f32.mxu1 %v260_v33  ;;  %2087 = vmatmul.mubr.f32.vlgmr.msra.gmra.mxu0 %v2685_v34  ;;  %v1756_v31 = vld [vmem:[%s3233_s1 + $0x2d8] sm:$0xff]  ;;  %v1755_v33 = vld [vmem:[%s3233_s1 + $0x2d0] sm:$0xff] }
  0x2f   : > { %2131 = vmatmul.mubr.f32.vlgmr.msra.gmra.mxu1 %v2688_v35  ;;  %2142 = vmatprep.subr.mxu0 %v1688_v36 }
  0x30   : > { %2186 = vmatprep.subr.mxu1 %v1712_v37  ;;  %2143 = vmatpush3.msra.mxu0 %v1688_v36  ;;  %v2902_v36 = vld [vmem:[%s2674_s12 + $0x72] sm:$0xff] }
  0x31   : > { %2187 = vmatpush3.msra.mxu1 %v1712_v37  ;;  %2144 = vmatprep.subr.mxu0 %v1687_v38  ;;  %v1730_v37 = vld [vmem:[%s3233_s1 + $0x248] sm:$0xff] }
  0x32   : > { %2188 = vmatprep.subr.mxu1 %v1711_v39  ;;  %2145 = vmatpush3.msra.mxu0 %v1687_v38  ;;  %v1754_v38 = vld [vmem:[%s3233_s1 + $0x2c8] sm:$0xff] }
  0x33   : > { %2189 = vmatpush3.msra.mxu1 %v1711_v39  ;;  %2146 = vmatprep.subr.mxu0 %v1686_v40  ;;  %v1729_v39 = vld [vmem:[%s3233_s1 + $0x240] sm:$0xff] }
  0x34   : > { %2190 = vmatprep.subr.mxu1 %v1710_v41  ;;  %2147 = vmatpush3.msra.mxu0 %v1686_v40  ;;  %v2917_v40 = vld [vmem:[%s2674_s12 + $0x80] sm:$0xff] }
  0x35   : > { %2191 = vmatpush3.msra.mxu1 %v1710_v41  ;;  %2148 = vmatprep.subr.mxu0 %v1685_v42  ;;  %v1753_v41 = vld [vmem:[%s3233_s1 + $0x2c0] sm:$0xff] }
  0x36   : > { %2192 = vmatprep.subr.mxu1 %v1709_v43  ;;  %2149 = vmatpush3.msra.mxu0 %v1685_v42  ;;  %v1728_v42 = vld [vmem:[%s3233_s1 + $0x238] sm:$0xff] }
  0x37   : > { %2193 = vmatpush3.msra.mxu1 %v1709_v43  ;;  %2150 = vmatprep.subr.mxu0 %v1684_v44  ;;  %v1752_v43 = vld [vmem:[%s3233_s1 + $0x2b8] sm:$0xff] }
  0x38   : > { %2194 = vmatprep.subr.mxu1 %v1708_v45  ;;  %2151 = vmatpush3.msra.mxu0 %v1684_v44  ;;  %v1727_v44 = vld [vmem:[%s3233_s1 + $0x230] sm:$0xff] }
  0x39   : > { %2195 = vmatpush3.msra.mxu1 %v1708_v45  ;;  %2152 = vmatprep.subr.mxu0 %v1683_v46  ;;  %v1751_v45 = vld [vmem:[%s3233_s1 + $0x2b0] sm:$0xff] }
  0x3a   : > { %2196 = vmatprep.subr.mxu1 %v1707_v47  ;;  %2153 = vmatpush3.msra.mxu0 %v1683_v46  ;;  %v1726_v46 = vld [vmem:[%s3233_s1 + $0x228] sm:$0xff] }
  0x3b   : > { %2197 = vmatpush3.msra.mxu1 %v1707_v47  ;;  %2154 = vmatprep.subr.mxu0 %v1682_v48  ;;  %v1750_v47 = vld [vmem:[%s3233_s1 + $0x2a8] sm:$0xff] }
  0x3c   : > { %2198 = vmatprep.subr.mxu1 %v1706_v49  ;;  %2155 = vmatpush3.msra.mxu0 %v1682_v48  ;;  %v1725_v48 = vld [vmem:[%s3233_s1 + $0x220] sm:$0xff] }
  0x3d   : > { %2199 = vmatpush3.msra.mxu1 %v1706_v49  ;;  %2156 = vmatprep.subr.mxu0 %v1681_v50  ;;  %v1749_v49 = vld [vmem:[%s3233_s1 + $0x2a0] sm:$0xff] }
  0x3e   : > { %2200 = vmatprep.subr.mxu1 %v1705_v51  ;;  %2157 = vmatpush3.msra.mxu0 %v1681_v50  ;;  %v1724_v50 = vld [vmem:[%s3233_s1 + $0x218] sm:$0xff] }
  0x3f   : > { %2201 = vmatpush3.msra.mxu1 %v1705_v51  ;;  %2158 = vmatprep.subr.mxu0 %v1680_v52  ;;  %v1748_v51 = vld [vmem:[%s3233_s1 + $0x298] sm:$0xff] }
  0x40   : > { %2202 = vmatprep.subr.mxu1 %v1704_v53  ;;  %2159 = vmatpush3.msra.mxu0 %v1680_v52  ;;  %v1723_v52 = vld [vmem:[%s3233_s1 + $0x210] sm:$0xff] }
  0x41   : > { %2203 = vmatpush3.msra.mxu1 %v1704_v53  ;;  %2089 = vmatprep.mubr.f32.mxu0 %v2747_v54  ;;  %v1747_v53 = vld [vmem:[%s3233_s1 + $0x290] sm:$0xff] }
  0x42   : > { %2133 = vmatprep.mubr.f32.mxu1 %v2750_v55  ;;  %2160 = vmatprep.subr.mxu0 %v1679_v56 }
  0x43   : > { %2204 = vmatprep.subr.mxu1 %v1703_v57  ;;  %2090 = vmatmul.mubr.f32.gmra.mxu0 %v2759_v58 }
  0x44   : > { %2134 = vmatmul.mubr.f32.gmra.mxu1 %v2762_v59  ;;  %2161 = vmatpush3.msra.mxu0 %v1679_v56  ;;  %v1722_v56 = vld [vmem:[%s3233_s1 + $0x208] sm:$0xff] }
  0x45   : > { %2205 = vmatpush3.msra.mxu1 %v1703_v57  ;;  %2162 = vmatprep.subr.mxu0 %v1678_v60  ;;  %v1746_v57 = vld [vmem:[%s3233_s1 + $0x288] sm:$0xff] }
  0x46   : > { %2206 = vmatprep.subr.mxu1 %v1702_v61  ;;  %2163 = vmatpush3.msra.mxu0 %v1678_v60  ;;  %v1721_v60 = vld [vmem:[%s3233_s1 + $0x200] sm:$0xff] }
  0x47   : > { %2207 = vmatpush3.msra.mxu1 %v1702_v61  ;;  %2092 = vmatprep.mubr.f32.mxu0 %v2775_v62  ;;  %v1745_v61 = vld [vmem:[%s3233_s1 + $0x280] sm:$0xff] }
  0x48   : > { %2136 = vmatprep.mubr.f32.mxu1 %v2778_v63  ;;  %2164 = vmatprep.subr.mxu0 %v1677_v0 }
  0x49   : > { %2208 = vmatprep.subr.mxu1 %v1701_v1  ;;  %2093 = vmatmul.mubr.f32.gmra.mxu0 %v2787_v2 }
  0x4a   : > { %2137 = vmatmul.mubr.f32.gmra.mxu1 %v2790_v3  ;;  %2165 = vmatpush3.msra.mxu0 %v1677_v0  ;;  %v1784_v0 = vld [vmem:[%s3233_s1 + $0x378] sm:$0xff] }
  0x4b   : > { %2209 = vmatpush3.msra.mxu1 %v1701_v1  ;;  %2166 = vmatprep.subr.mxu0 %v1676_v4  ;;  %v1808_v1 = vld [vmem:[%s3233_s1 + $0x3f8] sm:$0xff] }
  0x4c   : > { %2210 = vmatprep.subr.mxu1 %v1700_v5  ;;  %2167 = vmatpush3.msra.mxu0 %v1676_v4  ;;  %v1783_v4 = vld [vmem:[%s3233_s1 + $0x370] sm:$0xff] }
  0x4d   : > { %2211 = vmatpush3.msra.mxu1 %v1700_v5  ;;  %2095 = vmatprep.mubr.f32.mxu0 %v2803_v6  ;;  %v1782_v5 = vld [vmem:[%s3233_s1 + $0x368] sm:$0xff] }
  0x4e   : > { %2139 = vmatprep.mubr.f32.mxu1 %v2806_v7  ;;  %2168 = vmatprep.subr.mxu0 %v1675_v8 }
  0x4f   : > { %2212 = vmatprep.subr.mxu1 %v1699_v9  ;;  %2096 = vmatmul.mubr.f32.gmra.mxu0 %v2815_v10 }
  0x50   : > { %2140 = vmatmul.mubr.f32.gmra.mxu1 %v2818_v11  ;;  %2169 = vmatpush3.msra.mxu0 %v1675_v8  ;;  %v1806_v8 = vld [vmem:[%s3233_s1 + $0x3e8] sm:$0xff] }
  0x51   : > { %2213 = vmatpush3.msra.mxu1 %v1699_v9  ;;  %2170 = vmatprep.subr.mxu0 %v1674_v12  ;;  %v1781_v9 = vld [vmem:[%s3233_s1 + $0x360] sm:$0xff] }
  0x52   : > { %2214 = vmatprep.subr.mxu1 %v1698_v13  ;;  %2171 = vmatpush3.msra.mxu0 %v1674_v12  ;;  %v1805_v12 = vld [vmem:[%s3233_s1 + $0x3e0] sm:$0xff] }
  0x53   : > { %2215 = vmatpush3.msra.mxu1 %v1698_v13  ;;  %2172 = vmatprep.subr.mxu0 %v1673_v14  ;;  %v1780_v13 = vld [vmem:[%s3233_s1 + $0x358] sm:$0xff] }
  0x54   : > { %2216 = vmatprep.subr.mxu1 %v1697_v15  ;;  %2173 = vmatpush3.msra.mxu0 %v1673_v14  ;;  %v1804_v14 = vld [vmem:[%s3233_s1 + $0x3d8] sm:$0xff] }
  0x55   : > { %2174 = vmatprep.mubr.f32.mxu0 %v519_v16  ;;  %2217 = vmatpush3.msra.mxu1 %v1697_v15  ;;  %v1779_v15 = vld [vmem:[%s3233_s1 + $0x350] sm:$0xff] }
  0x56   : > { %2218 = vmatprep.mubr.f32.mxu1 %v2688_v35  ;;  %2175 = vmatmul.mubr.f32.vlgmr.msra.gmra.mxu0 %v2838_v17  ;;  %v2899_v35 = vld [vmem:[%s2674_s12 + $0x62] sm:$0xff]  ;;  %v1803_v16 = vld [vmem:[%s3233_s1 + $0x3d0] sm:$0xff] }
  0x57   : > { %2219 = vmatmul.mubr.f32.vlgmr.msra.gmra.mxu1 %v2750_v55  ;;  %2230 = vmatprep.subr.mxu0 %v1736_v18 }
  0x58   : > { %2274 = vmatprep.subr.mxu1 %v1760_v19  ;;  %2231 = vmatpush3.msra.mxu0 %v1736_v18  ;;  %v1778_v18 = vld [vmem:[%s3233_s1 + $0x348] sm:$0xff] }
  0x59   : > { %2275 = vmatpush3.msra.mxu1 %v1760_v19  ;;  %2232 = vmatprep.subr.mxu0 %v1735_v20  ;;  %v1802_v19 = vld [vmem:[%s3233_s1 + $0x3c8] sm:$0xff] }
  0x5a   : > { %2276 = vmatprep.subr.mxu1 %v1759_v21  ;;  %2177 = vmatprep.mubr.f32.mxu0 %v2856_v22 }
  0x5b   : > { %2233 = vmatpush3.msra.mxu0 %v1735_v20  ;;  %2277 = vmatpush3.msra.mxu1 %v1759_v21  ;;  %v1777_v20 = vld [vmem:[%s3233_s1 + $0x340] sm:$0xff] }
  0x5c   : > { %2178 = vmatmul.mubr.f32.gmra.mxu0 %v2859_v23  ;;  %2234 = vmatprep.subr.mxu0 %v1734_v24  ;;  %v3035_v21 = vld [vmem:[%s2674_s12 + $0x82] sm:$0xff] }
  0x5d   : > { %2278 = vmatprep.subr.mxu1 %v1758_v25  ;;  %2221 = vmatprep.mubr.f32.mxu1 %v2762_v59 }
  0x5e   : > { %2235 = vmatpush3.msra.mxu0 %v1734_v24  ;;  %2279 = vmatpush3.msra.mxu1 %v1758_v25  ;;  %v1801_v24 = vld [vmem:[%s3233_s1 + $0x3c0] sm:$0xff]  ;;  %v1776_v25 = vld [vmem:[%s3233_s1 + $0x338] sm:$0xff] }
  0x5f   : > { %2236 = vmatprep.subr.mxu0 %v1733_v26  ;;  %2222 = vmatmul.mubr.f32.gmra.mxu1 %v2778_v63 }
  0x60   : > { %2280 = vmatprep.subr.mxu1 %v1757_v27  ;;  %2180 = vmatprep.mubr.f32.mxu0 %v2877_v28 }
  0x61   : > { %2237 = vmatpush3.msra.mxu0 %v1733_v26  ;;  %2281 = vmatpush3.msra.mxu1 %v1757_v27  ;;  %v1800_v26 = vld [vmem:[%s3233_s1 + $0x3b8] sm:$0xff]  ;;  %v1775_v27 = vld [vmem:[%s3233_s1 + $0x330] sm:$0xff] }
  0x62   : > { %2181 = vmatmul.mubr.f32.gmra.mxu0 %v2880_v29  ;;  %2238 = vmatprep.subr.mxu0 %v1732_v30 }
  0x63   : > { %2282 = vmatprep.subr.mxu1 %v1756_v31  ;;  %2224 = vmatprep.mubr.f32.mxu1 %v2790_v3 }
  0x64   : > { %2239 = vmatpush3.msra.mxu0 %v1732_v30  ;;  %2283 = vmatpush3.msra.mxu1 %v1756_v31  ;;  %v1799_v30 = vld [vmem:[%s3233_s1 + $0x3b0] sm:$0xff]  ;;  %v1774_v31 = vld [vmem:[%s3233_s1 + $0x328] sm:$0xff] }
  0x65   : > { %2240 = vmatprep.subr.mxu0 %v1731_v32  ;;  %2225 = vmatmul.mubr.f32.gmra.mxu1 %v2806_v7 }
  0x66   : > { %2284 = vmatprep.subr.mxu1 %v1755_v33  ;;  %2183 = vmatprep.mubr.f32.mxu0 %v2899_v35 }
  0x67   : > { %2241 = vmatpush3.msra.mxu0 %v1731_v32  ;;  %2285 = vmatpush3.msra.mxu1 %v1755_v33  ;;  %v1798_v32 = vld [vmem:[%s3233_s1 + $0x3a8] sm:$0xff]  ;;  %v1773_v33 = vld [vmem:[%s3233_s1 + $0x320] sm:$0xff] }
  0x68   : > { %2184 = vmatmul.mubr.f32.gmra.mxu0 %v2902_v36  ;;  %2242 = vmatprep.subr.mxu0 %v1730_v37 }
  0x69   : > { %2286 = vmatprep.subr.mxu1 %v1754_v38  ;;  %2227 = vmatprep.mubr.f32.mxu1 %v2818_v11 }
  0x6a   : > { %2243 = vmatpush3.msra.mxu0 %v1730_v37  ;;  %2287 = vmatpush3.msra.mxu1 %v1754_v38  ;;  %v1797_v37 = vld [vmem:[%s3233_s1 + $0x3a0] sm:$0xff]  ;;  %v1772_v38 = vld [vmem:[%s3233_s1 + $0x318] sm:$0xff] }
  0x6b   : > { %2244 = vmatprep.subr.mxu0 %v1729_v39  ;;  %2228 = vmatmul.mubr.f32.gmra.mxu1 %v2917_v40 }
  0x6c   : > { %2288 = vmatprep.subr.mxu1 %v1753_v41  ;;  %2245 = vmatpush3.msra.mxu0 %v1729_v39  ;;  %v1796_v39 = vld [vmem:[%s3233_s1 + $0x398] sm:$0xff] }
  0x6d   : > { %2289 = vmatpush3.msra.mxu1 %v1753_v41  ;;  %2246 = vmatprep.subr.mxu0 %v1728_v42  ;;  %v1771_v41 = vld [vmem:[%s3233_s1 + $0x310] sm:$0xff] }
  0x6e   : > { %2290 = vmatprep.subr.mxu1 %v1752_v43  ;;  %2247 = vmatpush3.msra.mxu0 %v1728_v42  ;;  %v1795_v42 = vld [vmem:[%s3233_s1 + $0x390] sm:$0xff] }
  0x6f   : > { %2291 = vmatpush3.msra.mxu1 %v1752_v43  ;;  %2248 = vmatprep.subr.mxu0 %v1727_v44  ;;  %v1770_v43 = vld [vmem:[%s3233_s1 + $0x308] sm:$0xff] }
  0x70   : > { %2292 = vmatprep.subr.mxu1 %v1751_v45  ;;  %2249 = vmatpush3.msra.mxu0 %v1727_v44  ;;  %v1794_v44 = vld [vmem:[%s3233_s1 + $0x388] sm:$0xff] }
  0x71   : > { %2293 = vmatpush3.msra.mxu1 %v1751_v45  ;;  %2250 = vmatprep.subr.mxu0 %v1726_v46  ;;  %v1769_v45 = vld [vmem:[%s3233_s1 + $0x300] sm:$0xff] }
  0x72   : > { %2294 = vmatprep.subr.mxu1 %v1750_v47  ;;  %2251 = vmatpush3.msra.mxu0 %v1726_v46  ;;  %v1793_v46 = vld [vmem:[%s3233_s1 + $0x380] sm:$0xff] }
  0x73   : > { %2295 = vmatpush3.msra.mxu1 %v1750_v47  ;;  %2252 = vmatprep.subr.mxu0 %v1725_v48  ;;  %v1832_v47 = vld [vmem:[%s3233_s1 + $0x478] sm:$0xff] }
  0x74   : > { %2296 = vmatprep.subr.mxu1 %v1749_v49  ;;  %2253 = vmatpush3.msra.mxu0 %v1725_v48  ;;  %v1831_v48 = vld [vmem:[%s3233_s1 + $0x470] sm:$0xff] }
  0x75   : > { %2297 = vmatpush3.msra.mxu1 %v1749_v49  ;;  %2254 = vmatprep.subr.mxu0 %v1724_v50  ;;  %v1819_v49 = vld [vmem:[%s3233_s1 + $0x410] sm:$0xff] }
  0x76   : > { %2298 = vmatprep.subr.mxu1 %v1748_v51  ;;  %2255 = vmatpush3.msra.mxu0 %v1724_v50  ;;  %v1818_v50 = vld [vmem:[%s3233_s1 + $0x408] sm:$0xff] }
  0x77   : > { %2299 = vmatpush3.msra.mxu1 %v1748_v51  ;;  %2256 = vmatprep.subr.mxu0 %v1723_v52  ;;  %v1817_v51 = vld [vmem:[%s3233_s1 + $0x400] sm:$0xff] }
  0x78   : > { %2300 = vmatprep.subr.mxu1 %v1747_v53  ;;  %2257 = vmatpush3.msra.mxu0 %v1723_v52  ;;  %v1816_v52 = vld [vmem:[%s2674_s12 + $0x92] sm:$0xff] }
  0x79   : > { %2301 = vmatpush3.msra.mxu1 %v1747_v53  ;;  %2258 = vmatprep.subr.mxu0 %v1722_v56 }
  0x7a   : > { %2302 = vmatprep.subr.mxu1 %v1746_v57  ;;  %2259 = vmatpush3.msra.mxu0 %v1722_v56 }
  0x7b   : > { %2303 = vmatpush3.msra.mxu1 %v1746_v57  ;;  %2260 = vmatprep.subr.mxu0 %v1721_v60 }
  0x7c   : > { %2304 = vmatprep.subr.mxu1 %v1745_v61  ;;  %2261 = vmatpush3.msra.mxu0 %v1721_v60 }
  0x7d   : > { %2262 = vmatprep.mubr.f32.mxu0 %v2685_v34  ;;  %2305 = vmatpush3.msra.mxu1 %v1745_v61  ;;  %v1807_v34 = vld [vmem:[%s3233_s1 + $0x3f0] sm:$0xff] }
  0x7e   : > { %2306 = vmatprep.mubr.f32.mxu1 %v2838_v17  ;;  %2263 = vmatmul.mubr.f32.vlgmr.msra.gmra.mxu0 %v2747_v54  ;;  %v3020_v17 = vld [vmem:[%s2674_s12 + $0x81] sm:$0xff] }
  0x7f   : > { %2307 = vmatmul.mubr.f32.vlgmr.msra.gmra.mxu1 %v2856_v22  ;;  %2318 = vmatprep.subr.mxu0 %v1784_v0 }
  0x80   : > { %2362 = vmatprep.subr.mxu1 %v1808_v1  ;;  %2319 = vmatpush3.msra.mxu0 %v1784_v0 }
  0x81   : > { %2363 = vmatpush3.msra.mxu1 %v1808_v1  ;;  %2320 = vmatprep.subr.mxu0 %v1783_v4 }
  0x82   : > { %2364 = vmatprep.subr.mxu1 %v1807_v34  ;;  %2265 = vmatprep.mubr.f32.mxu0 %v2759_v58 }
  0x83   : > { %2321 = vmatpush3.msra.mxu0 %v1783_v4  ;;  %2365 = vmatpush3.msra.mxu1 %v1807_v34 }
  0x84   : > { %2266 = vmatmul.mubr.f32.gmra.mxu0 %v2775_v62  ;;  %2322 = vmatprep.subr.mxu0 %v1782_v5 }
  0x85   : > { %2366 = vmatprep.subr.mxu1 %v1806_v8  ;;  %2309 = vmatprep.mubr.f32.mxu1 %v2859_v23 }
  0x86   : > { %2323 = vmatpush3.msra.mxu0 %v1782_v5  ;;  %2367 = vmatpush3.msra.mxu1 %v1806_v8 }
  0x87   : > { %2324 = vmatprep.subr.mxu0 %v1781_v9  ;;  %2310 = vmatmul.mubr.f32.gmra.mxu1 %v2877_v28 }
  0x88   : > { %2368 = vmatprep.subr.mxu1 %v1805_v12  ;;  %2268 = vmatprep.mubr.f32.mxu0 %v2787_v2 }
  0x89   : > { %2325 = vmatpush3.msra.mxu0 %v1781_v9  ;;  %2369 = vmatpush3.msra.mxu1 %v1805_v12 }
  0x8a   : > { %2269 = vmatmul.mubr.f32.gmra.mxu0 %v2803_v6  ;;  %2326 = vmatprep.subr.mxu0 %v1780_v13 }
  0x8b   : > { %2370 = vmatprep.subr.mxu1 %v1804_v14  ;;  %2312 = vmatprep.mubr.f32.mxu1 %v2880_v29 }
  0x8c   : > { %2327 = vmatpush3.msra.mxu0 %v1780_v13  ;;  %2371 = vmatpush3.msra.mxu1 %v1804_v14 }
  0x8d   : > { %2328 = vmatprep.subr.mxu0 %v1779_v15  ;;  %2313 = vmatmul.mubr.f32.gmra.mxu1 %v2899_v35 }
  0x8e   : > { %2372 = vmatprep.subr.mxu1 %v1803_v16  ;;  %2271 = vmatprep.mubr.f32.mxu0 %v2815_v10 }
  0x8f   : > { %2329 = vmatpush3.msra.mxu0 %v1779_v15  ;;  %2373 = vmatpush3.msra.mxu1 %v1803_v16 }
  0x90   : > { %2272 = vmatmul.mubr.f32.gmra.mxu0 %v3020_v17  ;;  %2330 = vmatprep.subr.mxu0 %v1778_v18 }
  0x91   : > { %2374 = vmatprep.subr.mxu1 %v1802_v19  ;;  %2315 = vmatprep.mubr.f32.mxu1 %v2902_v36 }
  0x92   : > { %2331 = vmatpush3.msra.mxu0 %v1778_v18  ;;  %2375 = vmatpush3.msra.mxu1 %v1802_v19 }
  0x93   : > { %2332 = vmatprep.subr.mxu0 %v1777_v20  ;;  %2316 = vmatmul.mubr.f32.gmra.mxu1 %v3035_v21 }
  0x94   : > { %2376 = vmatprep.subr.mxu1 %v1801_v24  ;;  %2333 = vmatpush3.msra.mxu0 %v1777_v20 }
  0x95   : > { %2377 = vmatpush3.msra.mxu1 %v1801_v24  ;;  %2334 = vmatprep.subr.mxu0 %v1776_v25 }
  0x96   : > { %2378 = vmatprep.subr.mxu1 %v1800_v26  ;;  %2335 = vmatpush3.msra.mxu0 %v1776_v25 }
  0x97   : > { %2379 = vmatpush3.msra.mxu1 %v1800_v26  ;;  %2336 = vmatprep.subr.mxu0 %v1775_v27 }
  0x98   : > { %2380 = vmatprep.subr.mxu1 %v1799_v30  ;;  %2337 = vmatpush3.msra.mxu0 %v1775_v27 }
  0x99   : > { %2381 = vmatpush3.msra.mxu1 %v1799_v30  ;;  %2338 = vmatprep.subr.mxu0 %v1774_v31 }
  0x9a   : > { %2382 = vmatprep.subr.mxu1 %v1798_v32  ;;  %2339 = vmatpush3.msra.mxu0 %v1774_v31 }
  0x9b   : > { %2383 = vmatpush3.msra.mxu1 %v1798_v32  ;;  %2340 = vmatprep.subr.mxu0 %v1773_v33 }
  0x9c   : > { %2384 = vmatprep.subr.mxu1 %v1797_v37  ;;  %2341 = vmatpush3.msra.mxu0 %v1773_v33 }
  0x9d   : > { %2385 = vmatpush3.msra.mxu1 %v1797_v37  ;;  %2342 = vmatprep.subr.mxu0 %v1772_v38 }
  0x9e   : > { %2386 = vmatprep.subr.mxu1 %v1796_v39  ;;  %2343 = vmatpush3.msra.mxu0 %v1772_v38 }
  0x9f   : > { %2387 = vmatpush3.msra.mxu1 %v1796_v39  ;;  %2344 = vmatprep.subr.mxu0 %v1771_v41 }
  0xa0   : > { %2388 = vmatprep.subr.mxu1 %v1795_v42  ;;  %2345 = vmatpush3.msra.mxu0 %v1771_v41 }
  0xa1   : > { %2389 = vmatpush3.msra.mxu1 %v1795_v42  ;;  %2346 = vmatprep.subr.mxu0 %v1770_v43 }
  0xa2   : > { %2390 = vmatprep.subr.mxu1 %v1794_v44  ;;  %2347 = vmatpush3.msra.mxu0 %v1770_v43 }
  0xa3   : > { %2391 = vmatpush3.msra.mxu1 %v1794_v44  ;;  %2348 = vmatprep.subr.mxu0 %v1769_v45 }
  0xa4   : > { %2392 = vmatprep.subr.mxu1 %v1793_v46  ;;  %2349 = vmatpush3.msra.mxu0 %v1769_v45 }
  0xa5   : > { %2350 = vmatprep.mubr.f32.mxu0 %v2750_v55  ;;  %2393 = vmatpush3.msra.mxu1 %v1793_v46  ;;  %v1830_v55 = vld [vmem:[%s3233_s1 + $0x468] sm:$0xff] }
  0xa6   : > { %2394 = vmatprep.mubr.f32.mxu1 %v2747_v54  ;;  %2351 = vmatmul.mubr.f32.vlgmr.msra.gmra.mxu0 %v2762_v59  ;;  %v1829_v54 = vld [vmem:[%s3233_s1 + $0x460] sm:$0xff]  ;;  %v1827_v59 = vld [vmem:[%s3233_s1 + $0x450] sm:$0xff] }
  0xa7   : > { %2395 = vmatmul.mubr.f32.vlgmr.msra.gmra.mxu1 %v2759_v58  ;;  %2406 = vmatprep.subr.mxu0 %v1832_v47  ;;  %v1828_v58 = vld [vmem:[%s3233_s1 + $0x458] sm:$0xff] }
  0xa8   : > { %2450 = vmatprep.subr.mxu1 %v1832_v47  ;;  %2407 = vmatpush3.msra.mxu0 %v1832_v47 }
  0xa9   : > { %2466 = vmatpush3.msra.mxu1 %v1832_v47  ;;  %2408 = vmatprep.subr.mxu0 %v1831_v48 }
  0xaa   : > { %2451 = vmatprep.subr.mxu1 %v1831_v48  ;;  %2353 = vmatprep.mubr.f32.mxu0 %v2778_v63  ;;  %v1826_v63 = vld [vmem:[%s3233_s1 + $0x448] sm:$0xff] }
  0xab   : > { %2409 = vmatpush3.msra.mxu0 %v1831_v48  ;;  %2467 = vmatpush3.msra.mxu1 %v1831_v48 }
  0xac   : > { %2354 = vmatmul.mubr.f32.gmra.mxu0 %v2790_v3  ;;  %2410 = vmatprep.subr.mxu0 %v1830_v55  ;;  %v1792_v3 = vld [vmem:[%s2674_s12 + $0x91] sm:$0xff] }
  0xad   : > { %2452 = vmatprep.subr.mxu1 %v1830_v55  ;;  %2397 = vmatprep.mubr.f32.mxu1 %v2775_v62  ;;  %v1768_v62 = vld [vmem:[%s2674_s12 + $0x90] sm:$0xff]  ;;  %s1836_s12 = sshll.u32 %s3260_s15, 6 }
  0xae   : > { %2411 = vmatpush3.msra.mxu0 %v1830_v55  ;;  %2468 = vmatpush3.msra.mxu1 %v1830_v55  ;;  %s3188_s11 = scalar_lea.vmem %s3235_s3, %s1836_s12  ;;  %s3211_s21 = scalar_lea.vmem %s3236_s4, %s1836_s12 }
  0xaf   : > { %2412 = vmatprep.subr.mxu0 %v1829_v54  ;;  %2398 = vmatmul.mubr.f32.gmra.mxu1 %v2787_v2  ;;  %v1825_v2 = vld [vmem:[%s3233_s1 + $0x440] sm:$0xff] }
  0xb0   : > { %2453 = vmatprep.subr.mxu1 %v1829_v54  ;;  %2356 = vmatprep.mubr.f32.mxu0 %v2806_v7  ;;  %v1823_v7 = vld [vmem:[%s3233_s1 + $0x430] sm:$0xff] }
  0xb1   : > { %2413 = vmatpush3.msra.mxu0 %v1829_v54  ;;  %2469 = vmatpush3.msra.mxu1 %v1829_v54 }
  0xb2   : > { %2357 = vmatmul.mubr.f32.gmra.mxu0 %v2818_v11  ;;  %2414 = vmatprep.subr.mxu0 %v1828_v58  ;;  %v1821_v11 = vld [vmem:[%s3233_s1 + $0x420] sm:$0xff] }
  0xb3   : > { %2454 = vmatprep.subr.mxu1 %v1828_v58  ;;  %2400 = vmatprep.mubr.f32.mxu1 %v2803_v6  ;;  %v1824_v6 = vld [vmem:[%s3233_s1 + $0x438] sm:$0xff] }
  0xb4   : > { %2415 = vmatpush3.msra.mxu0 %v1828_v58  ;;  %2470 = vmatpush3.msra.mxu1 %v1828_v58 }
  0xb5   : > { %2416 = vmatprep.subr.mxu0 %v1827_v59  ;;  %2401 = vmatmul.mubr.f32.gmra.mxu1 %v2815_v10  ;;  %v1822_v10 = vld [vmem:[%s3233_s1 + $0x428] sm:$0xff] }
  0xb6   : > { %2455 = vmatprep.subr.mxu1 %v1827_v59  ;;  %2359 = vmatprep.mubr.f32.mxu0 %v2917_v40  ;;  %v1820_v40 = vld [vmem:[%s3233_s1 + $0x418] sm:$0xff] }
  0xb7   : > { %2417 = vmatpush3.msra.mxu0 %v1827_v59  ;;  %2471 = vmatpush3.msra.mxu1 %v1827_v59 }
  0xb8   : > { %2360 = vmatmul.mubr.f32.gmra.mxu0 %v1768_v62  ;;  %2418 = vmatprep.subr.mxu0 %v1826_v63 }
  0xb9   : > { %2456 = vmatprep.subr.mxu1 %v1826_v63  ;;  %2403 = vmatprep.mubr.f32.mxu1 %v3020_v17 }
  0xba   : > { %2419 = vmatpush3.msra.mxu0 %v1826_v63  ;;  %2472 = vmatpush3.msra.mxu1 %v1826_v63 }
  0xbb   : > { %2420 = vmatprep.subr.mxu0 %v1825_v2  ;;  %2404 = vmatmul.mubr.f32.gmra.mxu1 %v1792_v3 }
  0xbc   : > { %2457 = vmatprep.subr.mxu1 %v1825_v2  ;;  %2421 = vmatpush3.msra.mxu0 %v1825_v2 }
  0xbd   : > { %2473 = vmatpush3.msra.mxu1 %v1825_v2  ;;  %2422 = vmatprep.subr.mxu0 %v1824_v6 }
  0xbe   : > { %2458 = vmatprep.subr.mxu1 %v1824_v6  ;;  %2423 = vmatpush3.msra.mxu0 %v1824_v6 }
  0xbf   : > { %2474 = vmatpush3.msra.mxu1 %v1824_v6  ;;  %2424 = vmatprep.subr.mxu0 %v1823_v7 }
  0xc0   : > { %2459 = vmatprep.subr.mxu1 %v1823_v7  ;;  %2425 = vmatpush3.msra.mxu0 %v1823_v7 }
  0xc1   : > { %2475 = vmatpush3.msra.mxu1 %v1823_v7  ;;  %2426 = vmatprep.subr.mxu0 %v1822_v10 }
  0xc2   : > { %2460 = vmatprep.subr.mxu1 %v1822_v10  ;;  %2427 = vmatpush3.msra.mxu0 %v1822_v10 }
  0xc3   : > { %2476 = vmatpush3.msra.mxu1 %v1822_v10  ;;  %2428 = vmatprep.subr.mxu0 %v1821_v11 }
  0xc4   : > { %2461 = vmatprep.subr.mxu1 %v1821_v11  ;;  %2429 = vmatpush3.msra.mxu0 %v1821_v11 }
  0xc5   : > { %2477 = vmatpush3.msra.mxu1 %v1821_v11  ;;  %2430 = vmatprep.subr.mxu0 %v1820_v40 }
  0xc6   : > { %2462 = vmatprep.subr.mxu1 %v1820_v40  ;;  %2431 = vmatpush3.msra.mxu0 %v1820_v40 }
  0xc7   : > { %2478 = vmatpush3.msra.mxu1 %v1820_v40  ;;  %2432 = vmatprep.subr.mxu0 %v1819_v49 }
  0xc8   : > { %2463 = vmatprep.subr.mxu1 %v1819_v49  ;;  %2433 = vmatpush3.msra.mxu0 %v1819_v49 }
  0xc9   : > { %2479 = vmatpush3.msra.mxu1 %v1819_v49  ;;  %2434 = vmatprep.subr.mxu0 %v1818_v50 }
  0xca   : > { %2464 = vmatprep.subr.mxu1 %v1818_v50  ;;  %2435 = vmatpush3.msra.mxu0 %v1818_v50 }
  0xcb   : > { %2480 = vmatpush3.msra.mxu1 %v1818_v50  ;;  %2436 = vmatprep.subr.mxu0 %v1817_v51 }
  0xcc   : > { %2465 = vmatprep.subr.mxu1 %v1817_v51  ;;  %2437 = vmatpush3.msra.mxu0 %v1817_v51 }
  0xcd   : > { %2481 = vmatpush3.msra.mxu1 %v1817_v51  ;;  %2438 = vmatprep.mubr.f32.mxu0 %v2856_v22 }
  0xce   : > { %2444 = vmatprep.mubr.f32.mxu1 %v2899_v35  ;;  %2439 = vmatmul.mubr.f32.vlgmr.msra.gmra.mxu0 %v2859_v23 }
  0xcf   : > { %2445 = vmatmul.mubr.f32.vlgmr.msra.gmra.mxu1 %v2902_v36  ;;  %2441 = vmatprep.mubr.f32.mxu0 %v2877_v28 }
  0xd0   : > { %2447 = vmatprep.mubr.f32.mxu1 %v3035_v21 }
  0xd2   : > { %2442 = vmatmul.mubr.f32.gmra.mxu0 %v2880_v29 }
  0xd3   : > { %2448 = vmatmul.mubr.f32.gmra.mxu1 %v1816_v52 }
  0xee   : > { %v2088_v53 = vpop.f32.mrf.mxu0 }
  0xef   : > { %v2132_v57 = vpop.f32.mrf.mxu1 }
  0xf0   : > { %v375_v56 = vpop.f32.mrf.mxu0  ;;  %v486_v3 = vadd.f32 %v2132_v57, %v2088_v53 }
  0xf1   : > { %v480_v61 = vpop.f32.mrf.mxu1 }
  0xf2   : > { %v481_v11 = vadd.f32 %v480_v61, %v375_v56 }
 0x103   : > { %v2091_v60 = vpop.f32.mrf.mxu0 }
 0x104   : > { %v2135_v35 = vpop.f32.mrf.mxu1 }
 0x105   : > { %v3162_v22 = vpop.f32.mrf.mxu0 }
 0x106   : > { %3237 = vst [vmem:[#allocation2_spill] sm:$0xff] %v3162_v22  ;;  %v490_v23 = vpop.f32.mrf.mxu1 }
 0x109   : > { %v2094_v0 = vpop.f32.mrf.mxu0 }
 0x10a   : > { %v2138_v36 = vpop.f32.mrf.mxu1 }
 0x10b   : > { %v395_v1 = vpop.f32.mrf.mxu0  ;;  %v506_v6 = vadd.f32 %v2138_v36, %v2094_v0 }
 0x10c   : > { %v500_v28 = vpop.f32.mrf.mxu1 }
 0x10d   : > { %v501_v40 = vadd.f32 %v500_v28, %v395_v1 }
 0x10f   : > { %v2097_v4 = vpop.f32.mrf.mxu0 }
 0x110   : > { %v2141_v5 = vpop.f32.mrf.mxu1 }
 0x111   : > { %v405_v34 = vpop.f32.mrf.mxu0 }
 0x112   : > { %v510_v9 = vpop.f32.mrf.mxu1 }
 0x113   : > { %v511_v57 = vadd.f32 %v510_v9, %v405_v34 }
 0x116   : > { %v2176_v8 = vpop.f32.mrf.mxu0 }
 0x117   : > { %v2220_v12 = vpop.f32.mrf.mxu1  ;;  %v650_v49 = vadd.f32 %v2176_v8, %v486_v3 }
 0x118   : > { %v610_v29 = vpop.f32.mrf.mxu0 }
 0x119   : > { %v751_v14 = vpop.f32.mrf.mxu1  ;;  %v649_v51 = vadd.f32 %v610_v29, %v481_v11 }
 0x11c   : > { %v2179_v13 = vpop.f32.mrf.mxu0 }
 0x11e   : > { %v620_v15 = vpop.f32.mrf.mxu0 }
 0x11f   : > { %v2223_v16 = vpop.f32.mrf.mxu1 }
 0x121   : > { %v3164_v18 = vpop.f32.mrf.mxu1 }
 0x122   : > { %v2182_v17 = vpop.f32.mrf.mxu0  ;;  %3238 = vst [vmem:[#allocation3_spill] sm:$0xff] %v3164_v18 }
 0x123   : > { %v654_v50 = vadd.f32 %v2182_v17, %v506_v6 }
 0x124   : > { %v630_v19 = vpop.f32.mrf.mxu0 }
 0x125   : > { %v2226_v20 = vpop.f32.mrf.mxu1  ;;  %v653_v52 = vadd.f32 %v630_v19, %v501_v40 }
 0x126   : > { %v795_v22 = vadd.f32 %v2226_v20, %v654_v50 }
 0x127   : > { %v771_v24 = vpop.f32.mrf.mxu1 }
 0x128   : > { %v2185_v21 = vpop.f32.mrf.mxu0 }
 0x129   : > { %v3247_v19 = vld [vmem:[#allocation3_spill] sm:$0xff] }
 0x12a   : > { %v640_v25 = vpop.f32.mrf.mxu0 }
 0x12b   : > { %v2229_v26 = vpop.f32.mrf.mxu1  ;;  %v655_v28 = vadd.f32 %v640_v25, %v511_v57 }
 0x12d   : > { %v781_v30 = vpop.f32.mrf.mxu1 }
 0x12e   : > { %v796_v34 = vadd.f32 %v781_v30, %v655_v28 }
 0x13e   : > { %v2264_v27 = vpop.f32.mrf.mxu0 }
 0x13f   : > { %v2308_v31 = vpop.f32.mrf.mxu1 }
 0x140   : > { %v889_v32 = vpop.f32.mrf.mxu0 }
 0x141   : > { %v1027_v33 = vpop.f32.mrf.mxu1 }
 0x144   : > { %v2267_v37 = vpop.f32.mrf.mxu0 }
 0x146   : > { %v899_v39 = vpop.f32.mrf.mxu0 }
 0x147   : > { %v3166_v38 = vpop.f32.mrf.mxu1 }
 0x148   : > { %3239 = vst [vmem:[#allocation4_spill] sm:$0xff] %v3166_v38 }
 0x149   : > { %v3168_v41 = vpop.f32.mrf.mxu1 }
 0x14a   : > { %3240 = vst [vmem:[#allocation5_spill] sm:$0xff] %v3168_v41  ;;  %v2270_v42 = vpop.f32.mrf.mxu0  ;;  %v516_v41 = vadd.f32 %v2141_v5, %v2097_v4 }
 0x14b   : > { %v933_v61 = vadd.f32 %v2270_v42, %v795_v22 }
 0x14c   : > { %v909_v44 = vpop.f32.mrf.mxu0  ;;  %v656_v36 = vadd.f32 %v2185_v21, %v516_v41 }
 0x14d   : > { %v2314_v43 = vpop.f32.mrf.mxu1 }
 0x14e   : > { %v797_v5 = vadd.f32 %v2229_v26, %v656_v36  ;;  %v1071_v17 = vadd.f32 %v2314_v43, %v933_v61 }
 0x14f   : > { %v1047_v45 = vpop.f32.mrf.mxu1  ;;  %v3248_v26 = vld [vmem:[#allocation4_spill] sm:$0xff] }
 0x150   : > { %v2273_v46 = vpop.f32.mrf.mxu0 }
 0x152   : > { %v919_v48 = vpop.f32.mrf.mxu0 }
 0x153   : > { %v2317_v47 = vpop.f32.mrf.mxu1 }
 0x155   : > { %v3170_v55 = vpop.f32.mrf.mxu1 }
 0x156   : > { %3241 = vst [vmem:[#allocation6_spill] sm:$0xff] %v3170_v55  ;;  %v496_v55 = vadd.f32 %v2135_v35, %v2091_v60 }
 0x158   : > { %v652_v0 = vadd.f32 %v2179_v13, %v496_v55  ;;  %v935_v13 = vadd.f32 %v2273_v46, %v797_v5  ;;  %v1492_v55 = vld [vmem:[%s3188_s11 + $0x8] sm:$0xff] }
 0x15a   : > { %v793_v4 = vadd.f32 %v2223_v16, %v652_v0 }
 0x15c   : > { %v931_v9 = vadd.f32 %v2267_v37, %v793_v4 }
 0x15d   : > { %v3250_v43 = vld [vmem:[#allocation6_spill] sm:$0xff] }
 0x15e   : > { %v1069_v30 = vadd.f32 %v3248_v26, %v931_v9 }
 0x166   : > { %v2352_v54 = vpop.f32.mrf.mxu0 }
 0x167   : > { %v2396_v58 = vpop.f32.mrf.mxu1 }
 0x168   : > { %v1168_v59 = vpop.f32.mrf.mxu0 }
 0x169   : > { %v3172_v62 = vpop.f32.mrf.mxu1 }
 0x16a   : > { %3242 = vst [vmem:[#allocation7_spill] sm:$0xff] %v3172_v62  ;;  %v791_v62 = vadd.f32 %v2220_v12, %v650_v49  ;;  %v1495_v49 = vld [vmem:[%s3188_s11 + $0x20] sm:$0xff] }
 0x16c   : > { %v2355_v63 = vpop.f32.mrf.mxu0  ;;  %v929_v56 = vadd.f32 %v2264_v27, %v791_v62  ;;  %v934_v27 = vadd.f32 %v919_v48, %v796_v34 }
 0x16e   : > { %v3176_v7 = vpop.f32.mrf.mxu0  ;;  %v1067_v12 = vadd.f32 %v2308_v31, %v929_v56  ;;  %v1073_v31 = vadd.f32 %v2317_v47, %v935_v13 }
 0x16f   : > { %v3174_v2 = vpop.f32.mrf.mxu1  ;;  %3244 = vst [vmem:[#allocation9_spill] sm:$0xff] %v3176_v7  ;;  %v790_v7 = vadd.f32 %v751_v14, %v649_v51 }
 0x170   : > { %3243 = vst [vmem:[#allocation8_spill] sm:$0xff] %v3174_v2  ;;  %v3246_v2 = vld [vmem:[#allocation2_spill] sm:$0xff]  ;;  %v1208_v21 = vadd.f32 %v2352_v54, %v1067_v12 }
 0x171   : > { %v3178_v10 = vpop.f32.mrf.mxu1  ;;  %v491_v53 = vadd.f32 %v490_v23, %v3246_v2  ;;  %v928_v60 = vadd.f32 %v889_v32, %v790_v7  ;;  %v3251_v62 = vld [vmem:[#allocation7_spill] sm:$0xff] }
 0x172   : > { %3245 = vst [vmem:[#allocation10_spill] sm:$0xff] %v3178_v10  ;;  %v2358_v38 = vpop.f32.mrf.mxu0  ;;  %v794_v10 = vadd.f32 %v771_v24, %v653_v52  ;;  %v1346_v41 = vadd.f32 %v2396_v58, %v1208_v21 }
 0x173   : > { %v651_v1 = vadd.f32 %v620_v15, %v491_v53  ;;  %v1066_v22 = vadd.f32 %v1027_v33, %v928_v60  ;;  %v1212_v24 = vadd.f32 %v2358_v38, %v1071_v17  ;;  %v3249_v38 = vld [vmem:[#allocation5_spill] sm:$0xff] }
 0x174   : > { %v1188_v8 = vpop.f32.mrf.mxu0  ;;  %v932_v35 = vadd.f32 %v909_v44, %v794_v10  ;;  %v1072_v44 = vadd.f32 %v3250_v43, %v934_v27  ;;  %v1833_v10 = vld [vmem:[%s3234_s2] ss:$0 sm:$0xff]  ;;  %v1494_v60 = vld [vmem:[%s3188_s11 + $0x18] sm:$0xff] }
 0x175   : > { %v2402_v18 = vpop.f32.mrf.mxu1  ;;  %v792_v23 = vadd.f32 %v3247_v19, %v651_v1  ;;  %v1207_v32 = vadd.f32 %v1168_v59, %v1066_v22  ;;  %v1496_v59 = vld [vmem:[%s3188_s11 + $0x28] sm:$0xff]  ;;  %v1493_v22 = vld [vmem:[%s3188_s11 + $0x10] sm:$0xff] }
 0x176   : > { %v1070_v15 = vadd.f32 %v1047_v45, %v932_v35  ;;  %v1350_v42 = vadd.f32 %v2402_v18, %v1212_v24  ;;  %v1210_v45 = vadd.f32 %v2355_v63, %v1069_v30  ;;  %v3252_v7 = vld [vmem:[#allocation9_spill] sm:$0xff]  ;;  %v1491_v63 = vld [vmem:[%s3188_s11] sm:$0xff] }
 0x177   : > { %v1326_v29 = vpop.f32.mrf.mxu1  ;;  %v930_v25 = vadd.f32 %v899_v39, %v792_v23  ;;  %v1345_v2 = vadd.f32 %v3251_v62, %v1207_v32  ;;  %v3253_v57 = vld [vmem:[#allocation8_spill] sm:$0xff]  ;;  %v1498_v35 = vld [vmem:[%s3188_s11 + $0x38] sm:$0xff] }
 0x178   : > { %v2361_v14 = vpop.f32.mrf.mxu0  ;;  %v1211_v16 = vadd.f32 %v1188_v8, %v1070_v15  ;;  %v1348_v0 = vadd.f32 %v3253_v57, %v1210_v45  ;;  %v1497_v15 = vld [vmem:[%s3188_s11 + $0x30] sm:$0xff] }
 0x179   : > { %v1068_v39 = vadd.f32 %v3249_v38, %v930_v25  ;;  %v1214_v46 = vadd.f32 %v2361_v14, %v1073_v31  ;;  %v3254_v4 = vld [vmem:[#allocation10_spill] sm:$0xff] }
 0x17a   : > { %v1198_v37 = vpop.f32.mrf.mxu0  ;;  %v1349_v3 = vadd.f32 %v1326_v29, %v1211_v16 }
 0x17b   : > { %v2405_v20 = vpop.f32.mrf.mxu1  ;;  %v1209_v58 = vadd.f32 %v3252_v7, %v1068_v39  ;;  %v1213_v18 = vadd.f32 %v1198_v37, %v1072_v44 }
 0x17c   : > { %v1352_v36 = vadd.f32 %v2405_v20, %v1214_v46 }
 0x17d   : > { %v1336_v33 = vpop.f32.mrf.mxu1  ;;  %v1347_v5 = vadd.f32 %v3254_v4, %v1209_v58 }
 0x17e   : > { %v1351_v12 = vadd.f32 %v1336_v33, %v1213_v18 }
 0x18e   : > { %v2440_v48 = vpop.f32.mrf.mxu0 }
 0x18f   : > { %v2446_v54 = vpop.f32.mrf.mxu1  ;;  %v1484_v47 = vadd.f32 %v2440_v48, %v1346_v41 }
 0x190   : > { %v1488_v6 = vadd.f32 %v2446_v54, %v1350_v42  ;;  %v1444_v11 = vpop.f32.mrf.mxu0 }
 0x191   : > { %v1464_v40 = vpop.f32.mrf.mxu1  ;;  %v1500_v50 = vadd.f32 %v1492_v55, %v1484_v47  ;;  %v1483_v52 = vadd.f32 %v1444_v11, %v1345_v2 }
 0x192   : > { %v1504_v51 = vadd.f32 %v1496_v59, %v1488_v6  ;;  %v1487_v53 = vadd.f32 %v1464_v40, %v1349_v3  ;;  %v2443_v56 = vpop.f32.mrf.mxu0 }
 0x193   : > { %v2449_v61 = vpop.f32.mrf.mxu1  ;;  %v1515_v1 = vadd.f32 %v1833_v10, %v1500_v50  ;;  %v1499_v8 = vadd.f32 %v1491_v63, %v1483_v52  ;;  %v1486_v17 = vadd.f32 %v2443_v56, %v1348_v0 }
 0x194   : > { %v1519_v28 = vadd.f32 %v1833_v10, %v1504_v51  ;;  %v1503_v29 = vadd.f32 %v1495_v49, %v1487_v53  ;;  %v1490_v19 = vadd.f32 %v2449_v61, %v1352_v36  ;;  %v1454_v23 = vpop.f32.mrf.mxu0 }
 0x195   : > { %v1474_v34 = vpop.f32.mrf.mxu1  ;;  %v1523_v9 = vmax.f32 %v1515_v1, 0.0  ;;  %v1514_v14 = vadd.f32 %v1833_v10, %v1499_v8  ;;  %v1502_v21 = vadd.f32 %v1494_v60, %v1486_v17  ;;  %v1485_v25 = vadd.f32 %v1454_v23, %v1347_v5 }
 0x196   : > { %v1527_v13 = vmax.f32 %v1519_v28, 0.0  ;;  %v1518_v20 = vadd.f32 %v1833_v10, %v1503_v29  ;;  %v1506_v24 = vadd.f32 %v1498_v35, %v1490_v19  ;;  %v1489_v27 = vadd.f32 %v1474_v34, %v1351_v12 }
 0x197   : > { %1531 = vst [vmem:[%s3211_s21 + $0x8] sm:$0xff] %v1523_v9  ;;  %v1522_v32 = vmax.f32 %v1514_v14, 0.0  ;;  %v1517_v26 = vadd.f32 %v1833_v10, %v1502_v21  ;;  %v1501_v31 = vadd.f32 %v1493_v22, %v1485_v25 }
 0x198   : > { %1535 = vst [vmem:[%s3211_s21 + $0x28] sm:$0xff] %v1527_v13  ;;  %v1526_v16 = vmax.f32 %v1518_v20, 0.0  ;;  %v1521_v30 = vadd.f32 %v1833_v10, %v1506_v24  ;;  %v1505_v37 = vadd.f32 %v1497_v15, %v1489_v27 }
 0x199   : > { %1530 = vst [vmem:[%s3211_s21] sm:$0xff] %v1522_v32  ;;  %v1525_v33 = vmax.f32 %v1517_v26, 0.0  ;;  %v1516_v42 = vadd.f32 %v1833_v10, %v1501_v31 }
 0x19a   : > { %1534 = vst [vmem:[%s3211_s21 + $0x20] sm:$0xff] %v1526_v16  ;;  %v1529_v41 = vmax.f32 %v1521_v30, 0.0  ;;  %v1520_v38 = vadd.f32 %v1833_v10, %v1505_v37 }
 0x19b   : > { %1533 = vst [vmem:[%s3211_s21 + $0x18] sm:$0xff] %v1525_v33  ;;  %v1524_v39 = vmax.f32 %v1516_v42, 0.0 }
 0x19c   : > { %1537 = vst [vmem:[%s3211_s21 + $0x38] sm:$0xff] %v1529_v41  ;;  %v1528_v43 = vmax.f32 %v1520_v38, 0.0 }
 0x19d   : > { %1532 = vst [vmem:[%s3211_s21 + $0x10] sm:$0xff] %v1524_v39 }
 0x19e   : > { %1536 = vst [vmem:[%s3211_s21 + $0x30] sm:$0xff] %v1528_v43 }
 0x19f PF: > { %s14_s17 = sadd.s32 1, %s2529_s17   ;;  %s3255_s15 = smov %s2525_s16 }
 0x1a0   : > { %p11_p5 = scmp.ge.s32.totalorder %s14_s17, 4   ;;  %s3256_s16 = smov %s3258_s18 }
 0x1a2   :  { %13 = sbr.rel (!%p11_p5) target bundleno = 2 (0x2), region = 80 }

</bundles_post_ra>
